<compile_context>
chip_gen: v5e
topology: v5e:2x2
jax: 0.10.0
libtpu: 0.0.40
codegen_flags: <defaults>
</compile_context>

<pallas_src>
import functools

import jax
import jax.numpy as jnp
import numpy as np
from jax import lax
from jax.experimental import pallas as pl
from jax.experimental.pallas import tpu as pltpu


def _round_up(x, m):
    return (x + m - 1) // m * m


def _pick_batch_tile(n):
    """Images per grid step: amortize per-step overhead, keep >= 2 grid steps."""
    for bt in (4, 2):
        if n % bt == 0 and n // bt >= 2:
            return bt
    return 1


def _conv3x3s2_kernel(x_ref, w_ref, b_ref, *rest, bt, ho, wo_pad, cinp,
                      emit_relu_bf16):
    """3x3 / stride-2 / pad-1 conv for a tile of `bt` images.

    x_ref  : (bt, 6, (ho+1)*wo_pad, cinp)  bf16 pre-shifted slabs; slab 3*ph+kw
             holds x_pad[2a+ph, 2b+kw, :] at flattened row a*wo_pad + b.
    w_ref  : (9*cinp, coutp)               bf16 K-concatenated tap-major weights.
    b_ref  : (1, coutp)                    f32 bias.
    o_ref  : (bt, ho*wo_pad, coutp)        f32, rows flattened as oh*wo_pad+ow.
    r_ref  : (bt, ho*wo_pad, coutp)        bf16 relu(o)   (only if emit_relu_bf16)
    col_ref: (bt*ho*wo_pad, 9*cinp)        bf16 VMEM scratch (im2col LHS).
    """
    if emit_relu_bf16:
        o_ref, r_ref, col_ref = rest
    else:
        o_ref, col_ref = rest
        r_ref = None
    m = ho * wo_pad
    coutp = w_ref.shape[-1]

    # Build the im2col LHS: 9 contiguous, aligned copies.  wo_pad % 16 == 0 and
    # cinp % 128 == 0 make every merge-reshape a view and every scratch write a
    # lane/sublane-aligned full-tile store.
    for kh in range(3):
        ph, ih = kh % 2, kh // 2
        for kw in range(3):
            t = 3 * kh + kw
            slab = 3 * ph + kw
            sub = x_ref[:, slab, ih * wo_pad:ih * wo_pad + m, :]  # (bt, m, cinp)
            col_ref[:, t * cinp:(t + 1) * cinp] = sub.reshape(bt * m, cinp)

    # One long-K matmul: accumulation stays inside the MXU (f32 internal acc),
    # so there is no per-tap accumulator spill/reload VMEM traffic.
    acc = jnp.dot(col_ref[...], w_ref[...], preferred_element_type=jnp.float32)
    acc = acc + b_ref[...]
    acc = acc.reshape(bt, m, coutp)
    o_ref[...] = acc
    if emit_relu_bf16:
        # ReLU exactly once per element; bf16 feed for the next conv halves the
        # intermediate HBM write+read.
        r_ref[...] = jnp.maximum(acc, 0.0).astype(jnp.bfloat16)


def _make_conv_slabs(x_nhwc, ho, wo_pad, cinp):
    """Pre-shifted slab layout for a 3x3 / stride-2 / pad-1 conv.

    Returns (N, 6, (ho+1)*wo_pad, cinp) bf16 with, for s = 3*ph + kw
    (ph in {0,1} = output-row parity, kw in {0,1,2} = column shift):
      out[n, s, a*wo_pad + b, c] == x_pad1[n, 2a+ph, 2b+kw, c]
    where x_pad1 is x zero-padded by 1 on top/left (the conv padding) plus
    enough zero rows/cols on the bottom/right, channels zero-padded to cinp.
    Extra zero rows/cols only feed output columns the caller slices away.
    """
    n, h, w, c = x_nhwc.shape
    h2p = ho + 1
    xp = jnp.pad(x_nhwc.astype(jnp.bfloat16),
                 ((0, 0), (1, 2 * h2p - h - 1), (1, 2 * wo_pad + 1 - w),
                  (0, cinp - c)))
    slabs = []
    for ph in range(2):
        for kw in range(3):
            slabs.append(xp[:, ph::2, kw:kw + 2 * wo_pad:2, :])
    out = jnp.stack(slabs, axis=1)                  # (n, 6, h2p, wo_pad, cinp)
    return out.reshape(n, 6, h2p * wo_pad, cinp)


def conv3x3_s2_pallas(x_nhwc, weight_oihw, bias, *, coutp=None,
                      emit_relu_bf16=False):
    """PyTorch Conv2d(kernel=3, stride=2, padding=1) semantics, NHWC in/out.

    Returns (out, relu_out): out is (N, Ho, Wo, coutp) float32; relu_out is
    (N, Ho, Wo, coutp) bfloat16 (or None).  Channel lanes >= Cout are exactly
    zero, so either result can be fed straight into the next conv.
    NOTE: any input channel lanes beyond the weight's Cin are assumed to be
    exactly zero (this holds for outputs produced by this function).
    """
    n, h, w, cin_x = x_nhwc.shape
    cout, w_cin = weight_oihw.shape[0], weight_oihw.shape[1]
    assert cin_x >= w_cin, "input may carry zero-padded channels, never fewer"
    cinp = _round_up(cin_x, 128)
    if coutp is None:
        # 128 alignment suffices on v5e; real RetinaNet channels (256) are
        # already 256-aligned for the v6e/v7x 2x256^2 MXU.
        coutp = _round_up(cout, 128)
    ho, wo = (h + 1) // 2, (w + 1) // 2
    wo_pad = _round_up(wo, 16)          # bf16 sublane tile -> view-only flatten
    h2p = ho + 1
    m = ho * wo_pad
    bt = _pick_batch_tile(n)
    nb = n // bt

    slabs = _make_conv_slabs(x_nhwc, ho, wo_pad, cinp)

    # (Cout, Cin, 3, 3) -> (kh, kw, Cin, Cout) -> per-tap zero-pad -> K-concat.
    wk = jnp.transpose(weight_oihw, (2, 3, 1, 0)).reshape(9, w_cin, cout)
    wk = jnp.pad(wk, ((0, 0), (0, cinp - w_cin), (0, coutp - cout)))
    wk = wk.astype(jnp.bfloat16).reshape(9 * cinp, coutp)
    bk = jnp.pad(bias, (0, coutp - cout)).astype(jnp.float32).reshape(1, coutp)

    if emit_relu_bf16:
        out_shape = (jax.ShapeDtypeStruct((n, m, coutp), jnp.float32),
                     jax.ShapeDtypeStruct((n, m, coutp), jnp.bfloat16))
        out_specs = (pl.BlockSpec((bt, m, coutp), lambda i: (i, 0, 0)),
                     pl.BlockSpec((bt, m, coutp), lambda i: (i, 0, 0)))
    else:
        out_shape = jax.ShapeDtypeStruct((n, m, coutp), jnp.float32)
        out_specs = pl.BlockSpec((bt, m, coutp), lambda i: (i, 0, 0))

    result = pl.pallas_call(
        functools.partial(_conv3x3s2_kernel, bt=bt, ho=ho, wo_pad=wo_pad,
                          cinp=cinp, emit_relu_bf16=emit_relu_bf16),
        grid=(nb,),
        out_shape=out_shape,
        in_specs=[
            pl.BlockSpec((bt, 6, h2p * wo_pad, cinp), lambda i: (i, 0, 0, 0)),
            pl.BlockSpec((9 * cinp, coutp), lambda i: (0, 0)),
            pl.BlockSpec((1, coutp), lambda i: (0, 0)),
        ],
        out_specs=out_specs,
        scratch_shapes=[pltpu.VMEM((bt * m, 9 * cinp), jnp.bfloat16)],
        compiler_params=pltpu.CompilerParams(
            dimension_semantics=("parallel",),      # megacore sharding
            vmem_limit_bytes=32 * 1024 * 1024,      # safe on v5e/v6e/v7x
        ),
    )(slabs, wk, bk)

    if emit_relu_bf16:
        y, r = result
    else:
        y, r = result, None
    # (N, Ho*Wo_pad, coutp) -> (N, Ho, Wo, coutp); drop padded output columns
    # (they hold conv-over-zeros = bias, so they must not leak downstream).
    y = y.reshape(n, ho, wo_pad, coutp)[:, :, :wo, :]
    if r is not None:
        r = r.reshape(n, ho, wo_pad, coutp)[:, :, :wo, :]
    return y, r


@jax.jit
def _p6p7_forward(x_nchw, p6_w, p6_b, p7_w, p7_b):
    cout = p6_w.shape[0]
    x_nhwc = jnp.transpose(x_nchw, (0, 2, 3, 1))    # NHWC inside
    # p6 = conv(x); also emit relu(p6) in bf16 as the feed for conv2.
    p6_full, p6_relu = conv3x3_s2_pallas(x_nhwc, p6_w, p6_b, emit_relu_bf16=True)
    # p7 = conv(relu(p6)); ReLU was already applied (once) inside kernel 1.
    p7_full, _ = conv3x3_s2_pallas(p6_relu, p7_w, p7_b, emit_relu_bf16=False)
    p6 = jnp.transpose(p6_full[..., :cout], (0, 3, 1, 2))
    p7 = jnp.transpose(p7_full[..., :cout], (0, 3, 1, 2))
    return p6, p7


class LastLevelP6P7:
    """JAX/Pallas port of torchvision's LastLevelP6P7 (RetinaNet P6/P7)."""

    def __init__(self, in_channels, out_channels, key):
        k1, k2 = jax.random.split(key)
        # kaiming_uniform_(a=1): bound = sqrt(6 / ((1 + a^2) * fan_in)) = sqrt(3 / fan_in)
        bnd6 = (3.0 / (in_channels * 9)) ** 0.5
        bnd7 = (3.0 / (out_channels * 9)) ** 0.5
        self.p6_w = jax.random.uniform(k1, (out_channels, in_channels, 3, 3),
                                       jnp.float32, -bnd6, bnd6)
        self.p6_b = jnp.zeros((out_channels,), jnp.float32)
        self.p7_w = jax.random.uniform(k2, (out_channels, out_channels, 3, 3),
                                       jnp.float32, -bnd7, bnd7)
        self.p7_b = jnp.zeros((out_channels,), jnp.float32)
        self.out_channels = out_channels
        self.use_P5 = in_channels == out_channels

    def __call__(self, p, c, names):
        p5, c5 = p[-1], c[-1]                       # NCHW, as in PyTorch
        x = p5 if self.use_P5 else c5
        p6, p7 = _p6p7_forward(x, self.p6_w, self.p6_b, self.p7_w, self.p7_b)
        p = list(p) + [p6, p7]
        names = list(names) + ["p6", "p7"]
        return p, names


def _ref_conv_nchw(x, w, b, stride=2, pad=1):
    y = lax.conv_general_dilated(
        x, w, window_strides=(stride, stride),
        padding=((pad, pad), (pad, pad)),
        dimension_numbers=("NCHW", "OIHW", "NCHW"))
    return y + b.reshape(1, -1, 1, 1)


if __name__ == "__main__":
    key = jax.random.PRNGKey(0)
    k_mod, k_c5, k_p5 = jax.random.split(key, 3)

    N, CIN, COUT, H, W = 2, 4, 8, 16, 16
    mod = LastLevelP6P7(CIN, COUT, k_mod)

    c5 = jax.random.normal(k_c5, (N, CIN, H, W), jnp.float32)    # backbone C5
    p5 = jax.random.normal(k_p5, (N, COUT, H, W), jnp.float32)   # FPN P5

    out_p, out_names = mod([p5], [c5], ["p5"])
    out_p = [jax.block_until_ready(t) for t in out_p]

    # Reference: XLA conv with the same rounding points (bf16 operands, f32 acc).
    def bf16_rt(t):
        return t.astype(jnp.bfloat16).astype(jnp.float32)

    x = p5 if mod.use_P5 else c5
    p6_ref = _ref_conv_nchw(bf16_rt(x), bf16_rt(mod.p6_w), mod.p6_b)
    # Validate conv7 against our own p6 so rounding noise doesn't compound.
    p7_ref = _ref_conv_nchw(bf16_rt(jnp.maximum(out_p[-2], 0.0)),
                            bf16_rt(mod.p7_w), mod.p7_b)

    np.testing.assert_allclose(np.asarray(out_p[-2]), np.asarray(p6_ref),
                               atol=2e-3, rtol=2e-3)
    np.testing.assert_allclose(np.asarray(out_p[-1]), np.asarray(p7_ref),
                               atol=2e-3, rtol=2e-3)
    assert out_names == ["p5", "p6", "p7"]
    assert out_p[-2].shape == (N, COUT, 8, 8) and out_p[-1].shape == (N, COUT, 4, 4)

    print("KERNEL_OK")
</pallas_src>

<mosaic_0001>
module attributes {stable_mosaic.version = 11 : i64} {
  func.func @_conv3x3s2_kernel(%arg0: i32, %arg1: memref<1x6x144x128xbf16, #tpu.memory_space<vmem>>, %arg2: memref<1152x128xbf16, #tpu.memory_space<vmem>>, %arg3: memref<1x128xf32, #tpu.memory_space<vmem>>, %arg4: memref<1x128x128xf32, #tpu.memory_space<vmem>>, %arg5: memref<1x128x128xbf16, #tpu.memory_space<vmem>>, %arg6: memref<128x1152xbf16, #tpu.memory_space<vmem>>) attributes {dimension_semantics = [#tpu.dimension_semantics<parallel>], iteration_bounds = array<i64: 2>, scalar_prefetch = 0 : i64, scratch_operands = 1 : i64, tpu.core_type = #tpu.core_type<tc>, window_params = [{transform_indices = @transform_0, window_bounds = array<i64: 1, 6, 144, 128>}, {pipeline_mode = #tpu.pipeline_mode<synchronous>, transform_indices = @transform_1, window_bounds = array<i64: 1152, 128>}, {pipeline_mode = #tpu.pipeline_mode<synchronous>, transform_indices = @transform_2, window_bounds = array<i64: 1, 128>}, {transform_indices = @transform_3, window_bounds = array<i64: 1, 128, 128>}, {transform_indices = @transform_4, window_bounds = array<i64: 1, 128, 128>}]} {
    %c0 = arith.constant 0 : index
    %c0_0 = arith.constant 0 : index
    %c0_1 = arith.constant 0 : index
    %c0_2 = arith.constant 0 : index
    %0 = vector.load %arg1[%c0, %c0_0, %c0_1, %c0_2] : memref<1x6x144x128xbf16, #tpu.memory_space<vmem>>, vector<1x1x128x128xbf16>
    %1 = vector.shape_cast %0 : vector<1x1x128x128xbf16> to vector<1x128x128xbf16>
    %2 = vector.shape_cast %1 : vector<1x128x128xbf16> to vector<128x128xbf16>
    %c0_3 = arith.constant 0 : index
    %c0_4 = arith.constant 0 : index
    %3 = vector.load %arg6[%c0_3, %c0_4] : memref<128x1152xbf16, #tpu.memory_space<vmem>>, vector<128x128xbf16>
    tpu.vector_store %arg6[%c0_3, %c0_4], %2 {strides = array<i32>} : memref<128x1152xbf16, #tpu.memory_space<vmem>>, vector<128x128xbf16>,
    %c0_5 = arith.constant 0 : index
    %c1 = arith.constant 1 : index
    %c0_6 = arith.constant 0 : index
    %c0_7 = arith.constant 0 : index
    %4 = vector.load %arg1[%c0_5, %c1, %c0_6, %c0_7] : memref<1x6x144x128xbf16, #tpu.memory_space<vmem>>, vector<1x1x128x128xbf16>
    %5 = vector.shape_cast %4 : vector<1x1x128x128xbf16> to vector<1x128x128xbf16>
    %6 = vector.shape_cast %5 : vector<1x128x128xbf16> to vector<128x128xbf16>
    %c0_8 = arith.constant 0 : index
    %c128 = arith.constant 128 : index
    %7 = vector.load %arg6[%c0_8, %c128] : memref<128x1152xbf16, #tpu.memory_space<vmem>>, vector<128x128xbf16>
    tpu.vector_store %arg6[%c0_8, %c128], %6 {strides = array<i32>} : memref<128x1152xbf16, #tpu.memory_space<vmem>>, vector<128x128xbf16>,
    %c0_9 = arith.constant 0 : index
    %c2 = arith.constant 2 : index
    %c0_10 = arith.constant 0 : index
    %c0_11 = arith.constant 0 : index
    %8 = vector.load %arg1[%c0_9, %c2, %c0_10, %c0_11] : memref<1x6x144x128xbf16, #tpu.memory_space<vmem>>, vector<1x1x128x128xbf16>
    %9 = vector.shape_cast %8 : vector<1x1x128x128xbf16> to vector<1x128x128xbf16>
    %10 = vector.shape_cast %9 : vector<1x128x128xbf16> to vector<128x128xbf16>
    %c0_12 = arith.constant 0 : index
    %c256 = arith.constant 256 : index
    %11 = vector.load %arg6[%c0_12, %c256] : memref<128x1152xbf16, #tpu.memory_space<vmem>>, vector<128x128xbf16>
    tpu.vector_store %arg6[%c0_12, %c256], %10 {strides = array<i32>} : memref<128x1152xbf16, #tpu.memory_space<vmem>>, vector<128x128xbf16>,
    %c0_13 = arith.constant 0 : index
    %c3 = arith.constant 3 : index
    %c0_14 = arith.constant 0 : index
    %c0_15 = arith.constant 0 : index
    %12 = vector.load %arg1[%c0_13, %c3, %c0_14, %c0_15] : memref<1x6x144x128xbf16, #tpu.memory_space<vmem>>, vector<1x1x128x128xbf16>
    %13 = vector.shape_cast %12 : vector<1x1x128x128xbf16> to vector<1x128x128xbf16>
    %14 = vector.shape_cast %13 : vector<1x128x128xbf16> to vector<128x128xbf16>
    %c0_16 = arith.constant 0 : index
    %c384 = arith.constant 384 : index
    %15 = vector.load %arg6[%c0_16, %c384] : memref<128x1152xbf16, #tpu.memory_space<vmem>>, vector<128x128xbf16>
    tpu.vector_store %arg6[%c0_16, %c384], %14 {strides = array<i32>} : memref<128x1152xbf16, #tpu.memory_space<vmem>>, vector<128x128xbf16>,
    %c0_17 = arith.constant 0 : index
    %c4 = arith.constant 4 : index
    %c0_18 = arith.constant 0 : index
    %c0_19 = arith.constant 0 : index
    %16 = vector.load %arg1[%c0_17, %c4, %c0_18, %c0_19] : memref<1x6x144x128xbf16, #tpu.memory_space<vmem>>, vector<1x1x128x128xbf16>
    %17 = vector.shape_cast %16 : vector<1x1x128x128xbf16> to vector<1x128x128xbf16>
    %18 = vector.shape_cast %17 : vector<1x128x128xbf16> to vector<128x128xbf16>
    %c0_20 = arith.constant 0 : index
    %c512 = arith.constant 512 : index
    %19 = vector.load %arg6[%c0_20, %c512] : memref<128x1152xbf16, #tpu.memory_space<vmem>>, vector<128x128xbf16>
    tpu.vector_store %arg6[%c0_20, %c512], %18 {strides = array<i32>} : memref<128x1152xbf16, #tpu.memory_space<vmem>>, vector<128x128xbf16>,
    %c0_21 = arith.constant 0 : index
    %c5 = arith.constant 5 : index
    %c0_22 = arith.constant 0 : index
    %c0_23 = arith.constant 0 : index
    %20 = vector.load %arg1[%c0_21, %c5, %c0_22, %c0_23] : memref<1x6x144x128xbf16, #tpu.memory_space<vmem>>, vector<1x1x128x128xbf16>
    %21 = vector.shape_cast %20 : vector<1x1x128x128xbf16> to vector<1x128x128xbf16>
    %22 = vector.shape_cast %21 : vector<1x128x128xbf16> to vector<128x128xbf16>
    %c0_24 = arith.constant 0 : index
    %c640 = arith.constant 640 : index
    %23 = vector.load %arg6[%c0_24, %c640] : memref<128x1152xbf16, #tpu.memory_space<vmem>>, vector<128x128xbf16>
    tpu.vector_store %arg6[%c0_24, %c640], %22 {strides = array<i32>} : memref<128x1152xbf16, #tpu.memory_space<vmem>>, vector<128x128xbf16>,
    %c0_25 = arith.constant 0 : index
    %c0_26 = arith.constant 0 : index
    %c16 = arith.constant 16 : index
    %c0_27 = arith.constant 0 : index
    %24 = vector.load %arg1[%c0_25, %c0_26, %c16, %c0_27] : memref<1x6x144x128xbf16, #tpu.memory_space<vmem>>, vector<1x1x128x128xbf16>
    %25 = vector.shape_cast %24 : vector<1x1x128x128xbf16> to vector<1x128x128xbf16>
    %26 = vector.shape_cast %25 : vector<1x128x128xbf16> to vector<128x128xbf16>
    %c0_28 = arith.constant 0 : index
    %c768 = arith.constant 768 : index
    %27 = vector.load %arg6[%c0_28, %c768] : memref<128x1152xbf16, #tpu.memory_space<vmem>>, vector<128x128xbf16>
    tpu.vector_store %arg6[%c0_28, %c768], %26 {strides = array<i32>} : memref<128x1152xbf16, #tpu.memory_space<vmem>>, vector<128x128xbf16>,
    %c0_29 = arith.constant 0 : index
    %c1_30 = arith.constant 1 : index
    %c16_31 = arith.constant 16 : index
    %c0_32 = arith.constant 0 : index
    %28 = vector.load %arg1[%c0_29, %c1_30, %c16_31, %c0_32] : memref<1x6x144x128xbf16, #tpu.memory_space<vmem>>, vector<1x1x128x128xbf16>
    %29 = vector.shape_cast %28 : vector<1x1x128x128xbf16> to vector<1x128x128xbf16>
    %30 = vector.shape_cast %29 : vector<1x128x128xbf16> to vector<128x128xbf16>
    %c0_33 = arith.constant 0 : index
    %c896 = arith.constant 896 : index
    %31 = vector.load %arg6[%c0_33, %c896] : memref<128x1152xbf16, #tpu.memory_space<vmem>>, vector<128x128xbf16>
    tpu.vector_store %arg6[%c0_33, %c896], %30 {strides = array<i32>} : memref<128x1152xbf16, #tpu.memory_space<vmem>>, vector<128x128xbf16>,
    %c0_34 = arith.constant 0 : index
    %c2_35 = arith.constant 2 : index
    %c16_36 = arith.constant 16 : index
    %c0_37 = arith.constant 0 : index
    %32 = vector.load %arg1[%c0_34, %c2_35, %c16_36, %c0_37] : memref<1x6x144x128xbf16, #tpu.memory_space<vmem>>, vector<1x1x128x128xbf16>
    %33 = vector.shape_cast %32 : vector<1x1x128x128xbf16> to vector<1x128x128xbf16>
    %34 = vector.shape_cast %33 : vector<1x128x128xbf16> to vector<128x128xbf16>
    %c0_38 = arith.constant 0 : index
    %c1024 = arith.constant 1024 : index
    %35 = vector.load %arg6[%c0_38, %c1024] : memref<128x1152xbf16, #tpu.memory_space<vmem>>, vector<128x128xbf16>
    tpu.vector_store %arg6[%c0_38, %c1024], %34 {strides = array<i32>} : memref<128x1152xbf16, #tpu.memory_space<vmem>>, vector<128x128xbf16>,
    %c0_39 = arith.constant 0 : index
    %c0_40 = arith.constant 0 : index
    %36 = vector.load %arg6[%c0_39, %c0_40] : memref<128x1152xbf16, #tpu.memory_space<vmem>>, vector<128x1152xbf16>
    %c0_41 = arith.constant 0 : index
    %c0_42 = arith.constant 0 : index
    %37 = vector.load %arg2[%c0_41, %c0_42] : memref<1152x128xbf16, #tpu.memory_space<vmem>>, vector<1152x128xbf16>
    %cst = arith.constant dense<0.000000e+00> : vector<128x128xf32>
    %38 = tpu.matmul %36, %37, %cst {dimension_numbers = #tpu.dot_dimension_numbers<[1], [0], [0], [1], [0, 0, 1, 1], [], []>} : vector<128x1152xbf16>, vector<1152x128xbf16>, vector<128x128xf32> -> vector<128x128xf32>
    %c0_43 = arith.constant 0 : index
    %c0_44 = arith.constant 0 : index
    %39 = vector.load %arg3[%c0_43, %c0_44] : memref<1x128xf32, #tpu.memory_space<vmem>>, vector<1x128xf32>
    %40 = vector.broadcast %39 : vector<1x128xf32> to vector<128x128xf32>
    %41 = arith.addf %38, %40 : vector<128x128xf32>
    %42 = vector.shape_cast %41 : vector<128x128xf32> to vector<1x128x128xf32>
    %c0_45 = arith.constant 0 : index
    %c0_46 = arith.constant 0 : index
    %c0_47 = arith.constant 0 : index
    %43 = vector.load %arg4[%c0_45, %c0_46, %c0_47] : memref<1x128x128xf32, #tpu.memory_space<vmem>>, vector<1x128x128xf32>
    tpu.vector_store %arg4[%c0_45, %c0_46, %c0_47], %42 {strides = array<i32>} : memref<1x128x128xf32, #tpu.memory_space<vmem>>, vector<1x128x128xf32>,
    %cst_48 = arith.constant 0.000000e+00 : f32
    %44 = vector.broadcast %cst_48 : f32 to vector<1x128x128xf32>
    %45 = arith.maximumf %42, %44 : vector<1x128x128xf32>
    %46 = arith.truncf %45 : vector<1x128x128xf32> to vector<1x128x128xbf16>
    %c0_49 = arith.constant 0 : index
    %c0_50 = arith.constant 0 : index
    %c0_51 = arith.constant 0 : index
    %47 = vector.load %arg5[%c0_49, %c0_50, %c0_51] : memref<1x128x128xbf16, #tpu.memory_space<vmem>>, vector<1x128x128xbf16>
    tpu.vector_store %arg5[%c0_49, %c0_50, %c0_51], %46 {strides = array<i32>} : memref<1x128x128xbf16, #tpu.memory_space<vmem>>, vector<1x128x128xbf16>,
    return
  }
  func.func @transform_0(%arg0: i32) -> (i32, i32, i32, i32) {
    %c0_i32 = arith.constant 0 : i32
    %c0_i32_0 = arith.constant 0 : i32
    %c0_i32_1 = arith.constant 0 : i32
    %c0_i32_2 = arith.constant 0 : i32
    return %arg0, %c0_i32, %c0_i32_0, %c0_i32_1 : i32, i32, i32, i32
  }
  func.func @transform_1(%arg0: i32) -> (i32, i32) {
    %c0_i32 = arith.constant 0 : i32
    %c0_i32_0 = arith.constant 0 : i32
    %c0_i32_1 = arith.constant 0 : i32
    return %c0_i32, %c0_i32_0 : i32, i32
  }
  func.func @transform_2(%arg0: i32) -> (i32, i32) {
    %c0_i32 = arith.constant 0 : i32
    %c0_i32_0 = arith.constant 0 : i32
    %c0_i32_1 = arith.constant 0 : i32
    return %c0_i32, %c0_i32_0 : i32, i32
  }
  func.func @transform_3(%arg0: i32) -> (i32, i32, i32) {
    %c0_i32 = arith.constant 0 : i32
    %c0_i32_0 = arith.constant 0 : i32
    %c0_i32_1 = arith.constant 0 : i32
    return %arg0, %c0_i32, %c0_i32_0 : i32, i32, i32
  }
  func.func @transform_4(%arg0: i32) -> (i32, i32, i32) {
    %c0_i32 = arith.constant 0 : i32
    %c0_i32_0 = arith.constant 0 : i32
    %c0_i32_1 = arith.constant 0 : i32
    return %arg0, %c0_i32, %c0_i32_0 : i32, i32, i32
  }
}

module attributes {stable_mosaic.version = 11 : i64} {
  func.func @_conv3x3s2_kernel(%arg0: i32, %arg1: memref<1x6x80x128xbf16, #tpu.memory_space<vmem>>, %arg2: memref<1152x128xbf16, #tpu.memory_space<vmem>>, %arg3: memref<1x128xf32, #tpu.memory_space<vmem>>, %arg4: memref<1x64x128xf32, #tpu.memory_space<vmem>>, %arg5: memref<64x1152xbf16, #tpu.memory_space<vmem>>) attributes {dimension_semantics = [#tpu.dimension_semantics<parallel>], iteration_bounds = array<i64: 2>, scalar_prefetch = 0 : i64, scratch_operands = 1 : i64, tpu.core_type = #tpu.core_type<tc>, window_params = [{transform_indices = @transform_0, window_bounds = array<i64: 1, 6, 80, 128>}, {pipeline_mode = #tpu.pipeline_mode<synchronous>, transform_indices = @transform_1, window_bounds = array<i64: 1152, 128>}, {pipeline_mode = #tpu.pipeline_mode<synchronous>, transform_indices = @transform_2, window_bounds = array<i64: 1, 128>}, {transform_indices = @transform_3, window_bounds = array<i64: 1, 64, 128>}]} {
    %c0 = arith.constant 0 : index
    %c0_0 = arith.constant 0 : index
    %c0_1 = arith.constant 0 : index
    %c0_2 = arith.constant 0 : index
    %0 = vector.load %arg1[%c0, %c0_0, %c0_1, %c0_2] : memref<1x6x80x128xbf16, #tpu.memory_space<vmem>>, vector<1x1x64x128xbf16>
    %1 = vector.shape_cast %0 : vector<1x1x64x128xbf16> to vector<1x64x128xbf16>
    %2 = vector.shape_cast %1 : vector<1x64x128xbf16> to vector<64x128xbf16>
    %c0_3 = arith.constant 0 : index
    %c0_4 = arith.constant 0 : index
    %3 = vector.load %arg5[%c0_3, %c0_4] : memref<64x1152xbf16, #tpu.memory_space<vmem>>, vector<64x128xbf16>
    tpu.vector_store %arg5[%c0_3, %c0_4], %2 {strides = array<i32>} : memref<64x1152xbf16, #tpu.memory_space<vmem>>, vector<64x128xbf16>,
    %c0_5 = arith.constant 0 : index
    %c1 = arith.constant 1 : index
    %c0_6 = arith.constant 0 : index
    %c0_7 = arith.constant 0 : index
    %4 = vector.load %arg1[%c0_5, %c1, %c0_6, %c0_7] : memref<1x6x80x128xbf16, #tpu.memory_space<vmem>>, vector<1x1x64x128xbf16>
    %5 = vector.shape_cast %4 : vector<1x1x64x128xbf16> to vector<1x64x128xbf16>
    %6 = vector.shape_cast %5 : vector<1x64x128xbf16> to vector<64x128xbf16>
    %c0_8 = arith.constant 0 : index
    %c128 = arith.constant 128 : index
    %7 = vector.load %arg5[%c0_8, %c128] : memref<64x1152xbf16, #tpu.memory_space<vmem>>, vector<64x128xbf16>
    tpu.vector_store %arg5[%c0_8, %c128], %6 {strides = array<i32>} : memref<64x1152xbf16, #tpu.memory_space<vmem>>, vector<64x128xbf16>,
    %c0_9 = arith.constant 0 : index
    %c2 = arith.constant 2 : index
    %c0_10 = arith.constant 0 : index
    %c0_11 = arith.constant 0 : index
    %8 = vector.load %arg1[%c0_9, %c2, %c0_10, %c0_11] : memref<1x6x80x128xbf16, #tpu.memory_space<vmem>>, vector<1x1x64x128xbf16>
    %9 = vector.shape_cast %8 : vector<1x1x64x128xbf16> to vector<1x64x128xbf16>
    %10 = vector.shape_cast %9 : vector<1x64x128xbf16> to vector<64x128xbf16>
    %c0_12 = arith.constant 0 : index
    %c256 = arith.constant 256 : index
    %11 = vector.load %arg5[%c0_12, %c256] : memref<64x1152xbf16, #tpu.memory_space<vmem>>, vector<64x128xbf16>
    tpu.vector_store %arg5[%c0_12, %c256], %10 {strides = array<i32>} : memref<64x1152xbf16, #tpu.memory_space<vmem>>, vector<64x128xbf16>,
    %c0_13 = arith.constant 0 : index
    %c3 = arith.constant 3 : index
    %c0_14 = arith.constant 0 : index
    %c0_15 = arith.constant 0 : index
    %12 = vector.load %arg1[%c0_13, %c3, %c0_14, %c0_15] : memref<1x6x80x128xbf16, #tpu.memory_space<vmem>>, vector<1x1x64x128xbf16>
    %13 = vector.shape_cast %12 : vector<1x1x64x128xbf16> to vector<1x64x128xbf16>
    %14 = vector.shape_cast %13 : vector<1x64x128xbf16> to vector<64x128xbf16>
    %c0_16 = arith.constant 0 : index
    %c384 = arith.constant 384 : index
    %15 = vector.load %arg5[%c0_16, %c384] : memref<64x1152xbf16, #tpu.memory_space<vmem>>, vector<64x128xbf16>
    tpu.vector_store %arg5[%c0_16, %c384], %14 {strides = array<i32>} : memref<64x1152xbf16, #tpu.memory_space<vmem>>, vector<64x128xbf16>,
    %c0_17 = arith.constant 0 : index
    %c4 = arith.constant 4 : index
    %c0_18 = arith.constant 0 : index
    %c0_19 = arith.constant 0 : index
    %16 = vector.load %arg1[%c0_17, %c4, %c0_18, %c0_19] : memref<1x6x80x128xbf16, #tpu.memory_space<vmem>>, vector<1x1x64x128xbf16>
    %17 = vector.shape_cast %16 : vector<1x1x64x128xbf16> to vector<1x64x128xbf16>
    %18 = vector.shape_cast %17 : vector<1x64x128xbf16> to vector<64x128xbf16>
    %c0_20 = arith.constant 0 : index
    %c512 = arith.constant 512 : index
    %19 = vector.load %arg5[%c0_20, %c512] : memref<64x1152xbf16, #tpu.memory_space<vmem>>, vector<64x128xbf16>
    tpu.vector_store %arg5[%c0_20, %c512], %18 {strides = array<i32>} : memref<64x1152xbf16, #tpu.memory_space<vmem>>, vector<64x128xbf16>,
    %c0_21 = arith.constant 0 : index
    %c5 = arith.constant 5 : index
    %c0_22 = arith.constant 0 : index
    %c0_23 = arith.constant 0 : index
    %20 = vector.load %arg1[%c0_21, %c5, %c0_22, %c0_23] : memref<1x6x80x128xbf16, #tpu.memory_space<vmem>>, vector<1x1x64x128xbf16>
    %21 = vector.shape_cast %20 : vector<1x1x64x128xbf16> to vector<1x64x128xbf16>
    %22 = vector.shape_cast %21 : vector<1x64x128xbf16> to vector<64x128xbf16>
    %c0_24 = arith.constant 0 : index
    %c640 = arith.constant 640 : index
    %23 = vector.load %arg5[%c0_24, %c640] : memref<64x1152xbf16, #tpu.memory_space<vmem>>, vector<64x128xbf16>
    tpu.vector_store %arg5[%c0_24, %c640], %22 {strides = array<i32>} : memref<64x1152xbf16, #tpu.memory_space<vmem>>, vector<64x128xbf16>,
    %c0_25 = arith.constant 0 : index
    %c0_26 = arith.constant 0 : index
    %c16 = arith.constant 16 : index
    %c0_27 = arith.constant 0 : index
    %24 = vector.load %arg1[%c0_25, %c0_26, %c16, %c0_27] : memref<1x6x80x128xbf16, #tpu.memory_space<vmem>>, vector<1x1x64x128xbf16>
    %25 = vector.shape_cast %24 : vector<1x1x64x128xbf16> to vector<1x64x128xbf16>
    %26 = vector.shape_cast %25 : vector<1x64x128xbf16> to vector<64x128xbf16>
    %c0_28 = arith.constant 0 : index
    %c768 = arith.constant 768 : index
    %27 = vector.load %arg5[%c0_28, %c768] : memref<64x1152xbf16, #tpu.memory_space<vmem>>, vector<64x128xbf16>
    tpu.vector_store %arg5[%c0_28, %c768], %26 {strides = array<i32>} : memref<64x1152xbf16, #tpu.memory_space<vmem>>, vector<64x128xbf16>,
    %c0_29 = arith.constant 0 : index
    %c1_30 = arith.constant 1 : index
    %c16_31 = arith.constant 16 : index
    %c0_32 = arith.constant 0 : index
    %28 = vector.load %arg1[%c0_29, %c1_30, %c16_31, %c0_32] : memref<1x6x80x128xbf16, #tpu.memory_space<vmem>>, vector<1x1x64x128xbf16>
    %29 = vector.shape_cast %28 : vector<1x1x64x128xbf16> to vector<1x64x128xbf16>
    %30 = vector.shape_cast %29 : vector<1x64x128xbf16> to vector<64x128xbf16>
    %c0_33 = arith.constant 0 : index
    %c896 = arith.constant 896 : index
    %31 = vector.load %arg5[%c0_33, %c896] : memref<64x1152xbf16, #tpu.memory_space<vmem>>, vector<64x128xbf16>
    tpu.vector_store %arg5[%c0_33, %c896], %30 {strides = array<i32>} : memref<64x1152xbf16, #tpu.memory_space<vmem>>, vector<64x128xbf16>,
    %c0_34 = arith.constant 0 : index
    %c2_35 = arith.constant 2 : index
    %c16_36 = arith.constant 16 : index
    %c0_37 = arith.constant 0 : index
    %32 = vector.load %arg1[%c0_34, %c2_35, %c16_36, %c0_37] : memref<1x6x80x128xbf16, #tpu.memory_space<vmem>>, vector<1x1x64x128xbf16>
    %33 = vector.shape_cast %32 : vector<1x1x64x128xbf16> to vector<1x64x128xbf16>
    %34 = vector.shape_cast %33 : vector<1x64x128xbf16> to vector<64x128xbf16>
    %c0_38 = arith.constant 0 : index
    %c1024 = arith.constant 1024 : index
    %35 = vector.load %arg5[%c0_38, %c1024] : memref<64x1152xbf16, #tpu.memory_space<vmem>>, vector<64x128xbf16>
    tpu.vector_store %arg5[%c0_38, %c1024], %34 {strides = array<i32>} : memref<64x1152xbf16, #tpu.memory_space<vmem>>, vector<64x128xbf16>,
    %c0_39 = arith.constant 0 : index
    %c0_40 = arith.constant 0 : index
    %36 = vector.load %arg5[%c0_39, %c0_40] : memref<64x1152xbf16, #tpu.memory_space<vmem>>, vector<64x1152xbf16>
    %c0_41 = arith.constant 0 : index
    %c0_42 = arith.constant 0 : index
    %37 = vector.load %arg2[%c0_41, %c0_42] : memref<1152x128xbf16, #tpu.memory_space<vmem>>, vector<1152x128xbf16>
    %cst = arith.constant dense<0.000000e+00> : vector<64x128xf32>
    %38 = tpu.matmul %36, %37, %cst {dimension_numbers = #tpu.dot_dimension_numbers<[1], [0], [0], [1], [0, 0, 1, 1], [], []>} : vector<64x1152xbf16>, vector<1152x128xbf16>, vector<64x128xf32> -> vector<64x128xf32>
    %c0_43 = arith.constant 0 : index
    %c0_44 = arith.constant 0 : index
    %39 = vector.load %arg3[%c0_43, %c0_44] : memref<1x128xf32, #tpu.memory_space<vmem>>, vector<1x128xf32>
    %40 = vector.broadcast %39 : vector<1x128xf32> to vector<64x128xf32>
    %41 = arith.addf %38, %40 : vector<64x128xf32>
    %42 = vector.shape_cast %41 : vector<64x128xf32> to vector<1x64x128xf32>
    %c0_45 = arith.constant 0 : index
    %c0_46 = arith.constant 0 : index
    %c0_47 = arith.constant 0 : index
    %43 = vector.load %arg4[%c0_45, %c0_46, %c0_47] : memref<1x64x128xf32, #tpu.memory_space<vmem>>, vector<1x64x128xf32>
    tpu.vector_store %arg4[%c0_45, %c0_46, %c0_47], %42 {strides = array<i32>} : memref<1x64x128xf32, #tpu.memory_space<vmem>>, vector<1x64x128xf32>,
    return
  }
  func.func @transform_0(%arg0: i32) -> (i32, i32, i32, i32) {
    %c0_i32 = arith.constant 0 : i32
    %c0_i32_0 = arith.constant 0 : i32
    %c0_i32_1 = arith.constant 0 : i32
    %c0_i32_2 = arith.constant 0 : i32
    return %arg0, %c0_i32, %c0_i32_0, %c0_i32_1 : i32, i32, i32, i32
  }
  func.func @transform_1(%arg0: i32) -> (i32, i32) {
    %c0_i32 = arith.constant 0 : i32
    %c0_i32_0 = arith.constant 0 : i32
    %c0_i32_1 = arith.constant 0 : i32
    return %c0_i32, %c0_i32_0 : i32, i32
  }
  func.func @transform_2(%arg0: i32) -> (i32, i32) {
    %c0_i32 = arith.constant 0 : i32
    %c0_i32_0 = arith.constant 0 : i32
    %c0_i32_1 = arith.constant 0 : i32
    return %c0_i32, %c0_i32_0 : i32, i32
  }
  func.func @transform_3(%arg0: i32) -> (i32, i32, i32) {
    %c0_i32 = arith.constant 0 : i32
    %c0_i32_0 = arith.constant 0 : i32
    %c0_i32_1 = arith.constant 0 : i32
    return %arg0, %c0_i32, %c0_i32_0 : i32, i32, i32
  }
}

</mosaic_0001>

<bundles_post_ra>
// kernel: _p6p7_forward.3
= control target key start
LH: loop header
LB: loop body
LE: loop exit
PB: predicated region body
PF: predicated region fallthrough
CT: control target
= control target key end

     0   :  { %s2109_s12 = smov 0   ;;  %s2481_s0 = inlined_call_operand.vmem [shape: bf16[2,6,80,128], index: 0, kind: input, shape index: {}]   ;;  %s2482_s1 = inlined_call_operand.vmem [shape: bf16[1152,128], index: 1, kind: input, shape index: {}]   ;;  %s2483_s2 = inlined_call_operand.vmem [shape: f32[1,128], index: 2, kind: input, shape index: {}]   ;;  %s2484_s3 = inlined_call_operand.vmem [shape: f32[2,64,128], index: 3, kind: output, shape index: {}]  }
   0x1 LB: > { %s1448_s13 = sadd.s32 4294967295, %s2087_s12   ;;  %p1452_p0 = scmp.ge.s32.totalorder %s2087_s12, 1  ;;  %s2087_s12 = sphi %s2109_s12, %s13_s12  }
   0x2   : > { %p137_p1 = scmp.lt.s32.totalorder %s2087_s12, 3 }
   0x4   : > { %p138_p2 = pnand %p1452_p0, %p137_p1 }
   0x5   : > { %p161_p3 = scmp.lt.s32.totalorder (!%p138_p2), %s1448_s13, 1 }
   0x6   : > { %141 = sbr.rel (%p138_p2) target bundleno = 330 (0x14a), region = 32 }
   0xb   : > { %v1990_v0 = vld [vmem:[%s2482_s1 + $0x38] sm:$0xff]  ;;  %v1989_v2 = vld [vmem:[%s2482_s1 + $0x30] sm:$0xff]  ;;  %s2486_s13 = smov (!%p161_p3, %s1448_s13), 1  ;;  %v1988_v6 = vld [vmem:[%s2482_s1 + $0x28] sm:$0xff] }
   0xc   : > { %v2006_v1 = vld [vmem:[%s2482_s1 + $0xb8] sm:$0xff]  ;;  %2055 = vmatpush.bf16.msra.mxu1 %v1990_v0  ;;  %1124 = vmatpush.bf16.msra.mxu0 %v1990_v0  ;;  %v2005_v3 = vld [vmem:[%s2482_s1 + $0xb0] sm:$0xff]  ;;  %s2071_s24 = smul.u32 240, %s2486_s13  ;;  %v2004_v7 = vld [vmem:[%s2482_s1 + $0xa8] sm:$0xff]  ;;  %s1946_s18 = sshll.u32 %s2486_s13, 6 }
   0xd   : > { %1182 = vmatpush.bf16.msra.mxu2 %v2006_v1  ;;  %v2014_v4 = vld [vmem:[%s2482_s1 + $0xf8] sm:$0xff]  ;;  %v2013_v5 = vld [vmem:[%s2482_s1 + $0xf0] sm:$0xff]  ;;  %v1987_v12 = vld [vmem:[%s2482_s1 + $0x20] sm:$0xff]  ;;  %s2454_s21 = scalar_lea.vmem %s2484_s3, %s1946_s18 }
   0xe   : > { %1211 = vmatpush.bf16.msra.mxu3 %v2014_v4  ;;  %s2144_s4 = scalar_lea.vmem %s2481_s0, %s2071_s24  ;;  %v2012_v13 = vld [vmem:[%s2482_s1 + $0xe8] sm:$0xff]  ;;  %v2003_v16 = vld [vmem:[%s2482_s1 + $0xa0] sm:$0xff]  ;;  %v1986_v21 = vld [vmem:[%s2482_s1 + $0x18] sm:$0xff] }
   0xf   : > { %v175_v8 = vld [vmem:[%s2144_s4 + $0x10] sm:$0xf]  ;;  %v176_v9 = vld [vmem:[%s2144_s4 + $0x14] sm:$0xf]  ;;  %v171_v10 = vld [vmem:[%s2144_s4] sm:$0xf] }
  0x10   : > { %2056 = vmatpush.bf16.msra.mxu1 %v1989_v2  ;;  %1125 = vmatpush.bf16.msra.mxu0 %v1989_v2  ;;  %183 = vst [vmem:[#allocation2 + $0x90] sm:$0xf] %v175_v8  ;;  %v172_v11 = vld [vmem:[%s2144_s4 + $0x4] sm:$0xf]  ;;  %v1464_v14 = vld [vmem:[%s2144_s4 + $0x50] sm:$0xf] }
  0x11   : > { %1183 = vmatpush.bf16.msra.mxu2 %v2005_v3  ;;  %184 = vst [vmem:[#allocation2 + $0xb4] sm:$0xf] %v176_v9  ;;  %v1465_v15 = vld [vmem:[%s2144_s4 + $0x54] sm:$0xf]  ;;  %v2011_v17 = vld [vmem:[%s2482_s1 + $0xe0] sm:$0xff]  ;;  %v2002_v23 = vld [vmem:[%s2482_s1 + $0x98] sm:$0xff] }
  0x12   : > { %1212 = vmatpush.bf16.msra.mxu3 %v2013_v5  ;;  %179 = vst [vmem:[#allocation2] sm:$0xf] %v171_v10  ;;  %v177_v18 = vld [vmem:[%s2144_s4 + $0x18] sm:$0xf]  ;;  %v178_v19 = vld [vmem:[%s2144_s4 + $0x1c] sm:$0xf] }
  0x13   : > { %180 = vst [vmem:[#allocation2 + $0x24] sm:$0xf] %v172_v11  ;;  %v173_v20 = vld [vmem:[%s2144_s4 + $0x8] sm:$0xf]  ;;  %v174_v22 = vld [vmem:[%s2144_s4 + $0xc] sm:$0xf] }
  0x14   : > { %2057 = vmatpush.bf16.msra.mxu1 %v1988_v6  ;;  %1126 = vmatpush.bf16.msra.mxu0 %v1988_v6  ;;  %213 = vst [vmem:[#allocation2 + $0x8] sm:$0xf] %v1464_v14  ;;  %v1472_v24 = vld [vmem:[%s2144_s4 + $0x78] sm:$0xf]  ;;  %v1473_v25 = vld [vmem:[%s2144_s4 + $0x7c] sm:$0xf] }
  0x15   : > { %1184 = vmatpush.bf16.msra.mxu2 %v2004_v7  ;;  %214 = vst [vmem:[#allocation2 + $0x2c] sm:$0xf] %v1465_v15  ;;  %v2010_v26 = vld [vmem:[%s2482_s1 + $0xd8] sm:$0xff]  ;;  %v1985_v27 = vld [vmem:[%s2482_s1 + $0x10] sm:$0xff]  ;;  %v1984_v32 = vld [vmem:[%s2482_s1 + $0x8] sm:$0xff] }
  0x16   : > { %1213 = vmatpush.bf16.msra.mxu3 %v2012_v13  ;;  %185 = vst [vmem:[#allocation2 + $0xd8] sm:$0xf] %v177_v18  ;;  %v2001_v28 = vld [vmem:[%s2482_s1 + $0x90] sm:$0xff]  ;;  %v1466_v29 = vld [vmem:[%s2144_s4 + $0x58] sm:$0xf]  ;;  %v2000_v34 = vld [vmem:[%s2482_s1 + $0x88] sm:$0xff] }
  0x17   : > { %186 = vst [vmem:[#allocation2 + $0xfc] sm:$0xf] %v178_v19  ;;  %v1467_v30 = vld [vmem:[%s2144_s4 + $0x5c] sm:$0xf]  ;;  %v2009_v31 = vld [vmem:[%s2482_s1 + $0xd0] sm:$0xff]  ;;  %v1983_v35 = vld [vmem:[%s2482_s1] sm:$0xff] }
  0x18   : > { %2058 = vmatpush.bf16.msra.mxu1 %v1987_v12  ;;  %1127 = vmatpush.bf16.msra.mxu0 %v1987_v12  ;;  %181 = vst [vmem:[#allocation2 + $0x48] sm:$0xf] %v173_v20  ;;  %v1456_v33 = vld [vmem:[%s2144_s4 + $0x28] sm:$0xf]  ;;  %v1457_v36 = vld [vmem:[%s2144_s4 + $0x2c] sm:$0xf] }
  0x19   : > { %1185 = vmatpush.bf16.msra.mxu2 %v2003_v16  ;;  %182 = vst [vmem:[#allocation2 + $0x6c] sm:$0xf] %v174_v22  ;;  %v1586_v37 = vld [vmem:[#allocation2 + $0x90] sm:$0xf]  ;;  %v1998_v38 = vld [vmem:[%s2482_s1 + $0x78] sm:$0xff]  ;;  %v1999_v39 = vld [vmem:[%s2482_s1 + $0x80] sm:$0xff] }
  0x1a   : > { %1214 = vmatpush.bf16.msra.mxu3 %v2011_v17  ;;  %230 = vst [vmem:[#allocation2 + $0xc] sm:$0xf] %v1472_v24  ;;  %v2008_v40 = vld [vmem:[%s2482_s1 + $0xc8] sm:$0xff]  ;;  %v1969_v41 = vld [vmem:[#allocation2 + $0xb0] sm:$0xf0]  ;;  %v2022_v44 = vld [vmem:[%s2482_s1 + $0x138] sm:$0xff] }
  0x1b   : > { %231 = vst [vmem:[#allocation2 + $0x30] sm:$0xf] %v1473_v25  ;;  %v1514_v42 = vld [vmem:[#allocation2] sm:$0xf]  ;;  %v1951_v43 = vld [vmem:[#allocation2 + $0x20] sm:$0xf0]  ;;  %v1587_v51 = vor.u32 %v1969_v41, %v1586_v37 }
  0x1c   : > { %2059 = vmatpush.bf16.msra.mxu1 %v1986_v21  ;;  %1128 = vmatpush.bf16.msra.mxu0 %v1986_v21  ;;  %215 = vst [vmem:[#allocation2 + $0x50] sm:$0xf] %v1466_v29  ;;  %v1522_v45 = vld [vmem:[#allocation2 + $0x8] sm:$0xf]  ;;  %v1952_v46 = vld [vmem:[#allocation2 + $0x28] sm:$0xf0]  ;;  %v1515_v53 = vor.u32 %v1951_v43, %v1514_v42 }
  0x1d   : > { %1186 = vmatpush.bf16.msra.mxu2 %v2002_v23  ;;  %216 = vst [vmem:[#allocation2 + $0x74] sm:$0xf] %v1467_v30  ;;  %v2038_v47 = vld [vmem:[%s2482_s1 + $0x1b8] sm:$0xff]  ;;  %v1474_v49 = vld [vmem:[%s2144_s4 + $0x80] sm:$0xf]  ;;  %v1997_v52 = vld [vmem:[%s2482_s1 + $0x70] sm:$0xff]  ;;  %v1523_v56 = vor.u32 %v1952_v46, %v1522_v45 }
  0x1e   : > { %1215 = vmatpush.bf16.msra.mxu3 %v2010_v26  ;;  %196 = vst [vmem:[#allocation2 + $0x4] sm:$0xf] %v1456_v33  ;;  %v1475_v50 = vld [vmem:[%s2144_s4 + $0x84] sm:$0xf]  ;;  %v1480_v55 = vld [vmem:[%s2144_s4 + $0xa0] sm:$0xf] }
  0x1f   : > { %197 = vst [vmem:[#allocation2 + $0x28] sm:$0xf] %v1457_v36  ;;  %v2007_v57 = vld [vmem:[%s2482_s1 + $0xc0] sm:$0xff]  ;;  %v2046_v58 = vld [vmem:[%s2482_s1 + $0x1f8] sm:$0xff]  ;;  %v2021_v62 = vld [vmem:[%s2482_s1 + $0x130] sm:$0xff] }
  0x20   : > { %2060 = vmatpush.bf16.msra.mxu1 %v1985_v27  ;;  %1129 = vmatpush.bf16.msra.mxu0 %v1985_v27  ;;  %232 = vst [vmem:[#allocation2 + $0x54] sm:$0xf] %v1474_v49  ;;  %v1481_v59 = vld [vmem:[%s2144_s4 + $0xa4] sm:$0xf]  ;;  %v1468_v60 = vld [vmem:[%s2144_s4 + $0x60] sm:$0xf] }
  0x21   : > { %1187 = vmatpush.bf16.msra.mxu2 %v2001_v28  ;;  %v1948_v48 = vld [vmem:[#allocation2 + $0xc] sm:$0xf]  ;;  %233 = vst [vmem:[#allocation2 + $0x78] sm:$0xf] %v1475_v50  ;;  %v1469_v61 = vld [vmem:[%s2144_s4 + $0x64] sm:$0xf] }
  0x22   : > { %1216 = vmatpush.bf16.msra.mxu3 %v2009_v31  ;;  %v1524_v54 = vld [vmem:[#allocation2 + $0x2c] sm:$0xf0]  ;;  %247 = vst [vmem:[#allocation2 + $0x10] sm:$0xf] %v1480_v55  ;;  %v1996_v1 = vld [vmem:[%s2482_s1 + $0x68] sm:$0xff]  ;;  %v1995_v7 = vld [vmem:[%s2482_s1 + $0x60] sm:$0xff] }
  0x23   : > { %v2037_v63 = vld [vmem:[%s2482_s1 + $0x1b0] sm:$0xff]  ;;  %248 = vst [vmem:[#allocation2 + $0x34] sm:$0xf] %v1481_v59  ;;  %v1527_v0 = vor.u32 %v1948_v48, %v1524_v54  ;;  %v2020_v5 = vld [vmem:[%s2482_s1 + $0x128] sm:$0xff]  ;;  %v2019_v9 = vld [vmem:[%s2482_s1 + $0x120] sm:$0xff] }
  0x24   : > { %2061 = vmatpush.bf16.msra.mxu1 %v1984_v32  ;;  %1130 = vmatpush.bf16.msra.mxu0 %v1984_v32  ;;  %217 = vst [vmem:[#allocation2 + $0x98] sm:$0xf] %v1468_v60  ;;  %v2045_v2 = vld [vmem:[%s2482_s1 + $0x1f0] sm:$0xff]  ;;  %v2036_v6 = vld [vmem:[%s2482_s1 + $0x1a8] sm:$0xff]  ;;  %v2035_v10 = vld [vmem:[%s2482_s1 + $0x1a0] sm:$0xff] }
  0x25   : > { %1188 = vmatpush.bf16.msra.mxu2 %v2000_v34  ;;  %218 = vst [vmem:[#allocation2 + $0xbc] sm:$0xf] %v1469_v61  ;;  %v1458_v3 = vld [vmem:[%s2144_s4 + $0x30] sm:$0xf]  ;;  %v1459_v4 = vld [vmem:[%s2144_s4 + $0x34] sm:$0xf] }
  0x26   : > { %1217 = vmatpush.bf16.msra.mxu3 %v2008_v40  ;;  %198 = vst [vmem:[#allocation2 + $0x4c] sm:$0xf] %v1458_v3  ;;  %v2044_v8 = vld [vmem:[%s2482_s1 + $0x1e8] sm:$0xff]  ;;  %v1622_v11 = vld [vmem:[#allocation2 + $0xd8] sm:$0xf]  ;;  %v1993_v29 = vld [vmem:[%s2482_s1 + $0x50] sm:$0xff] }
  0x27   : > { %199 = vst [vmem:[#allocation2 + $0x70] sm:$0xf] %v1459_v4  ;;  %v1994_v12 = vld [vmem:[%s2482_s1 + $0x58] sm:$0xff]  ;;  %v1550_v14 = vld [vmem:[#allocation2 + $0x48] sm:$0xf]  ;;  %v2017_v31 = vld [vmem:[%s2482_s1 + $0x110] sm:$0xff] }
  0x28   : > { %2062 = vmatpush.bf16.msra.mxu1 %v1983_v35  ;;  %1131 = vmatpush.bf16.msra.mxu0 %v1983_v35  ;;  %v1978_v13 = vld [vmem:[#allocation2 + $0xf8] sm:$0xf0]  ;;  %v1960_v15 = vld [vmem:[#allocation2 + $0x68] sm:$0xf0]  ;;  %v1558_v17 = vld [vmem:[#allocation2 + $0x50] sm:$0xf] }
  0x29   : > { %1189 = vmatpush.bf16.msra.mxu2 %v1999_v39  ;;  %v2018_v16 = vld [vmem:[%s2482_s1 + $0x118] sm:$0xff]  ;;  %v1961_v18 = vld [vmem:[#allocation2 + $0x70] sm:$0xf0]  ;;  %v1476_v20 = vld [vmem:[%s2144_s4 + $0x88] sm:$0xf]  ;;  %v1623_v22 = vor.u32 %v1978_v13, %v1622_v11  ;;  %v1551_v23 = vor.u32 %v1960_v15, %v1550_v14 }
  0x2a   : > { %1218 = vmatpush.bf16.msra.mxu3 %v2007_v57  ;;  %v1957_v19 = vld [vmem:[#allocation2 + $0x54] sm:$0xf]  ;;  %v1477_v21 = vld [vmem:[%s2144_s4 + $0x8c] sm:$0xf]  ;;  %234 = vst [vmem:[#allocation2 + $0x9c] sm:$0xf] %v1476_v20  ;;  %v1559_v26 = vor.u32 %v1961_v18, %v1558_v17 }
  0x2b   : > { %1142 = vmatmul.bf16.vlgmr.msra.gmra.mxu1 %v1587_v51  ;;  %1132 = vmatmul.bf16.vlgmr.msra.gmra.mxu0 %v1515_v53  ;;  %v1482_v24 = vld [vmem:[%s2144_s4 + $0xa8] sm:$0xf]  ;;  %v1483_v25 = vld [vmem:[%s2144_s4 + $0xac] sm:$0xf]  ;;  %v1560_v27 = vld [vmem:[#allocation2 + $0x74] sm:$0xf0] }
  0x2c   : > { %1153 = vmatpush.bf16.msrb.mxu1 %v1998_v38  ;;  %1240 = vmatpush.bf16.msrb.mxu0 %v2022_v44  ;;  %235 = vst [vmem:[#allocation2 + $0xc0] sm:$0xf] %v1477_v21  ;;  %v1470_v28 = vld [vmem:[%s2144_s4 + $0x68] sm:$0xf]  ;;  %v1471_v30 = vld [vmem:[%s2144_s4 + $0x6c] sm:$0xf]  ;;  %v1563_v32 = vor.u32 %v1957_v19, %v1560_v27 }
  0x2d   : > { %1298 = vmatpush.bf16.msrb.mxu2 %v2038_v47  ;;  %1219 = vmatmul.bf16.vlgmr.msra.gmra.mxu3 %v1527_v0  ;;  %249 = vst [vmem:[#allocation2 + $0x58] sm:$0xf] %v1482_v24  ;;  %v2034_v33 = vld [vmem:[%s2482_s1 + $0x198] sm:$0xff]  ;;  %v2043_v34 = vld [vmem:[%s2482_s1 + $0x1e0] sm:$0xff]  ;;  %v1992_v35 = vld [vmem:[%s2482_s1 + $0x48] sm:$0xff] }
  0x2e   : > { %1190 = vmatmul.bf16.vlgmr.msra.gmra.mxu2 %v1523_v56  ;;  %1327 = vmatpush.bf16.msrb.mxu3 %v2046_v58  ;;  %250 = vst [vmem:[#allocation2 + $0x7c] sm:$0xf] %v1483_v25  ;;  %v2033_v36 = vld [vmem:[%s2482_s1 + $0x190] sm:$0xff]  ;;  %v1460_v37 = vld [vmem:[%s2144_s4 + $0x38] sm:$0xf]  ;;  %v2016_v38 = vld [vmem:[%s2482_s1 + $0x108] sm:$0xff] }
  0x2f   : > { %219 = vst [vmem:[#allocation2 + $0xe0] sm:$0xf] %v1470_v28  ;;  %v2042_v39 = vld [vmem:[%s2482_s1 + $0x1d8] sm:$0xff]  ;;  %v1991_v41 = vld [vmem:[%s2482_s1 + $0x40] sm:$0xff]  ;;  %v1516_v46 = vld [vmem:[#allocation2 + $0x24] sm:$0xf0] }
  0x30   : > { %1154 = vmatpush.bf16.msrb.mxu1 %v1997_v52  ;;  %1241 = vmatpush.bf16.msrb.mxu0 %v2021_v62  ;;  %220 = vst [vmem:[#allocation2 + $0x104] sm:$0xf] %v1471_v30  ;;  %v1461_v40 = vld [vmem:[%s2144_s4 + $0x3c] sm:$0xf]  ;;  %v2015_v43 = vld [vmem:[%s2482_s1 + $0x100] sm:$0xff]  ;;  %v2029_v51 = vld [vmem:[%s2482_s1 + $0x170] sm:$0xff] }
  0x31   : > { %1299 = vmatpush.bf16.msrb.mxu2 %v2037_v63  ;;  %200 = vst [vmem:[#allocation2 + $0x94] sm:$0xf] %v1460_v37  ;;  %v2030_v42 = vld [vmem:[%s2482_s1 + $0x178] sm:$0xff]  ;;  %v1947_v44 = vld [vmem:[#allocation2 + $0x4] sm:$0xf]  ;;  %v2053_v53 = vld [vmem:[%s2482_s1 + $0x230] sm:$0xff] }
  0x32   : > { %1328 = vmatpush.bf16.msrb.mxu3 %v2045_v2  ;;  %201 = vst [vmem:[#allocation2 + $0xb8] sm:$0xf] %v1461_v40  ;;  %v2054_v45 = vld [vmem:[%s2482_s1 + $0x238] sm:$0xff]  ;;  %v1530_v47 = vld [vmem:[#allocation2 + $0x10] sm:$0xf]  ;;  %v1519_v56 = vor.u32 %v1947_v44, %v1516_v46  ;;  %v2028_v0 = vld [vmem:[%s2482_s1 + $0x168] sm:$0xff] }
  0x33   : > { %v1953_v48 = vld [vmem:[#allocation2 + $0x30] sm:$0xf0]  ;;  %v1594_v49 = vld [vmem:[#allocation2 + $0x98] sm:$0xf]  ;;  %v1970_v50 = vld [vmem:[#allocation2 + $0xb8] sm:$0xf0] }
  0x34   : > { %1155 = vmatpush.bf16.msrb.mxu1 %v1996_v1  ;;  %1242 = vmatpush.bf16.msrb.mxu0 %v2020_v5  ;;  %v1966_v52 = vld [vmem:[#allocation2 + $0x9c] sm:$0xf]  ;;  %v1478_v54 = vld [vmem:[%s2144_s4 + $0x90] sm:$0xf]  ;;  %v1479_v55 = vld [vmem:[%s2144_s4 + $0x94] sm:$0xf]  ;;  %v1531_v57 = vor.u32 %v1953_v48, %v1530_v47  ;;  %v1595_v60 = vor.u32 %v1970_v50, %v1594_v49 }
  0x35   : > { %1300 = vmatpush.bf16.msrb.mxu2 %v2036_v6  ;;  %236 = vst [vmem:[#allocation2 + $0xe4] sm:$0xf] %v1478_v54  ;;  %v1484_v58 = vld [vmem:[%s2144_s4 + $0xb0] sm:$0xf]  ;;  %v1485_v59 = vld [vmem:[%s2144_s4 + $0xb4] sm:$0xf] }
  0x36   : > { %1329 = vmatpush.bf16.msrb.mxu3 %v2044_v8  ;;  %v1596_v61 = vld [vmem:[#allocation2 + $0xbc] sm:$0xf0]  ;;  %237 = vst [vmem:[#allocation2 + $0x108] sm:$0xf] %v1479_v55  ;;  %v272_v62 = vld [vmem:[%s2144_s4 + $0x8] sm:$0xf] }
  0x37   : > { %251 = vst [vmem:[#allocation2 + $0xa0] sm:$0xf] %v1484_v58  ;;  %v273_v63 = vld [vmem:[%s2144_s4 + $0xc] sm:$0xf]  ;;  %v1599_v2 = vor.u32 %v1966_v52, %v1596_v61  ;;  %v2041_v3 = vld [vmem:[%s2482_s1 + $0x1d0] sm:$0xff]  ;;  %v2031_v4 = vld [vmem:[%s2482_s1 + $0x180] sm:$0xff] }
  0x38   : > { %1156 = vmatpush.bf16.msrb.mxu1 %v1995_v7  ;;  %1243 = vmatpush.bf16.msrb.mxu0 %v2019_v9  ;;  %v2032_v1 = vld [vmem:[%s2482_s1 + $0x188] sm:$0xff]  ;;  %252 = vst [vmem:[#allocation2 + $0xc4] sm:$0xf] %v1485_v59  ;;  %v1462_v7 = vld [vmem:[%s2144_s4 + $0x40] sm:$0xf]  ;;  %v2026_v11 = vld [vmem:[%s2482_s1 + $0x158] sm:$0xff] }
  0x39   : > { %1301 = vmatpush.bf16.msrb.mxu2 %v2035_v10  ;;  %280 = vst [vmem:[#allocation2 + $0x18] sm:$0xf] %v272_v62  ;;  %v2052_v5 = vld [vmem:[%s2482_s1 + $0x228] sm:$0xff]  ;;  %v1463_v8 = vld [vmem:[%s2144_s4 + $0x44] sm:$0xf]  ;;  %v2025_v18 = vld [vmem:[%s2482_s1 + $0x150] sm:$0xff] }
  0x3a   : > { %1330 = vmatpush.bf16.msrb.mxu3 %v2043_v34  ;;  %281 = vst [vmem:[#allocation2 + $0x3c] sm:$0xf] %v273_v63  ;;  %v2040_v6 = vld [vmem:[%s2482_s1 + $0x1c8] sm:$0xff]  ;;  %v2027_v9 = vld [vmem:[%s2482_s1 + $0x160] sm:$0xff]  ;;  %v1552_v13 = vld [vmem:[#allocation2 + $0x6c] sm:$0xf0] }
  0x3b   : > { %1147 = vmatmul.bf16.gmra.mxu1 %v1623_v22  ;;  %1137 = vmatmul.bf16.gmra.mxu0 %v1551_v23  ;;  %202 = vst [vmem:[#allocation2 + $0xdc] sm:$0xf] %v1462_v7  ;;  %v2051_v10 = vld [vmem:[%s2482_s1 + $0x220] sm:$0xff]  ;;  %v1566_v14 = vld [vmem:[#allocation2 + $0x58] sm:$0xf]  ;;  %v2049_v34 = vld [vmem:[%s2482_s1 + $0x210] sm:$0xff] }
  0x3c   : > { %1157 = vmatpush.bf16.msrb.mxu1 %v1994_v12  ;;  %1244 = vmatpush.bf16.msrb.mxu0 %v2018_v16  ;;  %203 = vst [vmem:[#allocation2 + $0x100] sm:$0xf] %v1463_v8  ;;  %v1956_v12 = vld [vmem:[#allocation2 + $0x4c] sm:$0xf]  ;;  %v1962_v15 = vld [vmem:[#allocation2 + $0x78] sm:$0xf0] }
  0x3d   : > { %1302 = vmatpush.bf16.msrb.mxu2 %v2034_v33  ;;  %1224 = vmatmul.bf16.gmra.mxu3 %v1563_v32  ;;  %v1630_v16 = vld [vmem:[#allocation2 + $0xe0] sm:$0xf]  ;;  %v1979_v17 = vld [vmem:[#allocation2 + $0x100] sm:$0xf0]  ;;  %v1486_v20 = vld [vmem:[%s2144_s4 + $0xb8] sm:$0xf]  ;;  %v1555_v22 = vor.u32 %v1956_v12, %v1552_v13  ;;  %v1567_v23 = vor.u32 %v1962_v15, %v1566_v14 }
  0x3e   : > { %1195 = vmatmul.bf16.gmra.mxu2 %v1559_v26  ;;  %1331 = vmatpush.bf16.msrb.mxu3 %v2042_v39  ;;  %v1975_v19 = vld [vmem:[#allocation2 + $0xe4] sm:$0xf]  ;;  %v1487_v21 = vld [vmem:[%s2144_s4 + $0xbc] sm:$0xf]  ;;  %253 = vst [vmem:[#allocation2 + $0xe8] sm:$0xf] %v1486_v20  ;;  %v1631_v26 = vor.u32 %v1979_v17, %v1630_v16 }
  0x3f   : > { %v1496_v24 = vld [vmem:[%s2144_s4 + $0x30] sm:$0xf]  ;;  %v1497_v25 = vld [vmem:[%s2144_s4 + $0x34] sm:$0xf]  ;;  %v1632_v27 = vld [vmem:[#allocation2 + $0x104] sm:$0xf0] }
  0x40   : > { %1158 = vmatpush.bf16.msrb.mxu1 %v1993_v29  ;;  %1245 = vmatpush.bf16.msrb.mxu0 %v2017_v31  ;;  %254 = vst [vmem:[#allocation2 + $0x10c] sm:$0xf] %v1487_v21  ;;  %v274_v28 = vld [vmem:[%s2144_s4 + $0x10] sm:$0xf]  ;;  %v275_v29 = vld [vmem:[%s2144_s4 + $0x14] sm:$0xf]  ;;  %v1635_v30 = vor.u32 %v1975_v19, %v1632_v27 }
  0x41   : > { %1303 = vmatpush.bf16.msrb.mxu2 %v2033_v36  ;;  %296 = vst [vmem:[#allocation2 + $0x1c] sm:$0xf] %v1496_v24  ;;  %v2024_v31 = vld [vmem:[%s2482_s1 + $0x148] sm:$0xff]  ;;  %v2039_v32 = vld [vmem:[%s2482_s1 + $0x1c0] sm:$0xff]  ;;  %v2050_v33 = vld [vmem:[%s2482_s1 + $0x218] sm:$0xff] }
  0x42   : > { %1332 = vmatpush.bf16.msrb.mxu3 %v2041_v3  ;;  %297 = vst [vmem:[#allocation2 + $0x40] sm:$0xf] %v1497_v25  ;;  %v1489_v36 = vld [vmem:[%s2144_s4 + $0xcc] sm:$0xf]  ;;  %v2023_v37 = vld [vmem:[%s2482_s1 + $0x140] sm:$0xff] }
  0x43   : > { %282 = vst [vmem:[#allocation2 + $0x60] sm:$0xf] %v274_v28  ;;  %v1965_v39 = vld [vmem:[#allocation2 + $0x94] sm:$0xf]  ;;  %v1588_v40 = vld [vmem:[#allocation2 + $0xb4] sm:$0xf0] }
  0x44   : > { %1159 = vmatpush.bf16.msrb.mxu1 %v1992_v35  ;;  %1246 = vmatpush.bf16.msrb.mxu0 %v2016_v38  ;;  %283 = vst [vmem:[#allocation2 + $0x84] sm:$0xf] %v275_v29  ;;  %v1488_v35 = vld [vmem:[%s2144_s4 + $0xc8] sm:$0xf]  ;;  %v1954_v44 = vld [vmem:[#allocation2 + $0x38] sm:$0xf0]  ;;  %v1591_v48 = vor.u32 %v1965_v39, %v1588_v40 }
  0x45   : > { %1304 = vmatpush.bf16.msrb.mxu2 %v2032_v1  ;;  %264 = vst [vmem:[#allocation2 + $0x14] sm:$0xf] %v1488_v35  ;;  %v2048_v38 = vld [vmem:[%s2482_s1 + $0x208] sm:$0xff]  ;;  %v1498_v46 = vld [vmem:[%s2144_s4 + $0x38] sm:$0xf] }
  0x46   : > { %1333 = vmatpush.bf16.msrb.mxu3 %v2040_v6  ;;  %265 = vst [vmem:[#allocation2 + $0x38] sm:$0xf] %v1489_v36  ;;  %v1499_v47 = vld [vmem:[%s2144_s4 + $0x3c] sm:$0xf]  ;;  %v1504_v50 = vld [vmem:[%s2144_s4 + $0x58] sm:$0xf] }
  0x47   : > { %298 = vst [vmem:[#allocation2 + $0x64] sm:$0xf] %v1498_v46  ;;  %v276_v54 = vld [vmem:[%s2144_s4 + $0x18] sm:$0xf]  ;;  %v277_v55 = vld [vmem:[%s2144_s4 + $0x1c] sm:$0xf] }
  0x48   : > { %1160 = vmatpush.bf16.msrb.mxu1 %v1991_v41  ;;  %1247 = vmatpush.bf16.msrb.mxu0 %v2015_v43  ;;  %v1602_v41 = vld [vmem:[#allocation2 + $0xa0] sm:$0xf]  ;;  %v1538_v43 = vld [vmem:[#allocation2 + $0x18] sm:$0xf]  ;;  %299 = vst [vmem:[#allocation2 + $0x88] sm:$0xf] %v1499_v47 }
  0x49   : > { %1305 = vmatpush.bf16.msrb.mxu2 %v2031_v4  ;;  %v1539_v52 = vor.u32 %v1954_v44, %v1538_v43  ;;  %312 = vst [vmem:[#allocation2 + $0x20] sm:$0xf] %v1504_v50  ;;  %v1490_v58 = vld [vmem:[%s2144_s4 + $0xd0] sm:$0xf]  ;;  %v1491_v59 = vld [vmem:[%s2144_s4 + $0xd4] sm:$0xf] }
  0x4a   : > { %1334 = vmatpush.bf16.msrb.mxu3 %v2039_v32  ;;  %284 = vst [vmem:[#allocation2 + $0xa8] sm:$0xf] %v276_v54  ;;  %v1624_v61 = vld [vmem:[#allocation2 + $0xfc] sm:$0xf0]  ;;  %v1638_v62 = vld [vmem:[#allocation2 + $0xe8] sm:$0xf] }
  0x4b   : > { %1161 = vmatmul.bf16.vlgmr.msrb.gmra.mxu1 %v1519_v56  ;;  %1248 = vmatmul.bf16.vlgmr.msrb.gmra.mxu0 %v1531_v57  ;;  %v2047_v57 = vld [vmem:[%s2482_s1 + $0x200] sm:$0xff]  ;;  %285 = vst [vmem:[#allocation2 + $0xcc] sm:$0xf] %v277_v55  ;;  %v1980_v63 = vld [vmem:[#allocation2 + $0x108] sm:$0xf0] }
  0x4c   : > { %1269 = vmatpush.bf16.msra.mxu1 %v2030_v42  ;;  %1356 = vmatpush.bf16.msra.mxu0 %v2054_v45  ;;  %v1971_v42 = vld [vmem:[#allocation2 + $0xc0] sm:$0xf0]  ;;  %266 = vst [vmem:[#allocation2 + $0x5c] sm:$0xf] %v1490_v58  ;;  %v1506_v4 = vld [vmem:[%s2144_s4 + $0x60] sm:$0xf]  ;;  %v1639_v6 = vor.u32 %v1980_v63, %v1638_v62 }
  0x4d   : > { %1229 = vmatmul.bf16.gmra.mxu3 %v1599_v2  ;;  %2063 = vmatpush.bf16.msra.mxu2 %v2054_v45  ;;  %v1950_v45 = vld [vmem:[#allocation2 + $0x1c] sm:$0xf]  ;;  %v1603_v49 = vor.u32 %v1971_v42, %v1602_v41  ;;  %267 = vst [vmem:[#allocation2 + $0x80] sm:$0xf] %v1491_v59  ;;  %v1963_v1 = vld [vmem:[#allocation2 + $0x80] sm:$0xf0] }
  0x4e   : > { %1200 = vmatmul.bf16.gmra.mxu2 %v1595_v60  ;;  %v1974_v60 = vld [vmem:[#allocation2 + $0xdc] sm:$0xf]  ;;  %v1500_v2 = vld [vmem:[%s2144_s4 + $0x40] sm:$0xf]  ;;  %v1501_v3 = vld [vmem:[%s2144_s4 + $0x44] sm:$0xf] }
  0x4f   : > { %v1959_v7 = vld [vmem:[#allocation2 + $0x64] sm:$0xf]  ;;  %300 = vst [vmem:[#allocation2 + $0xac] sm:$0xf] %v1500_v2  ;;  %v1492_v14 = vld [vmem:[%s2144_s4 + $0xd8] sm:$0xf] }
  0x50   : > { %1270 = vmatpush.bf16.msra.mxu1 %v2029_v51  ;;  %1357 = vmatpush.bf16.msra.mxu0 %v2053_v53  ;;  %v1505_v51 = vld [vmem:[%s2144_s4 + $0x5c] sm:$0xf]  ;;  %v1507_v8 = vld [vmem:[%s2144_s4 + $0x64] sm:$0xf]  ;;  %301 = vst [vmem:[#allocation2 + $0xd0] sm:$0xf] %v1501_v3 }
  0x51   : > { %2064 = vmatpush.bf16.msra.mxu2 %v2053_v53  ;;  %v1540_v53 = vld [vmem:[#allocation2 + $0x3c] sm:$0xf0]  ;;  %313 = vst [vmem:[#allocation2 + $0x44] sm:$0xf] %v1505_v51  ;;  %v279_v12 = vld [vmem:[%s2144_s4 + $0x24] sm:$0xf] }
  0x52   : > { %v1543_v56 = vor.u32 %v1950_v45, %v1540_v53  ;;  %314 = vst [vmem:[#allocation2 + $0x68] sm:$0xf] %v1506_v4  ;;  %v1493_v15 = vld [vmem:[%s2144_s4 + $0xdc] sm:$0xf]  ;;  %v1949_v16 = vld [vmem:[#allocation2 + $0x14] sm:$0xf] }
  0x53   : > { %315 = vst [vmem:[#allocation2 + $0x8c] sm:$0xf] %v1507_v8  ;;  %v1532_v17 = vld [vmem:[#allocation2 + $0x34] sm:$0xf0]  ;;  %v1610_v20 = vld [vmem:[#allocation2 + $0xa8] sm:$0xf] }
  0x54   : > { %1271 = vmatpush.bf16.msra.mxu1 %v2028_v0  ;;  %1358 = vmatpush.bf16.msra.mxu0 %v2052_v5  ;;  %v1574_v0 = vld [vmem:[#allocation2 + $0x60] sm:$0xf]  ;;  %287 = vst [vmem:[#allocation2 + $0x114] sm:$0xf] %v279_v12  ;;  %v1972_v21 = vld [vmem:[#allocation2 + $0xc8] sm:$0xf0]  ;;  %v1535_v25 = vor.u32 %v1949_v16, %v1532_v17 }
  0x55   : > { %2065 = vmatpush.bf16.msra.mxu2 %v2052_v5  ;;  %v1627_v5 = vor.u32 %v1974_v60, %v1624_v61  ;;  %268 = vst [vmem:[#allocation2 + $0xa4] sm:$0xf] %v1492_v14  ;;  %v1508_v24 = vld [vmem:[%s2144_s4 + $0x68] sm:$0xf]  ;;  %v1509_v28 = vld [vmem:[%s2144_s4 + $0x6c] sm:$0xf]  ;;  %v1611_v29 = vor.u32 %v1972_v21, %v1610_v20 }
  0x56   : > { %269 = vst [vmem:[#allocation2 + $0xc8] sm:$0xf] %v1493_v15  ;;  %v1968_v27 = vld [vmem:[#allocation2 + $0xac] sm:$0xf]  ;;  %v1511_v32 = vld [vmem:[%s2144_s4 + $0x74] sm:$0xf] }
  0x57   : > { %316 = vst [vmem:[#allocation2 + $0xb0] sm:$0xf] %v1508_v24  ;;  %v1495_v35 = vld [vmem:[%s2144_s4 + $0xe4] sm:$0xf]  ;;  %v1958_v36 = vld [vmem:[#allocation2 + $0x5c] sm:$0xf] }
  0x58   : > { %1272 = vmatpush.bf16.msra.mxu1 %v2027_v9  ;;  %1359 = vmatpush.bf16.msra.mxu0 %v2051_v10  ;;  %v1575_v9 = vor.u32 %v1963_v1, %v1574_v0  ;;  %v1955_v19 = vld [vmem:[#allocation2 + $0x40] sm:$0xf0]  ;;  %317 = vst [vmem:[#allocation2 + $0xd4] sm:$0xf] %v1509_v28 }
  0x59   : > { %2066 = vmatpush.bf16.msra.mxu2 %v2051_v10  ;;  %v1576_v10 = vld [vmem:[#allocation2 + $0x84] sm:$0xf0]  ;;  %319 = vst [vmem:[#allocation2 + $0x11c] sm:$0xf] %v1511_v32 }
  0x5a   : > { %v1579_v13 = vor.u32 %v1959_v7, %v1576_v10  ;;  %271 = vst [vmem:[#allocation2 + $0x110] sm:$0xf] %v1495_v35  ;;  %v1964_v39 = vld [vmem:[#allocation2 + $0x88] sm:$0xf0]  ;;  %v2080_v10 = vld [vmem:[%s2483_s2] ss:$0 sm:$0xff] }
  0x5b   : > { %1166 = vmatmul.bf16.gmra.mxu1 %v1555_v22  ;;  %1253 = vmatmul.bf16.gmra.mxu0 %v1567_v23  ;;  %v1502_v22 = vld [vmem:[%s2144_s4 + $0x48] sm:$0xf]  ;;  %v1503_v23 = vld [vmem:[%s2144_s4 + $0x4c] sm:$0xf]  ;;  %v1981_v41 = vld [vmem:[#allocation2 + $0x110] sm:$0xf0] }
  0x5c   : > { %1273 = vmatpush.bf16.msra.mxu1 %v2026_v11  ;;  %1360 = vmatpush.bf16.msra.mxu0 %v2050_v33  ;;  %v278_v11 = vld [vmem:[%s2144_s4 + $0x20] sm:$0xf]  ;;  %302 = vst [vmem:[#allocation2 + $0xf4] sm:$0xf] %v1502_v22 }
  0x5d   : > { %1234 = vmatmul.bf16.gmra.mxu3 %v1635_v30  ;;  %2067 = vmatpush.bf16.msra.mxu2 %v2050_v33  ;;  %286 = vst [vmem:[#allocation2 + $0xf0] sm:$0xf] %v278_v11  ;;  %v1612_v30 = vld [vmem:[#allocation2 + $0xcc] sm:$0xf0] }
  0x5e   : > { %1205 = vmatmul.bf16.gmra.mxu2 %v1631_v26  ;;  %303 = vst [vmem:[#allocation2 + $0x118] sm:$0xf] %v1503_v23  ;;  %v1615_v33 = vor.u32 %v1968_v27, %v1612_v30  ;;  %v1618_v50 = vld [vmem:[#allocation2 + $0xb0] sm:$0xf] }
  0x5f   : > { %v1973_v51 = vld [vmem:[#allocation2 + $0xd0] sm:$0xf0] }
  0x60   : > { %1274 = vmatpush.bf16.msra.mxu1 %v2025_v18  ;;  %1361 = vmatpush.bf16.msra.mxu0 %v2049_v34  ;;  %v1546_v18 = vld [vmem:[#allocation2 + $0x20] sm:$0xf]  ;;  %v1982_v53 = vld [vmem:[#allocation2 + $0x118] sm:$0xf0]  ;;  %v1619_v55 = vor.u32 %v1973_v51, %v1618_v50 }
  0x61   : > { %2068 = vmatpush.bf16.msra.mxu2 %v2049_v34  ;;  %v1547_v26 = vor.u32 %v1955_v19, %v1546_v18  ;;  %v1494_v34 = vld [vmem:[%s2144_s4 + $0xe0] sm:$0xf]  ;;  %v1640_v0 = vld [vmem:[#allocation2 + $0x10c] sm:$0xf0] }
  0x62   : > { %270 = vst [vmem:[#allocation2 + $0xec] sm:$0xf] %v1494_v34 }
  0x63   : > { %v1977_v45 = vld [vmem:[#allocation2 + $0xf4] sm:$0xf] }
  0x64   : > { %1275 = vmatpush.bf16.msra.mxu1 %v2024_v31  ;;  %1362 = vmatpush.bf16.msra.mxu0 %v2048_v38  ;;  %v1510_v31 = vld [vmem:[%s2144_s4 + $0x70] sm:$0xf] }
  0x65   : > { %2069 = vmatpush.bf16.msra.mxu2 %v2048_v38  ;;  %318 = vst [vmem:[#allocation2 + $0xf8] sm:$0xf] %v1510_v31  ;;  %v1582_v38 = vld [vmem:[#allocation2 + $0x68] sm:$0xf]  ;;  %v1646_v40 = vld [vmem:[#allocation2 + $0xf0] sm:$0xf] }
  0x66   : > { %v1583_v43 = vor.u32 %v1964_v39, %v1582_v38  ;;  %v1647_v44 = vor.u32 %v1981_v41, %v1646_v40  ;;  %v1648_v46 = vld [vmem:[#allocation2 + $0x114] sm:$0xf0] }
  0x67   : > { %v1651_v47 = vor.u32 %v1977_v45, %v1648_v46 }
  0x68   : > { %1276 = vmatpush.bf16.msra.mxu1 %v2023_v37  ;;  %1363 = vmatpush.bf16.msra.mxu0 %v2047_v57  ;;  %v1568_v37 = vld [vmem:[#allocation2 + $0x7c] sm:$0xf0] }
  0x69   : > { %2070 = vmatpush.bf16.msra.mxu2 %v2047_v57  ;;  %v1571_v42 = vor.u32 %v1958_v36, %v1568_v37  ;;  %v1976_v63 = vld [vmem:[#allocation2 + $0xec] sm:$0xf] }
  0x6a   : > { %v1643_v1 = vor.u32 %v1976_v63, %v1640_v0 }
  0x6b   : > { %1171 = vmatmul.bf16.gmra.mxu1 %v1591_v48  ;;  %1258 = vmatmul.bf16.gmra.mxu0 %v1603_v49  ;;  %v1967_v48 = vld [vmem:[#allocation2 + $0xa4] sm:$0xf]  ;;  %v1604_v49 = vld [vmem:[#allocation2 + $0xc4] sm:$0xf0] }
  0x6c   : > { %v1607_v54 = vor.u32 %v1967_v48, %v1604_v49 }
  0x6d   : > { %1335 = vmatmul.bf16.vlgmr.msrb.gmra.mxu3 %v1543_v56 }
  0x6e   : > { %1306 = vmatmul.bf16.vlgmr.msrb.gmra.mxu2 %v1539_v52  ;;  %v1654_v52 = vld [vmem:[#allocation2 + $0xf8] sm:$0xf] }
  0x6f   : > { %v1655_v58 = vor.u32 %v1982_v53, %v1654_v52 }
  0x7b   : > { %1176 = vmatmul.bf16.gmra.mxu1 %v1627_v5  ;;  %1263 = vmatmul.bf16.gmra.mxu0 %v1639_v6 }
  0x7d   : > { %1340 = vmatmul.bf16.gmra.mxu3 %v1579_v13 }
  0x7e   : > { %1311 = vmatmul.bf16.gmra.mxu2 %v1575_v9 }
  0x8b   : > { %1277 = vmatmul.bf16.vlgmr.msra.gmra.mxu1 %v1535_v25  ;;  %1364 = vmatmul.bf16.vlgmr.msra.gmra.mxu0 %v1547_v26 }
  0x8d   : > { %1345 = vmatmul.bf16.gmra.mxu3 %v1615_v33 }
  0x8e   : > { %1316 = vmatmul.bf16.gmra.mxu2 %v1611_v29 }
  0x9b   : > { %1282 = vmatmul.bf16.gmra.mxu1 %v1571_v42  ;;  %1369 = vmatmul.bf16.gmra.mxu0 %v1583_v43 }
  0x9d   : > { %1350 = vmatmul.bf16.gmra.mxu3 %v1651_v47 }
  0x9e   : > { %1321 = vmatmul.bf16.gmra.mxu2 %v1647_v44 }
  0xa8   : > { %v1143_v56 = vpop.f32.mrf.mxu1  ;;  %v1133_v57 = vpop.f32.mrf.mxu0 }
  0xa9   : > { %v1134_v11 = vadd.f32 %v2080_v10, %v1133_v57  ;;  %v1144_v38 = vadd.f32 %v2080_v10, %v1143_v56 }
  0xab   : > { %1287 = vmatmul.bf16.gmra.mxu1 %v1607_v54  ;;  %1374 = vmatmul.bf16.gmra.mxu0 %v1619_v55 }
  0xae   : > { %1379 = vmatmul.bf16.vlgmr.msra.gmra.mxu2 %v1655_v58 }
  0xb0   : > { %v1145_v60 = vpop.f32.mrf.mxu1  ;;  %v1135_v61 = vpop.f32.mrf.mxu0 }
  0xb1   : > { %v1191_v59 = vpop.f32.mrf.mxu2  ;;  %v2413_v62 = vpop.f32.mrf.mxu3  ;;  %v1136_v18 = vadd.f32 %v2080_v10, %v1135_v61  ;;  %v1146_v45 = vadd.f32 %v2080_v10, %v1145_v60 }
  0xb8   : > { %v1148_v3 = vpop.f32.mrf.mxu1  ;;  %v1138_v4 = vpop.f32.mrf.mxu0 }
  0xb9   : > { %v1193_v2 = vpop.f32.mrf.mxu2  ;;  %v2415_v5 = vpop.f32.mrf.mxu3  ;;  %v1139_v25 = vadd.f32 %v2080_v10, %v1138_v4  ;;  %v1149_v52 = vadd.f32 %v2080_v10, %v1148_v3 }
  0xbb   : > { %1292 = vmatmul.bf16.gmra.mxu1 %v1643_v1 }
  0xc0   : > { %v1150_v7 = vpop.f32.mrf.mxu1  ;;  %v1140_v8 = vpop.f32.mrf.mxu0 }
  0xc1   : > { %v1196_v6 = vpop.f32.mrf.mxu2  ;;  %v2417_v9 = vpop.f32.mrf.mxu3  ;;  %v1141_v31 = vadd.f32 %v2080_v10, %v1140_v8 }
  0xc8   : > { %v1162_v13 = vpop.f32.mrf.mxu1  ;;  %v1249_v14 = vpop.f32.mrf.mxu0 }
  0xc9   : > { %v1198_v12 = vpop.f32.mrf.mxu2  ;;  %v1163_v15 = vadd.f32 %v1162_v13, %v1134_v11  ;;  %v2422_v17 = vpop.f32.mrf.mxu3 }
  0xcb   : > { %v1192_v16 = vadd.f32 %v1191_v59, %v1163_v15  ;;  %v1151_v59 = vadd.f32 %v2080_v10, %v1150_v7 }
  0xcd   : > { %v1221_v1 = vadd.f32 %v2413_v62, %v1192_v16 }
  0xcf   : > { %v1250_v3 = vadd.f32 %v1249_v14, %v1221_v1 }
  0xd0   : > { %v1164_v20 = vpop.f32.mrf.mxu1  ;;  %v1251_v21 = vpop.f32.mrf.mxu0 }
  0xd1   : > { %v1201_v19 = vpop.f32.mrf.mxu2  ;;  %v1165_v22 = vadd.f32 %v1164_v20, %v1136_v18  ;;  %v2424_v24 = vpop.f32.mrf.mxu3 }
  0xd3   : > { %v1194_v23 = vadd.f32 %v1193_v2, %v1165_v22 }
  0xd5   : > { %v1223_v13 = vadd.f32 %v2415_v5, %v1194_v23 }
  0xd7   : > { %v1252_v62 = vadd.f32 %v1251_v21, %v1223_v13 }
  0xd8   : > { %v1167_v27 = vpop.f32.mrf.mxu1  ;;  %v1254_v28 = vpop.f32.mrf.mxu0 }
  0xd9   : > { %v1203_v26 = vpop.f32.mrf.mxu2  ;;  %v1168_v29 = vadd.f32 %v1167_v27, %v1139_v25  ;;  %v2426_v33 = vpop.f32.mrf.mxu3 }
  0xdb   : > { %v1197_v30 = vadd.f32 %v1196_v6, %v1168_v29 }
  0xdd   : > { %v1226_v20 = vadd.f32 %v2417_v9, %v1197_v30 }
  0xdf   : > { %v1255_v25 = vadd.f32 %v1254_v28, %v1226_v20 }
  0xe0   : > { %v1169_v34 = vpop.f32.mrf.mxu1  ;;  %v2428_v35 = vpop.f32.mrf.mxu0 }
  0xe1   : > { %v1206_v32 = vpop.f32.mrf.mxu2  ;;  %v1170_v36 = vadd.f32 %v1169_v34, %v1141_v31  ;;  %v2432_v43 = vpop.f32.mrf.mxu3 }
  0xe3   : > { %v1199_v37 = vadd.f32 %v1198_v12, %v1170_v36 }
  0xe5   : > { %v1228_v21 = vadd.f32 %v2422_v17, %v1199_v37 }
  0xe8   : > { %v1172_v40 = vpop.f32.mrf.mxu1  ;;  %v2430_v41 = vpop.f32.mrf.mxu0 }
  0xe9   : > { %v1208_v39 = vpop.f32.mrf.mxu2  ;;  %v1173_v42 = vadd.f32 %v1172_v40, %v1144_v38  ;;  %v2438_v51 = vpop.f32.mrf.mxu3 }
  0xeb   : > { %v1202_v44 = vadd.f32 %v1201_v19, %v1173_v42 }
  0xed   : > { %v1231_v28 = vadd.f32 %v2424_v24, %v1202_v44 }
  0xef   : > { %v1260_v17 = vadd.f32 %v2430_v41, %v1231_v28 }
  0xf0   : > { %v1174_v47 = vpop.f32.mrf.mxu1  ;;  %v2434_v48 = vpop.f32.mrf.mxu0 }
  0xf1   : > { %v1307_v46 = vpop.f32.mrf.mxu2  ;;  %v1175_v49 = vadd.f32 %v1174_v47, %v1146_v45  ;;  %v1336_v58 = vpop.f32.mrf.mxu3 }
  0xf3   : > { %v2436_v50 = vadd.f32 %v1203_v26, %v1175_v49 }
  0xf8   : > { %v1177_v54 = vpop.f32.mrf.mxu1  ;;  %v2440_v55 = vpop.f32.mrf.mxu0 }
  0xf9   : > { %v1309_v53 = vpop.f32.mrf.mxu2  ;;  %v1178_v56 = vadd.f32 %v1177_v54, %v1149_v52  ;;  %v1338_v4 = vpop.f32.mrf.mxu3 }
  0xfb   : > { %v2442_v57 = vadd.f32 %v1206_v32, %v1178_v56 }
 0x100   : > { %v1179_v61 = vpop.f32.mrf.mxu1  ;;  %v2444_v63 = vpop.f32.mrf.mxu0 }
 0x101   : > { %v1312_v60 = vpop.f32.mrf.mxu2  ;;  %v1180_v0 = vadd.f32 %v1179_v61, %v1151_v59  ;;  %v1341_v19 = vpop.f32.mrf.mxu3 }
 0x103   : > { %v2447_v2 = vadd.f32 %v1208_v39, %v1180_v0  ;;  %v1257_v39 = vadd.f32 %v2428_v35, %v1228_v21  ;;  %v1233_v35 = vadd.f32 %v2426_v33, %v2436_v50  ;;  %v1236_v0 = vadd.f32 %v2432_v43, %v2442_v57 }
 0x105   : > { %v1262_v24 = vadd.f32 %v2434_v48, %v1233_v35  ;;  %v1265_v33 = vadd.f32 %v2440_v55, %v1236_v0 }
 0x108   : > { %v1278_v6 = vpop.f32.mrf.mxu1  ;;  %v1365_v8 = vpop.f32.mrf.mxu0 }
 0x109   : > { %v1279_v11 = vadd.f32 %v1278_v6, %v1250_v3  ;;  %v1314_v12 = vpop.f32.mrf.mxu2  ;;  %v1343_v34 = vpop.f32.mrf.mxu3 }
 0x10b   : > { %v1308_v15 = vadd.f32 %v1307_v46, %v1279_v11  ;;  %v1238_v11 = vadd.f32 %v2438_v51, %v2447_v2 }
 0x10d   : > { %v1337_v7 = vadd.f32 %v1336_v58, %v1308_v15  ;;  %v1267_v43 = vadd.f32 %v2444_v63, %v1238_v11 }
 0x10f   : > { %v1366_v10 = vadd.f32 %v1365_v8, %v1337_v7 }
 0x110   : > { %v1280_v14 = vpop.f32.mrf.mxu1  ;;  %v1367_v16 = vpop.f32.mrf.mxu0 }
 0x111   : > { %1385 = vst [vmem:[%s2454_s21] sm:$0xff] %v1366_v10  ;;  %v1281_v18 = vadd.f32 %v1280_v14, %v1252_v62  ;;  %v1317_v22 = vpop.f32.mrf.mxu2  ;;  %v1346_v47 = vpop.f32.mrf.mxu3 }
 0x113   : > { %v1310_v5 = vadd.f32 %v1309_v53, %v1281_v18 }
 0x115   : > { %v1339_v23 = vadd.f32 %v1338_v4, %v1310_v5 }
 0x117   : > { %v1368_v26 = vadd.f32 %v1367_v16, %v1339_v23 }
 0x118   : > { %v1283_v27 = vpop.f32.mrf.mxu1  ;;  %v1370_v29 = vpop.f32.mrf.mxu0 }
 0x119   : > { %1386 = vst [vmem:[%s2454_s21 + $0x8] sm:$0xff] %v1368_v26  ;;  %v1284_v31 = vadd.f32 %v1283_v27, %v1255_v25  ;;  %v1319_v38 = vpop.f32.mrf.mxu2  ;;  %v1348_v59 = vpop.f32.mrf.mxu3 }
 0x11b   : > { %v1313_v32 = vadd.f32 %v1312_v60, %v1284_v31 }
 0x11d   : > { %v1342_v36 = vadd.f32 %v1341_v19, %v1313_v32 }
 0x11f   : > { %v1371_v9 = vadd.f32 %v1370_v29, %v1342_v36 }
 0x120   : > { %v1285_v30 = vpop.f32.mrf.mxu1  ;;  %v1372_v40 = vpop.f32.mrf.mxu0 }
 0x121   : > { %1387 = vst [vmem:[%s2454_s21 + $0x10] sm:$0xff] %v1371_v9  ;;  %v1286_v42 = vadd.f32 %v1285_v30, %v1257_v39  ;;  %v1322_v49 = vpop.f32.mrf.mxu2  ;;  %v1351_v48 = vpop.f32.mrf.mxu3 }
 0x123   : > { %v1315_v45 = vadd.f32 %v1314_v12, %v1286_v42 }
 0x125   : > { %v1344_v46 = vadd.f32 %v1343_v34, %v1315_v45 }
 0x127   : > { %v1373_v37 = vadd.f32 %v1372_v40, %v1344_v46 }
 0x128   : > { %v1288_v52 = vpop.f32.mrf.mxu1  ;;  %v1375_v54 = vpop.f32.mrf.mxu0 }
 0x129   : > { %1388 = vst [vmem:[%s2454_s21 + $0x18] sm:$0xff] %v1373_v37  ;;  %v1289_v53 = vadd.f32 %v1288_v52, %v1260_v17  ;;  %v1324_v41 = vpop.f32.mrf.mxu2  ;;  %v1353_v55 = vpop.f32.mrf.mxu3 }
 0x12b   : > { %v1318_v56 = vadd.f32 %v1317_v22, %v1289_v53 }
 0x12d   : > { %v1347_v58 = vadd.f32 %v1346_v47, %v1318_v56 }
 0x12f   : > { %v1376_v44 = vadd.f32 %v1375_v54, %v1347_v58 }
 0x130   : > { %v1290_v60 = vpop.f32.mrf.mxu1  ;;  %v1377_v3 = vpop.f32.mrf.mxu0 }
 0x131   : > { %1389 = vst [vmem:[%s2454_s21 + $0x20] sm:$0xff] %v1376_v44  ;;  %v1291_v61 = vadd.f32 %v1290_v60, %v1262_v24  ;;  %v1380_v13 = vpop.f32.mrf.mxu2 }
 0x133   : > { %v1320_v1 = vadd.f32 %v1319_v38, %v1291_v61 }
 0x135   : > { %v1349_v4 = vadd.f32 %v1348_v59, %v1320_v1 }
 0x137   : > { %v1378_v50 = vadd.f32 %v1377_v3, %v1349_v4 }
 0x138   : > { %v1293_v6 = vpop.f32.mrf.mxu1 }
 0x139   : > { %1390 = vst [vmem:[%s2454_s21 + $0x28] sm:$0xff] %v1378_v50  ;;  %v1294_v8 = vadd.f32 %v1293_v6, %v1265_v33  ;;  %v1382_v16 = vpop.f32.mrf.mxu2 }
 0x13b   : > { %v1323_v12 = vadd.f32 %v1322_v49, %v1294_v8 }
 0x13d   : > { %v1352_v15 = vadd.f32 %v1351_v48, %v1323_v12 }
 0x13f   : > { %v1381_v57 = vadd.f32 %v1380_v13, %v1352_v15 }
 0x140   : > { %v1295_v7 = vpop.f32.mrf.mxu1 }
 0x141   : > { %1391 = vst [vmem:[%s2454_s21 + $0x30] sm:$0xff] %v1381_v57  ;;  %v1296_v62 = vadd.f32 %v1295_v7, %v1267_v43 }
 0x143   : > { %v1325_v10 = vadd.f32 %v1324_v41, %v1296_v62 }
 0x145   : > { %v1354_v14 = vadd.f32 %v1353_v55, %v1325_v10 }
 0x147   : > { %v1383_v18 = vadd.f32 %v1382_v16, %v1354_v14 }
 0x149   : > { %1392 = vst [vmem:[%s2454_s21 + $0x38] sm:$0xff] %v1383_v18 }
 0x14a PF: > { %s13_s12 = sadd.s32 1, %s2087_s12  }
 0x14b   : > { %p10_p4 = scmp.ge.s32.totalorder %s13_s12, 4  }
 0x14d   :  { %12 = sbr.rel (!%p10_p4) target bundleno = 1 (0x1), region = 67 }

// kernel: _p6p7_forward.2
= control target key start
LH: loop header
LB: loop body
LE: loop exit
PB: predicated region body
PF: predicated region fallthrough
CT: control target
= control target key end

     0   :  { %s3085_s15 = smov 0   ;;  %s3617_s0 = inlined_call_operand.vmem [shape: bf16[2,6,144,128], index: 0, kind: input, shape index: {}]   ;;  %s3618_s1 = inlined_call_operand.vmem [shape: bf16[1152,128], index: 1, kind: input, shape index: {}]   ;;  %s3619_s2 = inlined_call_operand.vmem [shape: f32[1,128], index: 2, kind: input, shape index: {}]   ;;  %s3620_s3 = inlined_call_operand.vmem [shape: f32[2,128,128], index: 3, kind: output, shape index: {0}]   ;;  %s3621_s4 = inlined_call_operand.vmem [shape: bf16[2,128,128], index: 4, kind: output, shape index: {1}]  }
   0x1 LB: > { %s2125_s16 = sadd.s32 4294967295, %s3058_s15   ;;  %p2129_p0 = scmp.ge.s32.totalorder %s3058_s15, 1  ;;  %s3058_s15 = sphi %s3085_s15, %s15_s15  }
   0x2   : > { %p165_p1 = scmp.lt.s32.totalorder %s3058_s15, 3 }
   0x4   : > { %p166_p2 = pnand %p2129_p0, %p165_p1 }
   0x5   : > { %p196_p3 = scmp.lt.s32.totalorder (!%p166_p2), %s2125_s16, 1 }
   0x6   : > { %169 = sbr.rel (%p166_p2) target bundleno = 466 (0x1d2), region = 32 }
   0xb   : > { %v2906_v0 = vld [vmem:[%s3618_s1 + $0x38] sm:$0xff]  ;;  %v2905_v1 = vld [vmem:[%s3618_s1 + $0x30] sm:$0xff]  ;;  %s3623_s16 = smov (!%p196_p3, %s2125_s16), 1  ;;  %v2904_v2 = vld [vmem:[%s3618_s1 + $0x28] sm:$0xff] }
   0xc   : > { %3018 = vmatpush.bf16.msra.mxu1 %v2906_v0  ;;  %3019 = vmatpush.bf16.msra.mxu2 %v2906_v0  ;;  %s3042_s21 = smul.u32 432, %s3623_s16  ;;  %v2903_v8 = vld [vmem:[%s3618_s1 + $0x20] sm:$0xff]  ;;  %v2902_v13 = vld [vmem:[%s3618_s1 + $0x18] sm:$0xff]  ;;  %v2901_v18 = vld [vmem:[%s3618_s1 + $0x10] sm:$0xff]  ;;  %s2826_s6 = sshll.u32 %s3623_s16, 6 }
   0xd   : > { %3020 = vmatpush.bf16.msra.mxu3 %v2906_v0  ;;  %1532 = vmatpush.bf16.msra.mxu0 %v2906_v0  ;;  %v2900_v22 = vld [vmem:[%s3618_s1 + $0x8] sm:$0xff]  ;;  %v2899_v23 = vld [vmem:[%s3618_s1] sm:$0xff]  ;;  %v2922_v34 = vld [vmem:[%s3618_s1 + $0xb8] sm:$0xff]  ;;  %s3577_s9 = scalar_lea.vmem %s3621_s4, %s2826_s6 }
   0xe   : > { %s3108_s26 = scalar_lea.vmem %s3617_s0, %s3042_s21  ;;  %v2914_v35 = vld [vmem:[%s3618_s1 + $0x78] sm:$0xff]  ;;  %v2921_v45 = vld [vmem:[%s3618_s1 + $0xb0] sm:$0xff]  ;;  %v2920_v53 = vld [vmem:[%s3618_s1 + $0xa8] sm:$0xff] }
   0xf   : > { %v215_v3 = vld [vmem:[%s3108_s26 + $0x10] sm:$0xf]  ;;  %v216_v4 = vld [vmem:[%s3108_s26 + $0x14] sm:$0xf]  ;;  %v219_v5 = vld [vmem:[%s3108_s26 + $0x20] sm:$0xf] }
  0x10   : > { %3021 = vmatpush.bf16.msra.mxu1 %v2905_v1  ;;  %3022 = vmatpush.bf16.msra.mxu2 %v2905_v1  ;;  %231 = vst [vmem:[#allocation2 + $0x90] sm:$0xf] %v215_v3  ;;  %v220_v6 = vld [vmem:[%s3108_s26 + $0x24] sm:$0xf]  ;;  %v223_v7 = vld [vmem:[%s3108_s26 + $0x30] sm:$0xf] }
  0x11   : > { %3023 = vmatpush.bf16.msra.mxu3 %v2905_v1  ;;  %1533 = vmatpush.bf16.msra.mxu0 %v2905_v1  ;;  %232 = vst [vmem:[#allocation2 + $0xb4] sm:$0xf] %v216_v4  ;;  %v224_v9 = vld [vmem:[%s3108_s26 + $0x34] sm:$0xf]  ;;  %v211_v10 = vld [vmem:[%s3108_s26] sm:$0xf] }
  0x12   : > { %235 = vst [vmem:[#allocation2 + $0x120] sm:$0xf] %v219_v5  ;;  %v212_v11 = vld [vmem:[%s3108_s26 + $0x4] sm:$0xf]  ;;  %v217_v12 = vld [vmem:[%s3108_s26 + $0x18] sm:$0xf] }
  0x13   : > { %236 = vst [vmem:[#allocation2 + $0x144] sm:$0xf] %v220_v6  ;;  %v218_v14 = vld [vmem:[%s3108_s26 + $0x1c] sm:$0xf]  ;;  %v221_v15 = vld [vmem:[%s3108_s26 + $0x28] sm:$0xf] }
  0x14   : > { %3024 = vmatpush.bf16.msra.mxu1 %v2904_v2  ;;  %3025 = vmatpush.bf16.msra.mxu2 %v2904_v2  ;;  %239 = vst [vmem:[#allocation2 + $0x1b0] sm:$0xf] %v223_v7  ;;  %v222_v16 = vld [vmem:[%s3108_s26 + $0x2c] sm:$0xf]  ;;  %v225_v17 = vld [vmem:[%s3108_s26 + $0x38] sm:$0xf] }
  0x15   : > { %3026 = vmatpush.bf16.msra.mxu3 %v2904_v2  ;;  %1534 = vmatpush.bf16.msra.mxu0 %v2904_v2  ;;  %240 = vst [vmem:[#allocation2 + $0x1d4] sm:$0xf] %v224_v9  ;;  %v226_v19 = vld [vmem:[%s3108_s26 + $0x3c] sm:$0xf]  ;;  %v213_v20 = vld [vmem:[%s3108_s26 + $0x8] sm:$0xf] }
  0x16   : > { %227 = vst [vmem:[#allocation2] sm:$0xf] %v211_v10  ;;  %v214_v21 = vld [vmem:[%s3108_s26 + $0xc] sm:$0xf]  ;;  %v2135_v29 = vld [vmem:[%s3108_s26 + $0x48] sm:$0xf] }
  0x17   : > { %228 = vst [vmem:[#allocation2 + $0x24] sm:$0xf] %v212_v11  ;;  %v2321_v24 = vld [vmem:[#allocation2 + $0x90] sm:$0xf]  ;;  %v2136_v31 = vld [vmem:[%s3108_s26 + $0x4c] sm:$0xf] }
  0x18   : > { %3027 = vmatpush.bf16.msra.mxu1 %v2903_v8  ;;  %3028 = vmatpush.bf16.msra.mxu2 %v2903_v8  ;;  %233 = vst [vmem:[#allocation2 + $0xd8] sm:$0xf] %v217_v12  ;;  %v2849_v25 = vld [vmem:[#allocation2 + $0xb0] sm:$0xf0]  ;;  %v2151_v38 = vld [vmem:[%s3108_s26 + $0x90] sm:$0xf] }
  0x19   : > { %3029 = vmatpush.bf16.msra.mxu3 %v2903_v8  ;;  %1535 = vmatpush.bf16.msra.mxu0 %v2903_v8  ;;  %234 = vst [vmem:[#allocation2 + $0xfc] sm:$0xf] %v218_v14  ;;  %v2393_v26 = vld [vmem:[#allocation2 + $0x120] sm:$0xf]  ;;  %v2322_v36 = vor.u32 %v2849_v25, %v2321_v24  ;;  %v2152_v39 = vld [vmem:[%s3108_s26 + $0x94] sm:$0xf] }
  0x1a   : > { %237 = vst [vmem:[#allocation2 + $0x168] sm:$0xf] %v221_v15  ;;  %v2867_v27 = vld [vmem:[#allocation2 + $0x140] sm:$0xf0]  ;;  %v2930_v41 = vld [vmem:[%s3618_s1 + $0xf8] sm:$0xff]  ;;  %v2913_v46 = vld [vmem:[%s3618_s1 + $0x70] sm:$0xff] }
  0x1b   : > { %238 = vst [vmem:[#allocation2 + $0x18c] sm:$0xf] %v222_v16  ;;  %v2465_v28 = vld [vmem:[#allocation2 + $0x1b0] sm:$0xf]  ;;  %v2394_v37 = vor.u32 %v2867_v27, %v2393_v26  ;;  %v2938_v43 = vld [vmem:[%s3618_s1 + $0x138] sm:$0xff]  ;;  %v2912_v54 = vld [vmem:[%s3618_s1 + $0x68] sm:$0xff] }
  0x1c   : > { %3030 = vmatpush.bf16.msra.mxu1 %v2902_v13  ;;  %3031 = vmatpush.bf16.msra.mxu2 %v2902_v13  ;;  %241 = vst [vmem:[#allocation2 + $0x1f8] sm:$0xf] %v225_v17  ;;  %v2885_v30 = vld [vmem:[#allocation2 + $0x1d0] sm:$0xf0]  ;;  %v2167_v44 = vld [vmem:[%s3108_s26 + $0xd8] sm:$0xf] }
  0x1d   : > { %3032 = vmatpush.bf16.msra.mxu3 %v2902_v13  ;;  %1536 = vmatpush.bf16.msra.mxu0 %v2902_v13  ;;  %242 = vst [vmem:[#allocation2 + $0x21c] sm:$0xf] %v226_v19  ;;  %v2249_v32 = vld [vmem:[#allocation2] sm:$0xf]  ;;  %v2466_v40 = vor.u32 %v2885_v30, %v2465_v28  ;;  %v2168_v47 = vld [vmem:[%s3108_s26 + $0xdc] sm:$0xf] }
  0x1e   : > { %229 = vst [vmem:[#allocation2 + $0x48] sm:$0xf] %v213_v20  ;;  %v2831_v33 = vld [vmem:[#allocation2 + $0x20] sm:$0xf0]  ;;  %v2183_v48 = vld [vmem:[%s3108_s26 + $0x120] sm:$0xf] }
  0x1f   : > { %230 = vst [vmem:[#allocation2 + $0x6c] sm:$0xf] %v214_v21  ;;  %v2250_v42 = vor.u32 %v2831_v33, %v2249_v32  ;;  %v2184_v49 = vld [vmem:[%s3108_s26 + $0x124] sm:$0xf]  ;;  %v2929_v50 = vld [vmem:[%s3618_s1 + $0xf0] sm:$0xff]  ;;  %v2928_v56 = vld [vmem:[%s3618_s1 + $0xe8] sm:$0xff] }
  0x20   : > { %3033 = vmatpush.bf16.msra.mxu1 %v2901_v18  ;;  %3034 = vmatpush.bf16.msra.mxu2 %v2901_v18  ;;  %260 = vst [vmem:[#allocation2 + $0x4] sm:$0xf] %v2135_v29  ;;  %v2937_v51 = vld [vmem:[%s3618_s1 + $0x130] sm:$0xff]  ;;  %v2936_v57 = vld [vmem:[%s3618_s1 + $0x128] sm:$0xff]  ;;  %v2919_v58 = vld [vmem:[%s3618_s1 + $0xa0] sm:$0xff] }
  0x21   : > { %3035 = vmatpush.bf16.msra.mxu3 %v2901_v18  ;;  %1537 = vmatpush.bf16.msra.mxu0 %v2901_v18  ;;  %261 = vst [vmem:[#allocation2 + $0x28] sm:$0xf] %v2136_v31  ;;  %v2137_v52 = vld [vmem:[%s3108_s26 + $0x50] sm:$0xf]  ;;  %v2138_v55 = vld [vmem:[%s3108_s26 + $0x54] sm:$0xf] }
  0x22   : > { %293 = vst [vmem:[#allocation2 + $0x8] sm:$0xf] %v2151_v38  ;;  %v2911_v59 = vld [vmem:[%s3618_s1 + $0x60] sm:$0xff]  ;;  %v2153_v60 = vld [vmem:[%s3108_s26 + $0x98] sm:$0xf]  ;;  %v2917_v20 = vld [vmem:[%s3618_s1 + $0x90] sm:$0xff] }
  0x23   : > { %294 = vst [vmem:[#allocation2 + $0x2c] sm:$0xf] %v2152_v39  ;;  %v2154_v61 = vld [vmem:[%s3108_s26 + $0x9c] sm:$0xf]  ;;  %v2357_v62 = vld [vmem:[#allocation2 + $0xd8] sm:$0xf] }
  0x24   : > { %3036 = vmatpush.bf16.msra.mxu1 %v2900_v22  ;;  %3037 = vmatpush.bf16.msra.mxu2 %v2900_v22  ;;  %326 = vst [vmem:[#allocation2 + $0xc] sm:$0xf] %v2167_v44  ;;  %v2858_v63 = vld [vmem:[#allocation2 + $0xf8] sm:$0xf0]  ;;  %v2429_v0 = vld [vmem:[#allocation2 + $0x168] sm:$0xf] }
  0x25   : > { %3038 = vmatpush.bf16.msra.mxu3 %v2900_v22  ;;  %1538 = vmatpush.bf16.msra.mxu0 %v2900_v22  ;;  %327 = vst [vmem:[#allocation2 + $0x30] sm:$0xf] %v2168_v47  ;;  %v2876_v1 = vld [vmem:[#allocation2 + $0x188] sm:$0xf0]  ;;  %v2169_v2 = vld [vmem:[%s3108_s26 + $0xe0] sm:$0xf]  ;;  %v2358_v14 = vor.u32 %v2858_v63, %v2357_v62 }
  0x26   : > { %359 = vst [vmem:[#allocation2 + $0x10] sm:$0xf] %v2183_v48  ;;  %v2927_v3 = vld [vmem:[%s3618_s1 + $0xe0] sm:$0xff]  ;;  %v2501_v5 = vld [vmem:[#allocation2 + $0x1f8] sm:$0xf]  ;;  %v2430_v15 = vor.u32 %v2876_v1, %v2429_v0  ;;  %v2909_v21 = vld [vmem:[%s3618_s1 + $0x50] sm:$0xff] }
  0x27   : > { %360 = vst [vmem:[#allocation2 + $0x34] sm:$0xf] %v2184_v49  ;;  %v2935_v4 = vld [vmem:[%s3618_s1 + $0x120] sm:$0xff]  ;;  %v2894_v6 = vld [vmem:[#allocation2 + $0x218] sm:$0xf0]  ;;  %v2925_v22 = vld [vmem:[%s3618_s1 + $0xd0] sm:$0xff] }
  0x28   : > { %3039 = vmatpush.bf16.msra.mxu1 %v2899_v23  ;;  %3040 = vmatpush.bf16.msra.mxu2 %v2899_v23  ;;  %262 = vst [vmem:[#allocation2 + $0x4c] sm:$0xf] %v2137_v52  ;;  %v2170_v7 = vld [vmem:[%s3108_s26 + $0xe4] sm:$0xf]  ;;  %v2285_v8 = vld [vmem:[#allocation2 + $0x48] sm:$0xf]  ;;  %v2502_v16 = vor.u32 %v2894_v6, %v2501_v5 }
  0x29   : > { %3041 = vmatpush.bf16.msra.mxu3 %v2899_v23  ;;  %1539 = vmatpush.bf16.msra.mxu0 %v2899_v23  ;;  %263 = vst [vmem:[#allocation2 + $0x70] sm:$0xf] %v2138_v55  ;;  %v2185_v9 = vld [vmem:[%s3108_s26 + $0x128] sm:$0xf]  ;;  %v2840_v10 = vld [vmem:[#allocation2 + $0x68] sm:$0xf0] }
  0x2a   : > { %295 = vst [vmem:[#allocation2 + $0x50] sm:$0xf] %v2153_v60  ;;  %v2186_v11 = vld [vmem:[%s3108_s26 + $0x12c] sm:$0xf]  ;;  %v2918_v12 = vld [vmem:[%s3618_s1 + $0x98] sm:$0xff]  ;;  %v2286_v17 = vor.u32 %v2840_v10, %v2285_v8  ;;  %v2933_v23 = vld [vmem:[%s3618_s1 + $0x110] sm:$0xff] }
  0x2b   : > { %1550 = vmatmul.bf16.vlgmr.msra.gmra.mxu1 %v2322_v36  ;;  %1560 = vmatmul.bf16.vlgmr.msra.gmra.mxu2 %v2394_v37  ;;  %296 = vst [vmem:[#allocation2 + $0x74] sm:$0xf] %v2154_v61  ;;  %v2910_v13 = vld [vmem:[%s3618_s1 + $0x58] sm:$0xff]  ;;  %v2916_v24 = vld [vmem:[%s3618_s1 + $0x88] sm:$0xff]  ;;  %v2915_v30 = vld [vmem:[%s3618_s1 + $0x80] sm:$0xff] }
  0x2c   : > { %1630 = vmatpush.bf16.msrb.mxu2 %v2922_v34  ;;  %1581 = vmatpush.bf16.msrb.mxu1 %v2914_v35  ;;  %328 = vst [vmem:[#allocation2 + $0x54] sm:$0xf] %v2169_v2  ;;  %v2926_v18 = vld [vmem:[%s3618_s1 + $0xd8] sm:$0xff]  ;;  %v2908_v25 = vld [vmem:[%s3618_s1 + $0x48] sm:$0xff]  ;;  %v2907_v31 = vld [vmem:[%s3618_s1 + $0x40] sm:$0xff] }
  0x2d   : > { %1570 = vmatmul.bf16.vlgmr.msra.gmra.mxu3 %v2466_v40  ;;  %1540 = vmatmul.bf16.vlgmr.msra.gmra.mxu0 %v2250_v42  ;;  %329 = vst [vmem:[#allocation2 + $0x78] sm:$0xf] %v2170_v7  ;;  %v2934_v19 = vld [vmem:[%s3618_s1 + $0x118] sm:$0xff]  ;;  %v2924_v28 = vld [vmem:[%s3618_s1 + $0xc8] sm:$0xff]  ;;  %v2155_v34 = vld [vmem:[%s3108_s26 + $0xa0] sm:$0xf] }
  0x2e   : > { %1679 = vmatpush.bf16.msrb.mxu3 %v2930_v41  ;;  %1728 = vmatpush.bf16.msrb.mxu0 %v2938_v43  ;;  %361 = vst [vmem:[#allocation2 + $0x58] sm:$0xf] %v2185_v9  ;;  %v2139_v26 = vld [vmem:[%s3108_s26 + $0x58] sm:$0xf]  ;;  %v2140_v27 = vld [vmem:[%s3108_s26 + $0x5c] sm:$0xf] }
  0x2f   : > { %362 = vst [vmem:[#allocation2 + $0x7c] sm:$0xf] %v2186_v11  ;;  %v2932_v29 = vld [vmem:[%s3618_s1 + $0x108] sm:$0xff]  ;;  %v2954_v32 = vld [vmem:[%s3618_s1 + $0x1b8] sm:$0xff]  ;;  %v2156_v35 = vld [vmem:[%s3108_s26 + $0xa4] sm:$0xf] }
  0x30   : > { %1631 = vmatpush.bf16.msrb.mxu2 %v2921_v45  ;;  %1582 = vmatpush.bf16.msrb.mxu1 %v2913_v46  ;;  %264 = vst [vmem:[#allocation2 + $0x94] sm:$0xf] %v2139_v26  ;;  %v2946_v33 = vld [vmem:[%s3618_s1 + $0x178] sm:$0xff]  ;;  %v2171_v36 = vld [vmem:[%s3108_s26 + $0xe8] sm:$0xf]  ;;  %v2923_v42 = vld [vmem:[%s3618_s1 + $0xc0] sm:$0xff] }
  0x31   : > { %265 = vst [vmem:[#allocation2 + $0xb8] sm:$0xf] %v2140_v27  ;;  %v2827_v37 = vld [vmem:[#allocation2 + $0x4] sm:$0xf]  ;;  %v2251_v38 = vld [vmem:[#allocation2 + $0x24] sm:$0xf0] }
  0x32   : > { %1680 = vmatpush.bf16.msrb.mxu3 %v2929_v50  ;;  %1729 = vmatpush.bf16.msrb.mxu0 %v2937_v51  ;;  %v2257_v39 = vld [vmem:[#allocation2 + $0x8] sm:$0xf]  ;;  %v2832_v40 = vld [vmem:[#allocation2 + $0x28] sm:$0xf0]  ;;  %297 = vst [vmem:[#allocation2 + $0x98] sm:$0xf] %v2155_v34  ;;  %v2254_v52 = vor.u32 %v2827_v37, %v2251_v38 }
  0x33   : > { %v2172_v41 = vld [vmem:[%s3108_s26 + $0xec] sm:$0xf]  ;;  %v2931_v43 = vld [vmem:[%s3618_s1 + $0x100] sm:$0xff]  ;;  %298 = vst [vmem:[#allocation2 + $0xbc] sm:$0xf] %v2156_v35  ;;  %v2962_v50 = vld [vmem:[%s3618_s1 + $0x1f8] sm:$0xff] }
  0x34   : > { %1632 = vmatpush.bf16.msrb.mxu2 %v2920_v53  ;;  %1583 = vmatpush.bf16.msrb.mxu1 %v2912_v54  ;;  %v2828_v44 = vld [vmem:[#allocation2 + $0xc] sm:$0xf]  ;;  %v2187_v45 = vld [vmem:[%s3108_s26 + $0x130] sm:$0xf]  ;;  %330 = vst [vmem:[#allocation2 + $0x9c] sm:$0xf] %v2171_v36  ;;  %v2258_v53 = vor.u32 %v2832_v40, %v2257_v39 }
  0x35   : > { %v2259_v46 = vld [vmem:[#allocation2 + $0x2c] sm:$0xf0]  ;;  %v2188_v47 = vld [vmem:[%s3108_s26 + $0x134] sm:$0xf]  ;;  %331 = vst [vmem:[#allocation2 + $0xc0] sm:$0xf] %v2172_v41 }
  0x36   : > { %1681 = vmatpush.bf16.msrb.mxu3 %v2928_v56  ;;  %1730 = vmatpush.bf16.msrb.mxu0 %v2936_v57  ;;  %v2265_v48 = vld [vmem:[#allocation2 + $0x10] sm:$0xf]  ;;  %v2833_v49 = vld [vmem:[#allocation2 + $0x30] sm:$0xf0]  ;;  %v2970_v51 = vld [vmem:[%s3618_s1 + $0x238] sm:$0xff]  ;;  %v2262_v54 = vor.u32 %v2828_v44, %v2259_v46 }
  0x37   : > { %363 = vst [vmem:[#allocation2 + $0xa0] sm:$0xf] %v2187_v45  ;;  %v2266_v55 = vor.u32 %v2833_v49, %v2265_v48  ;;  %v2953_v56 = vld [vmem:[%s3618_s1 + $0x1b0] sm:$0xff]  ;;  %v2952_v60 = vld [vmem:[%s3618_s1 + $0x1a8] sm:$0xff]  ;;  %v2141_v0 = vld [vmem:[%s3108_s26 + $0x60] sm:$0xf] }
  0x38   : > { %1633 = vmatpush.bf16.msrb.mxu2 %v2919_v58  ;;  %1584 = vmatpush.bf16.msrb.mxu1 %v2911_v59  ;;  %364 = vst [vmem:[#allocation2 + $0xc4] sm:$0xf] %v2188_v47  ;;  %v2945_v57 = vld [vmem:[%s3618_s1 + $0x170] sm:$0xff]  ;;  %v2960_v61 = vld [vmem:[%s3618_s1 + $0x1e8] sm:$0xff]  ;;  %v2142_v1 = vld [vmem:[%s3108_s26 + $0x64] sm:$0xf] }
  0x39   : > { %v2961_v58 = vld [vmem:[%s3618_s1 + $0x1f0] sm:$0xff]  ;;  %v2944_v62 = vld [vmem:[%s3618_s1 + $0x168] sm:$0xff]  ;;  %266 = vst [vmem:[#allocation2 + $0xdc] sm:$0xf] %v2141_v0  ;;  %v2189_v11 = vld [vmem:[%s3108_s26 + $0x138] sm:$0xf] }
  0x3a   : > { %1682 = vmatpush.bf16.msrb.mxu3 %v2927_v3  ;;  %1731 = vmatpush.bf16.msrb.mxu0 %v2935_v4  ;;  %v2969_v59 = vld [vmem:[%s3618_s1 + $0x230] sm:$0xff]  ;;  %v2968_v63 = vld [vmem:[%s3618_s1 + $0x228] sm:$0xff]  ;;  %267 = vst [vmem:[#allocation2 + $0x100] sm:$0xf] %v2142_v1  ;;  %v2191_v35 = vld [vmem:[%s3108_s26 + $0x140] sm:$0xf] }
  0x3b   : > { %1555 = vmatmul.bf16.gmra.mxu1 %v2358_v14  ;;  %1565 = vmatmul.bf16.gmra.mxu2 %v2430_v15  ;;  %v2157_v2 = vld [vmem:[%s3108_s26 + $0xa8] sm:$0xf]  ;;  %v2158_v3 = vld [vmem:[%s3108_s26 + $0xac] sm:$0xf]  ;;  %v2173_v4 = vld [vmem:[%s3108_s26 + $0xf0] sm:$0xf] }
  0x3c   : > { %1634 = vmatpush.bf16.msrb.mxu2 %v2918_v12  ;;  %1585 = vmatpush.bf16.msrb.mxu1 %v2910_v13  ;;  %v2836_v5 = vld [vmem:[#allocation2 + $0x4c] sm:$0xf]  ;;  %v2287_v6 = vld [vmem:[#allocation2 + $0x6c] sm:$0xf0]  ;;  %v2841_v8 = vld [vmem:[#allocation2 + $0x70] sm:$0xf0] }
  0x3d   : > { %1575 = vmatmul.bf16.gmra.mxu3 %v2502_v16  ;;  %1545 = vmatmul.bf16.gmra.mxu0 %v2286_v17  ;;  %v2293_v7 = vld [vmem:[#allocation2 + $0x50] sm:$0xf]  ;;  %299 = vst [vmem:[#allocation2 + $0xe0] sm:$0xf] %v2157_v2  ;;  %v2174_v9 = vld [vmem:[%s3108_s26 + $0xf4] sm:$0xf]  ;;  %v2290_v16 = vor.u32 %v2836_v5, %v2287_v6 }
  0x3e   : > { %1683 = vmatpush.bf16.msrb.mxu3 %v2926_v18  ;;  %1732 = vmatpush.bf16.msrb.mxu0 %v2934_v19  ;;  %v2837_v10 = vld [vmem:[#allocation2 + $0x54] sm:$0xf]  ;;  %300 = vst [vmem:[#allocation2 + $0x104] sm:$0xf] %v2158_v3  ;;  %v2295_v12 = vld [vmem:[#allocation2 + $0x74] sm:$0xf0]  ;;  %v2294_v17 = vor.u32 %v2841_v8, %v2293_v7 }
  0x3f   : > { %332 = vst [vmem:[#allocation2 + $0xe4] sm:$0xf] %v2173_v4  ;;  %v2190_v13 = vld [vmem:[%s3108_s26 + $0x13c] sm:$0xf]  ;;  %v2301_v14 = vld [vmem:[#allocation2 + $0x58] sm:$0xf]  ;;  %v2298_v18 = vor.u32 %v2837_v10, %v2295_v12 }
  0x40   : > { %1635 = vmatpush.bf16.msrb.mxu2 %v2917_v20  ;;  %1586 = vmatpush.bf16.msrb.mxu1 %v2909_v21  ;;  %v2842_v15 = vld [vmem:[#allocation2 + $0x78] sm:$0xf0]  ;;  %333 = vst [vmem:[#allocation2 + $0x108] sm:$0xf] %v2174_v9  ;;  %v2951_v20 = vld [vmem:[%s3618_s1 + $0x1a0] sm:$0xff]  ;;  %v2949_v4 = vld [vmem:[%s3618_s1 + $0x190] sm:$0xff] }
  0x41   : > { %365 = vst [vmem:[#allocation2 + $0xe8] sm:$0xf] %v2189_v11  ;;  %v2302_v19 = vor.u32 %v2842_v15, %v2301_v14  ;;  %v2959_v21 = vld [vmem:[%s3618_s1 + $0x1e0] sm:$0xff]  ;;  %v2159_v26 = vld [vmem:[%s3108_s26 + $0xb0] sm:$0xf]  ;;  %v2950_v44 = vld [vmem:[%s3618_s1 + $0x198] sm:$0xff] }
  0x42   : > { %1684 = vmatpush.bf16.msrb.mxu3 %v2925_v22  ;;  %1733 = vmatpush.bf16.msrb.mxu0 %v2933_v23  ;;  %366 = vst [vmem:[#allocation2 + $0x10c] sm:$0xf] %v2190_v13  ;;  %v2943_v22 = vld [vmem:[%s3618_s1 + $0x160] sm:$0xff]  ;;  %v2160_v27 = vld [vmem:[%s3108_s26 + $0xb4] sm:$0xf]  ;;  %v2958_v45 = vld [vmem:[%s3618_s1 + $0x1d8] sm:$0xff] }
  0x43   : > { %v2967_v23 = vld [vmem:[%s3618_s1 + $0x220] sm:$0xff]  ;;  %301 = vst [vmem:[#allocation2 + $0x128] sm:$0xf] %v2159_v26  ;;  %v2846_v34 = vld [vmem:[#allocation2 + $0x9c] sm:$0xf]  ;;  %v2957_v5 = vld [vmem:[%s3618_s1 + $0x1d0] sm:$0xff] }
  0x44   : > { %1636 = vmatpush.bf16.msrb.mxu2 %v2916_v24  ;;  %1587 = vmatpush.bf16.msrb.mxu1 %v2908_v25  ;;  %v2143_v24 = vld [vmem:[%s3108_s26 + $0x68] sm:$0xf]  ;;  %v2144_v25 = vld [vmem:[%s3108_s26 + $0x6c] sm:$0xf]  ;;  %302 = vst [vmem:[#allocation2 + $0x14c] sm:$0xf] %v2160_v27 }
  0x45   : > { %268 = vst [vmem:[#allocation2 + $0x124] sm:$0xf] %v2143_v24  ;;  %v2331_v36 = vld [vmem:[#allocation2 + $0xbc] sm:$0xf0]  ;;  %v2192_v37 = vld [vmem:[%s3108_s26 + $0x144] sm:$0xf] }
  0x46   : > { %1685 = vmatpush.bf16.msrb.mxu3 %v2924_v28  ;;  %1734 = vmatpush.bf16.msrb.mxu0 %v2932_v29  ;;  %269 = vst [vmem:[#allocation2 + $0x148] sm:$0xf] %v2144_v25  ;;  %v2175_v28 = vld [vmem:[%s3108_s26 + $0xf8] sm:$0xf]  ;;  %v2845_v29 = vld [vmem:[#allocation2 + $0x94] sm:$0xf] }
  0x47   : > { %334 = vst [vmem:[#allocation2 + $0x12c] sm:$0xf] %v2175_v28  ;;  %v2337_v38 = vld [vmem:[#allocation2 + $0xa0] sm:$0xf]  ;;  %v2851_v39 = vld [vmem:[#allocation2 + $0xc0] sm:$0xf0] }
  0x48   : > { %1637 = vmatpush.bf16.msrb.mxu2 %v2915_v30  ;;  %1588 = vmatpush.bf16.msrb.mxu1 %v2907_v31  ;;  %v2323_v30 = vld [vmem:[#allocation2 + $0xb4] sm:$0xf0]  ;;  %367 = vst [vmem:[#allocation2 + $0x130] sm:$0xf] %v2191_v35  ;;  %v2145_v48 = vld [vmem:[%s3108_s26 + $0x70] sm:$0xf] }
  0x49   : > { %v2329_v31 = vld [vmem:[#allocation2 + $0x98] sm:$0xf]  ;;  %v2326_v40 = vor.u32 %v2845_v29, %v2323_v30  ;;  %368 = vst [vmem:[#allocation2 + $0x154] sm:$0xf] %v2192_v37  ;;  %v2146_v49 = vld [vmem:[%s3108_s26 + $0x74] sm:$0xf] }
  0x4a   : > { %1686 = vmatpush.bf16.msrb.mxu3 %v2923_v42  ;;  %1735 = vmatpush.bf16.msrb.mxu0 %v2931_v43  ;;  %v2334_v42 = vor.u32 %v2846_v34, %v2331_v36  ;;  %v2338_v43 = vor.u32 %v2851_v39, %v2337_v38  ;;  %v2942_v46 = vld [vmem:[%s3618_s1 + $0x158] sm:$0xff]  ;;  %270 = vst [vmem:[#allocation2 + $0x16c] sm:$0xf] %v2145_v48  ;;  %v2941_v6 = vld [vmem:[%s3618_s1 + $0x150] sm:$0xff]  ;;  %v2163_v10 = vld [vmem:[%s3108_s26 + $0xc0] sm:$0xf] }
  0x4b   : > { %1589 = vmatmul.bf16.vlgmr.msrb.gmra.mxu1 %v2254_v52  ;;  %1638 = vmatmul.bf16.vlgmr.msrb.gmra.mxu2 %v2258_v53  ;;  %v2966_v47 = vld [vmem:[%s3618_s1 + $0x218] sm:$0xff]  ;;  %271 = vst [vmem:[#allocation2 + $0x190] sm:$0xf] %v2146_v49  ;;  %v2177_v52 = vld [vmem:[%s3108_s26 + $0x100] sm:$0xf]  ;;  %v2965_v7 = vld [vmem:[%s3618_s1 + $0x210] sm:$0xff] }
  0x4c   : > { %1826 = vmatpush.bf16.msra.mxu2 %v2954_v32  ;;  %1777 = vmatpush.bf16.msra.mxu1 %v2946_v33  ;;  %v2850_v32 = vld [vmem:[#allocation2 + $0xb8] sm:$0xf0]  ;;  %336 = vst [vmem:[#allocation2 + $0x174] sm:$0xf] %v2177_v52  ;;  %v2147_v8 = vld [vmem:[%s3108_s26 + $0x78] sm:$0xf] }
  0x4d   : > { %1687 = vmatmul.bf16.vlgmr.msrb.gmra.mxu3 %v2262_v54  ;;  %1736 = vmatmul.bf16.vlgmr.msrb.gmra.mxu0 %v2266_v55  ;;  %v2176_v33 = vld [vmem:[%s3108_s26 + $0xfc] sm:$0xf]  ;;  %v2330_v41 = vor.u32 %v2850_v32, %v2329_v31  ;;  %v2359_v54 = vld [vmem:[#allocation2 + $0xfc] sm:$0xf0]  ;;  %v2863_v11 = vld [vmem:[#allocation2 + $0x124] sm:$0xf] }
  0x4e   : > { %1875 = vmatpush.bf16.msra.mxu3 %v2962_v50  ;;  %1924 = vmatpush.bf16.msra.mxu0 %v2970_v51  ;;  %335 = vst [vmem:[#allocation2 + $0x150] sm:$0xf] %v2176_v33  ;;  %v2161_v50 = vld [vmem:[%s3108_s26 + $0xb8] sm:$0xf]  ;;  %v2162_v51 = vld [vmem:[%s3108_s26 + $0xbc] sm:$0xf] }
  0x4f   : > { %v2854_v53 = vld [vmem:[#allocation2 + $0xdc] sm:$0xf]  ;;  %v2365_v55 = vld [vmem:[#allocation2 + $0xe0] sm:$0xf]  ;;  %303 = vst [vmem:[#allocation2 + $0x170] sm:$0xf] %v2161_v50 }
  0x50   : > { %1827 = vmatpush.bf16.msra.mxu2 %v2953_v56  ;;  %1778 = vmatpush.bf16.msra.mxu1 %v2945_v57  ;;  %v2859_v56 = vld [vmem:[#allocation2 + $0x100] sm:$0xf0]  ;;  %304 = vst [vmem:[#allocation2 + $0x194] sm:$0xf] %v2162_v51  ;;  %v2362_v0 = vor.u32 %v2854_v53, %v2359_v54  ;;  %v2148_v9 = vld [vmem:[%s3108_s26 + $0x7c] sm:$0xf] }
  0x51   : > { %v2178_v57 = vld [vmem:[%s3108_s26 + $0x104] sm:$0xf]  ;;  %v2366_v1 = vor.u32 %v2859_v56, %v2365_v55  ;;  %v2395_v12 = vld [vmem:[#allocation2 + $0x144] sm:$0xf0]  ;;  %v2868_v14 = vld [vmem:[#allocation2 + $0x148] sm:$0xf0] }
  0x52   : > { %1876 = vmatpush.bf16.msra.mxu3 %v2961_v58  ;;  %1925 = vmatpush.bf16.msra.mxu0 %v2969_v59  ;;  %v2855_v58 = vld [vmem:[#allocation2 + $0xe4] sm:$0xf]  ;;  %v2193_v59 = vld [vmem:[%s3108_s26 + $0x148] sm:$0xf]  ;;  %337 = vst [vmem:[#allocation2 + $0x198] sm:$0xf] %v2178_v57  ;;  %v2398_v24 = vor.u32 %v2863_v11, %v2395_v12 }
  0x53   : > { %369 = vst [vmem:[#allocation2 + $0x178] sm:$0xf] %v2193_v59  ;;  %v2401_v13 = vld [vmem:[#allocation2 + $0x128] sm:$0xf]  ;;  %v2164_v15 = vld [vmem:[%s3108_s26 + $0xc4] sm:$0xf] }
  0x54   : > { %1828 = vmatpush.bf16.msra.mxu2 %v2952_v60  ;;  %1779 = vmatpush.bf16.msra.mxu1 %v2944_v62  ;;  %v2367_v60 = vld [vmem:[#allocation2 + $0x104] sm:$0xf0]  ;;  %272 = vst [vmem:[#allocation2 + $0x1b4] sm:$0xf] %v2147_v8  ;;  %v2402_v25 = vor.u32 %v2868_v14, %v2401_v13  ;;  %v2149_v31 = vld [vmem:[%s3108_s26 + $0x80] sm:$0xf] }
  0x55   : > { %v2373_v62 = vld [vmem:[#allocation2 + $0xe8] sm:$0xf]  ;;  %v2370_v2 = vor.u32 %v2855_v58, %v2367_v60  ;;  %273 = vst [vmem:[#allocation2 + $0x1d8] sm:$0xf] %v2148_v9  ;;  %v2150_v32 = vld [vmem:[%s3108_s26 + $0x84] sm:$0xf] }
  0x56   : > { %1877 = vmatpush.bf16.msra.mxu3 %v2960_v61  ;;  %1926 = vmatpush.bf16.msra.mxu0 %v2968_v63  ;;  %v2194_v61 = vld [vmem:[%s3108_s26 + $0x14c] sm:$0xf]  ;;  %305 = vst [vmem:[#allocation2 + $0x1b8] sm:$0xf] %v2163_v10  ;;  %v2165_v33 = vld [vmem:[%s3108_s26 + $0xc8] sm:$0xf] }
  0x57   : > { %v2860_v63 = vld [vmem:[#allocation2 + $0x108] sm:$0xf0]  ;;  %370 = vst [vmem:[#allocation2 + $0x19c] sm:$0xf] %v2194_v61  ;;  %v2431_v35 = vld [vmem:[#allocation2 + $0x18c] sm:$0xf0] }
  0x58   : > { %1829 = vmatpush.bf16.msra.mxu2 %v2951_v20  ;;  %1780 = vmatpush.bf16.msra.mxu1 %v2943_v22  ;;  %v2374_v3 = vor.u32 %v2860_v63, %v2373_v62  ;;  %v2180_v20 = vld [vmem:[%s3108_s26 + $0x10c] sm:$0xf]  ;;  %306 = vst [vmem:[#allocation2 + $0x1dc] sm:$0xf] %v2164_v15  ;;  %v2195_v22 = vld [vmem:[%s3108_s26 + $0x150] sm:$0xf] }
  0x59   : > { %339 = vst [vmem:[#allocation2 + $0x1e0] sm:$0xf] %v2180_v20  ;;  %v2948_v28 = vld [vmem:[%s3618_s1 + $0x188] sm:$0xff]  ;;  %v2437_v36 = vld [vmem:[#allocation2 + $0x170] sm:$0xf]  ;;  %v2947_v52 = vld [vmem:[%s3618_s1 + $0x180] sm:$0xff] }
  0x5a   : > { %1878 = vmatpush.bf16.msra.mxu3 %v2959_v21  ;;  %1927 = vmatpush.bf16.msra.mxu0 %v2967_v23  ;;  %v2869_v21 = vld [vmem:[#allocation2 + $0x150] sm:$0xf0]  ;;  %371 = vst [vmem:[#allocation2 + $0x1c0] sm:$0xf] %v2195_v22  ;;  %v2956_v29 = vld [vmem:[%s3618_s1 + $0x1c8] sm:$0xff]  ;;  %v2955_v53 = vld [vmem:[%s3618_s1 + $0x1c0] sm:$0xff] }
  0x5b   : > { %1594 = vmatmul.bf16.gmra.mxu1 %v2290_v16  ;;  %1643 = vmatmul.bf16.gmra.mxu2 %v2294_v17  ;;  %v2864_v16 = vld [vmem:[#allocation2 + $0x12c] sm:$0xf]  ;;  %v2403_v17 = vld [vmem:[#allocation2 + $0x14c] sm:$0xf0]  ;;  %v2196_v23 = vld [vmem:[%s3108_s26 + $0x154] sm:$0xf] }
  0x5c   : > { %1830 = vmatpush.bf16.msra.mxu2 %v2950_v44  ;;  %1781 = vmatpush.bf16.msra.mxu1 %v2942_v46  ;;  %v2406_v26 = vor.u32 %v2864_v16, %v2403_v17  ;;  %372 = vst [vmem:[#allocation2 + $0x1e4] sm:$0xf] %v2196_v23  ;;  %v2940_v30 = vld [vmem:[%s3618_s1 + $0x148] sm:$0xff]  ;;  %v2877_v37 = vld [vmem:[#allocation2 + $0x190] sm:$0xf0]  ;;  %v2939_v54 = vld [vmem:[%s3618_s1 + $0x140] sm:$0xff] }
  0x5d   : > { %1692 = vmatmul.bf16.gmra.mxu3 %v2298_v18  ;;  %1741 = vmatmul.bf16.gmra.mxu0 %v2302_v19  ;;  %v2179_v18 = vld [vmem:[%s3108_s26 + $0x108] sm:$0xf]  ;;  %v2409_v19 = vld [vmem:[#allocation2 + $0x130] sm:$0xf]  ;;  %v2872_v34 = vld [vmem:[#allocation2 + $0x16c] sm:$0xf]  ;;  %v2438_v49 = vor.u32 %v2877_v37, %v2437_v36 }
  0x5e   : > { %1879 = vmatpush.bf16.msra.mxu3 %v2958_v45  ;;  %1928 = vmatpush.bf16.msra.mxu0 %v2966_v47  ;;  %338 = vst [vmem:[#allocation2 + $0x1bc] sm:$0xf] %v2179_v18  ;;  %v2410_v27 = vor.u32 %v2869_v21, %v2409_v19  ;;  %v2964_v38 = vld [vmem:[%s3618_s1 + $0x208] sm:$0xff]  ;;  %v2182_v44 = vld [vmem:[%s3108_s26 + $0x114] sm:$0xf]  ;;  %v2434_v48 = vor.u32 %v2872_v34, %v2431_v35  ;;  %v2963_v62 = vld [vmem:[%s3618_s1 + $0x200] sm:$0xff] }
  0x5f   : > { %274 = vst [vmem:[#allocation2 + $0x1fc] sm:$0xf] %v2149_v31  ;;  %v2166_v39 = vld [vmem:[%s3108_s26 + $0xcc] sm:$0xf]  ;;  %v2878_v45 = vld [vmem:[#allocation2 + $0x198] sm:$0xf0] }
  0x60   : > { %1831 = vmatpush.bf16.msra.mxu2 %v2949_v4  ;;  %1782 = vmatpush.bf16.msra.mxu1 %v2941_v6  ;;  %275 = vst [vmem:[#allocation2 + $0x220] sm:$0xf] %v2150_v32  ;;  %v2197_v46 = vld [vmem:[%s3108_s26 + $0x158] sm:$0xf]  ;;  %v2198_v47 = vld [vmem:[%s3108_s26 + $0x15c] sm:$0xf] }
  0x61   : > { %307 = vst [vmem:[#allocation2 + $0x200] sm:$0xf] %v2165_v33  ;;  %v2199_v55 = vld [vmem:[%s3108_s26 + $0x168] sm:$0xf]  ;;  %v2200_v56 = vld [vmem:[%s3108_s26 + $0x16c] sm:$0xf] }
  0x62   : > { %1880 = vmatpush.bf16.msra.mxu3 %v2957_v5  ;;  %1929 = vmatpush.bf16.msra.mxu0 %v2965_v7  ;;  %308 = vst [vmem:[#allocation2 + $0x224] sm:$0xf] %v2166_v39  ;;  %v408_v57 = vld [vmem:[%s3108_s26 + $0x8] sm:$0xf]  ;;  %v2881_v58 = vld [vmem:[#allocation2 + $0x1b4] sm:$0xf] }
  0x63   : > { %341 = vst [vmem:[#allocation2 + $0x228] sm:$0xf] %v2182_v44  ;;  %v2467_v59 = vld [vmem:[#allocation2 + $0x1d4] sm:$0xf0]  ;;  %v2886_v61 = vld [vmem:[#allocation2 + $0x1d8] sm:$0xf0] }
  0x64   : > { %1832 = vmatpush.bf16.msra.mxu2 %v2948_v28  ;;  %1783 = vmatpush.bf16.msra.mxu1 %v2940_v30  ;;  %373 = vst [vmem:[#allocation2 + $0x208] sm:$0xf] %v2197_v46  ;;  %v2473_v60 = vld [vmem:[#allocation2 + $0x1b8] sm:$0xf]  ;;  %v409_v63 = vld [vmem:[%s3108_s26 + $0xc] sm:$0xf]  ;;  %v2470_v8 = vor.u32 %v2881_v58, %v2467_v59 }
  0x65   : > { %374 = vst [vmem:[#allocation2 + $0x22c] sm:$0xf] %v2198_v47  ;;  %v2216_v4 = vld [vmem:[%s3108_s26 + $0x54] sm:$0xf]  ;;  %v2887_v5 = vld [vmem:[#allocation2 + $0x1e0] sm:$0xf0]  ;;  %v2474_v9 = vor.u32 %v2886_v61, %v2473_v60 }
  0x66   : > { %1881 = vmatpush.bf16.msra.mxu3 %v2956_v29  ;;  %1930 = vmatpush.bf16.msra.mxu0 %v2964_v38  ;;  %392 = vst [vmem:[#allocation2 + $0x14] sm:$0xf] %v2199_v55  ;;  %v2231_v6 = vld [vmem:[%s3108_s26 + $0x98] sm:$0xf]  ;;  %v2232_v7 = vld [vmem:[%s3108_s26 + $0x9c] sm:$0xf] }
  0x67   : > { %393 = vst [vmem:[#allocation2 + $0x38] sm:$0xf] %v2200_v56  ;;  %v3412_v14 = vld [vmem:[%s3619_s2] ss:$0 sm:$0xff]  ;;  %v2201_v21 = vld [vmem:[%s3108_s26 + $0x170] sm:$0xf] }
  0x68   : > { %1833 = vmatpush.bf16.msra.mxu2 %v2947_v52  ;;  %1784 = vmatpush.bf16.msra.mxu1 %v2939_v54  ;;  %424 = vst [vmem:[#allocation2 + $0x18] sm:$0xf] %v408_v57  ;;  %v2202_v22 = vld [vmem:[%s3108_s26 + $0x174] sm:$0xf]  ;;  %v410_v23 = vld [vmem:[%s3108_s26 + $0x10] sm:$0xf] }
  0x69   : > { %425 = vst [vmem:[#allocation2 + $0x3c] sm:$0xf] %v409_v63  ;;  %v411_v28 = vld [vmem:[%s3108_s26 + $0x14] sm:$0xf]  ;;  %v2217_v31 = vld [vmem:[%s3108_s26 + $0x58] sm:$0xf] }
  0x6a   : > { %1882 = vmatpush.bf16.msra.mxu3 %v2955_v53  ;;  %1931 = vmatpush.bf16.msra.mxu0 %v2963_v62  ;;  %457 = vst [vmem:[#allocation2 + $0x40] sm:$0xf] %v2216_v4  ;;  %v2511_v30 = vld [vmem:[#allocation2 + $0x224] sm:$0xf0]  ;;  %v2218_v33 = vld [vmem:[%s3108_s26 + $0x5c] sm:$0xf] }
  0x6b   : > { %1599 = vmatmul.bf16.gmra.mxu1 %v2326_v40  ;;  %1648 = vmatmul.bf16.gmra.mxu2 %v2330_v41  ;;  %v2873_v40 = vld [vmem:[#allocation2 + $0x174] sm:$0xf]  ;;  %v2439_v41 = vld [vmem:[#allocation2 + $0x194] sm:$0xf0]  ;;  %488 = vst [vmem:[#allocation2 + $0x20] sm:$0xf] %v2231_v6 }
  0x6c   : > { %v2442_v50 = vor.u32 %v2873_v40, %v2439_v41  ;;  %489 = vst [vmem:[#allocation2 + $0x44] sm:$0xf] %v2232_v7  ;;  %v2517_v32 = vld [vmem:[#allocation2 + $0x208] sm:$0xf]  ;;  %v2896_v34 = vld [vmem:[#allocation2 + $0x228] sm:$0xf0] }
  0x6d   : > { %1697 = vmatmul.bf16.gmra.mxu3 %v2334_v42  ;;  %1746 = vmatmul.bf16.gmra.mxu0 %v2338_v43  ;;  %v2181_v42 = vld [vmem:[%s3108_s26 + $0x110] sm:$0xf]  ;;  %v2445_v43 = vld [vmem:[#allocation2 + $0x178] sm:$0xf]  ;;  %394 = vst [vmem:[#allocation2 + $0x5c] sm:$0xf] %v2201_v21 }
  0x6e   : > { %340 = vst [vmem:[#allocation2 + $0x204] sm:$0xf] %v2181_v42  ;;  %v2446_v51 = vor.u32 %v2878_v45, %v2445_v43  ;;  %v2233_v35 = vld [vmem:[%s3108_s26 + $0xa0] sm:$0xf]  ;;  %v2234_v37 = vld [vmem:[%s3108_s26 + $0xa4] sm:$0xf]  ;;  %v2518_v45 = vor.u32 %v2896_v34, %v2517_v32 }
  0x6f   : > { %395 = vst [vmem:[#allocation2 + $0x80] sm:$0xf] %v2202_v22  ;;  %v2203_v53 = vld [vmem:[%s3108_s26 + $0x178] sm:$0xf]  ;;  %v2204_v54 = vld [vmem:[%s3108_s26 + $0x17c] sm:$0xf] }
  0x70   : > { %426 = vst [vmem:[#allocation2 + $0x60] sm:$0xf] %v410_v23  ;;  %v412_v55 = vld [vmem:[%s3108_s26 + $0x18] sm:$0xf]  ;;  %v2829_v56 = vld [vmem:[#allocation2 + $0x14] sm:$0xf] }
  0x71   : > { %427 = vst [vmem:[#allocation2 + $0x84] sm:$0xf] %v411_v28  ;;  %v2267_v57 = vld [vmem:[#allocation2 + $0x34] sm:$0xf0]  ;;  %v2834_v59 = vld [vmem:[#allocation2 + $0x38] sm:$0xf0] }
  0x72   : > { %458 = vst [vmem:[#allocation2 + $0x64] sm:$0xf] %v2217_v31  ;;  %v2273_v58 = vld [vmem:[#allocation2 + $0x18] sm:$0xf]  ;;  %v413_v60 = vld [vmem:[%s3108_s26 + $0x1c] sm:$0xf] }
  0x73   : > { %459 = vst [vmem:[#allocation2 + $0x88] sm:$0xf] %v2218_v33  ;;  %v2275_v62 = vld [vmem:[#allocation2 + $0x3c] sm:$0xf0]  ;;  %v2206_v32 = vld [vmem:[%s3108_s26 + $0x184] sm:$0xf] }
  0x74   : > { %490 = vst [vmem:[#allocation2 + $0x68] sm:$0xf] %v2233_v35  ;;  %v2219_v63 = vld [vmem:[%s3108_s26 + $0x60] sm:$0xf]  ;;  %v2838_v34 = vld [vmem:[#allocation2 + $0x5c] sm:$0xf] }
  0x75   : > { %v2891_v29 = vld [vmem:[#allocation2 + $0x204] sm:$0xf]  ;;  %491 = vst [vmem:[#allocation2 + $0x8c] sm:$0xf] %v2234_v37  ;;  %v2205_v31 = vld [vmem:[%s3108_s26 + $0x180] sm:$0xf] }
  0x76   : > { %v2514_v44 = vor.u32 %v2891_v29, %v2511_v30  ;;  %396 = vst [vmem:[#allocation2 + $0xa4] sm:$0xf] %v2203_v53  ;;  %v414_v33 = vld [vmem:[%s3108_s26 + $0x20] sm:$0xf]  ;;  %v2237_v53 = vld [vmem:[%s3108_s26 + $0xb0] sm:$0xf] }
  0x77   : > { %397 = vst [vmem:[#allocation2 + $0xc8] sm:$0xf] %v2204_v54  ;;  %v2303_v35 = vld [vmem:[#allocation2 + $0x7c] sm:$0xf0] }
  0x78   : > { %428 = vst [vmem:[#allocation2 + $0xa8] sm:$0xf] %v412_v55  ;;  %v2843_v37 = vld [vmem:[#allocation2 + $0x80] sm:$0xf0]  ;;  %v2238_v55 = vld [vmem:[%s3108_s26 + $0xb4] sm:$0xf] }
  0x79   : > { %429 = vst [vmem:[#allocation2 + $0xcc] sm:$0xf] %v413_v60 }
  0x7a   : > { %460 = vst [vmem:[#allocation2 + $0xac] sm:$0xf] %v2219_v63 }
  0x7b   : > { %1604 = vmatmul.bf16.gmra.mxu1 %v2362_v0  ;;  %1653 = vmatmul.bf16.gmra.mxu2 %v2366_v1  ;;  %v2882_v0 = vld [vmem:[#allocation2 + $0x1bc] sm:$0xf]  ;;  %v2475_v1 = vld [vmem:[#allocation2 + $0x1dc] sm:$0xf0]  ;;  %398 = vst [vmem:[#allocation2 + $0xec] sm:$0xf] %v2205_v31 }
  0x7c   : > { %v2478_v11 = vor.u32 %v2882_v0, %v2475_v1  ;;  %v2281_v0 = vld [vmem:[#allocation2 + $0x20] sm:$0xf]  ;;  %v2220_v1 = vld [vmem:[%s3108_s26 + $0x64] sm:$0xf]  ;;  %399 = vst [vmem:[#allocation2 + $0x110] sm:$0xf] %v2206_v32 }
  0x7d   : > { %1702 = vmatmul.bf16.gmra.mxu3 %v2370_v2  ;;  %1751 = vmatmul.bf16.gmra.mxu0 %v2374_v3  ;;  %v2215_v2 = vld [vmem:[%s3108_s26 + $0x50] sm:$0xf]  ;;  %v2481_v3 = vld [vmem:[#allocation2 + $0x1c0] sm:$0xf]  ;;  %461 = vst [vmem:[#allocation2 + $0xd0] sm:$0xf] %v2220_v1 }
  0x7e   : > { %456 = vst [vmem:[#allocation2 + $0x1c] sm:$0xf] %v2215_v2  ;;  %v2482_v12 = vor.u32 %v2887_v5, %v2481_v3  ;;  %v2835_v2 = vld [vmem:[#allocation2 + $0x40] sm:$0xf0]  ;;  %v2235_v3 = vld [vmem:[%s3108_s26 + $0xa8] sm:$0xf] }
  0x7f   : > { %v2236_v5 = vld [vmem:[%s3108_s26 + $0xac] sm:$0xf]  ;;  %v2282_v21 = vor.u32 %v2835_v2, %v2281_v0  ;;  %492 = vst [vmem:[#allocation2 + $0xb0] sm:$0xf] %v2235_v3  ;;  %v2224_v31 = vld [vmem:[%s3108_s26 + $0x74] sm:$0xf] }
  0x80   : > { %493 = vst [vmem:[#allocation2 + $0xd4] sm:$0xf] %v2236_v5 }
  0x81   : > { %430 = vst [vmem:[#allocation2 + $0xf0] sm:$0xf] %v414_v33  ;;  %v2239_v33 = vld [vmem:[%s3108_s26 + $0xb8] sm:$0xf] }
  0x82   : > { %494 = vst [vmem:[#allocation2 + $0xf8] sm:$0xf] %v2237_v53 }
  0x83   : > { %495 = vst [vmem:[#allocation2 + $0x11c] sm:$0xf] %v2238_v55 }
  0x84   : > { %465 = vst [vmem:[#allocation2 + $0x160] sm:$0xf] %v2224_v31 }
  0x85   : > { %v2830_v61 = vld [vmem:[#allocation2 + $0x1c] sm:$0xf]  ;;  %496 = vst [vmem:[#allocation2 + $0x140] sm:$0xf] %v2239_v33 }
  0x87   : > { %v2853_v32 = vld [vmem:[#allocation2 + $0xd0] sm:$0xf0] }
  0x8b   : > { %1609 = vmatmul.bf16.gmra.mxu1 %v2398_v24  ;;  %1658 = vmatmul.bf16.gmra.mxu2 %v2402_v25  ;;  %v2890_v24 = vld [vmem:[#allocation2 + $0x1fc] sm:$0xf]  ;;  %v2503_v25 = vld [vmem:[#allocation2 + $0x21c] sm:$0xf0] }
  0x8c   : > { %v2506_v40 = vor.u32 %v2890_v24, %v2503_v25 }
  0x8d   : > { %1707 = vmatmul.bf16.gmra.mxu3 %v2406_v26  ;;  %1756 = vmatmul.bf16.gmra.mxu0 %v2410_v27  ;;  %v2509_v26 = vld [vmem:[#allocation2 + $0x200] sm:$0xf]  ;;  %v2895_v27 = vld [vmem:[#allocation2 + $0x220] sm:$0xf0] }
  0x8e   : > { %v2510_v41 = vor.u32 %v2895_v27, %v2509_v26 }
  0x9b   : > { %1614 = vmatmul.bf16.gmra.mxu1 %v2434_v48  ;;  %1663 = vmatmul.bf16.gmra.mxu2 %v2438_v49 }
  0x9d   : > { %1712 = vmatmul.bf16.gmra.mxu3 %v2442_v50  ;;  %1761 = vmatmul.bf16.gmra.mxu0 %v2446_v51 }
  0xa8   : > { %v3405_v10 = vpop.f32.mrf.mxu1 }
  0xaa   : > { %v3407_v13 = vpop.f32.mrf.mxu0 }
  0xab   : > { %1619 = vmatmul.bf16.gmra.mxu1 %v2470_v8  ;;  %1668 = vmatmul.bf16.gmra.mxu2 %v2474_v9  ;;  %v1542_v6 = vadd.f32 %v3412_v14, %v3407_v13  ;;  %v2270_v9 = vor.u32 %v2829_v56, %v2267_v57 }
  0xad   : > { %1717 = vmatmul.bf16.gmra.mxu3 %v2478_v11  ;;  %1766 = vmatmul.bf16.gmra.mxu0 %v2482_v12  ;;  %v2274_v11 = vor.u32 %v2834_v59, %v2273_v58  ;;  %v2306_v59 = vor.u32 %v2838_v34, %v2303_v35  ;;  %v2240_v35 = vld [vmem:[%s3108_s26 + $0xbc] sm:$0xf] }
  0xae   : > { %v1561_v15 = vpop.f32.mrf.mxu2  ;;  %497 = vst [vmem:[#allocation2 + $0x164] sm:$0xf] %v2240_v35 }
  0xaf   : > { %v3415_v16 = vadd.f32 %v3412_v14, %v1561_v15 }
  0xb0   : > { %v1571_v17 = vpop.f32.mrf.mxu3  ;;  %v3420_v19 = vpop.f32.mrf.mxu1 }
  0xb1   : > { %v3418_v18 = vadd.f32 %v3412_v14, %v1571_v17  ;;  %v2278_v17 = vor.u32 %v2830_v61, %v2275_v62 }
  0xb2   : > { %v3422_v20 = vpop.f32.mrf.mxu0 }
  0xb3   : > { %v1544_v24 = vadd.f32 %v3412_v14, %v3422_v20  ;;  %v2839_v20 = vld [vmem:[#allocation2 + $0x64] sm:$0xf] }
  0xb6   : > { %v1563_v36 = vpop.f32.mrf.mxu2 }
  0xb7   : > { %v3433_v38 = vadd.f32 %v3412_v14, %v1563_v36  ;;  %v2309_v36 = vld [vmem:[#allocation2 + $0x60] sm:$0xf] }
  0xb8   : > { %v1573_v39 = vpop.f32.mrf.mxu3  ;;  %v3438_v43 = vpop.f32.mrf.mxu1  ;;  %v2310_v60 = vor.u32 %v2843_v37, %v2309_v36  ;;  %v1552_v36 = vadd.f32 %v3412_v14, %v3405_v10 }
  0xb9   : > { %v3436_v42 = vadd.f32 %v3412_v14, %v1573_v39  ;;  %v415_v39 = vld [vmem:[%s3108_s26 + $0x24] sm:$0xf] }
  0xba   : > { %v3440_v46 = vpop.f32.mrf.mxu0  ;;  %431 = vst [vmem:[#allocation2 + $0x114] sm:$0xf] %v415_v39 }
  0xbb   : > { %1624 = vmatmul.bf16.gmra.mxu1 %v2506_v40  ;;  %1673 = vmatmul.bf16.gmra.mxu2 %v2510_v41  ;;  %v2311_v40 = vld [vmem:[#allocation2 + $0x84] sm:$0xf0]  ;;  %v1547_v56 = vadd.f32 %v3412_v14, %v3440_v46 }
  0xbc   : > { %v2221_v41 = vld [vmem:[%s3108_s26 + $0x68] sm:$0xf]  ;;  %v2314_v62 = vor.u32 %v2839_v20, %v2311_v40 }
  0xbd   : > { %1722 = vmatmul.bf16.gmra.mxu3 %v2514_v44  ;;  %1771 = vmatmul.bf16.gmra.mxu0 %v2518_v45  ;;  %v2317_v45 = vld [vmem:[#allocation2 + $0x68] sm:$0xf]  ;;  %462 = vst [vmem:[#allocation2 + $0xf4] sm:$0xf] %v2221_v41 }
  0xbe   : > { %v1566_v47 = vpop.f32.mrf.mxu2 }
  0xbf   : > { %v3443_v48 = vadd.f32 %v3412_v14, %v1566_v47  ;;  %v2222_v47 = vld [vmem:[%s3108_s26 + $0x6c] sm:$0xf] }
  0xc0   : > { %v1576_v49 = vpop.f32.mrf.mxu3  ;;  %v3448_v51 = vpop.f32.mrf.mxu1  ;;  %463 = vst [vmem:[#allocation2 + $0x118] sm:$0xf] %v2222_v47 }
  0xc1   : > { %v3446_v50 = vadd.f32 %v3412_v14, %v1576_v49  ;;  %v2844_v49 = vld [vmem:[#allocation2 + $0x88] sm:$0xf0] }
  0xc2   : > { %v3450_v52 = vpop.f32.mrf.mxu0  ;;  %v2318_v63 = vor.u32 %v2844_v49, %v2317_v45 }
  0xc6   : > { %v1568_v4 = vpop.f32.mrf.mxu2 }
  0xc7   : > { %v3463_v7 = vadd.f32 %v3412_v14, %v1568_v4  ;;  %v1549_v4 = vadd.f32 %v3412_v14, %v3450_v52  ;;  %v2848_v52 = vld [vmem:[#allocation2 + $0xac] sm:$0xf] }
  0xc8   : > { %v1578_v8 = vpop.f32.mrf.mxu3  ;;  %v1590_v15 = vpop.f32.mrf.mxu1 }
  0xc9   : > { %v3466_v12 = vadd.f32 %v3412_v14, %v1578_v8  ;;  %v1591_v22 = vadd.f32 %v1590_v15, %v1542_v6 }
  0xca   : > { %v1737_v23 = vpop.f32.mrf.mxu0 }
  0xcb   : > { %1785 = vmatmul.bf16.vlgmr.msra.gmra.mxu1 %v2270_v9  ;;  %1834 = vmatmul.bf16.vlgmr.msra.gmra.mxu2 %v2274_v11 }
  0xcd   : > { %1883 = vmatmul.bf16.vlgmr.msra.gmra.mxu3 %v2278_v17  ;;  %1932 = vmatmul.bf16.vlgmr.msra.gmra.mxu0 %v2282_v21  ;;  %v2207_v17 = vld [vmem:[%s3108_s26 + $0x188] sm:$0xf]  ;;  %v2208_v21 = vld [vmem:[%s3108_s26 + $0x18c] sm:$0xf] }
  0xce   : > { %v1639_v13 = vpop.f32.mrf.mxu2  ;;  %400 = vst [vmem:[#allocation2 + $0x134] sm:$0xf] %v2207_v17  ;;  %v2226_v17 = vld [vmem:[%s3108_s26 + $0x7c] sm:$0xf] }
  0xcf   : > { %v1640_v25 = vadd.f32 %v1639_v13, %v1591_v22  ;;  %v416_v22 = vld [vmem:[%s3108_s26 + $0x28] sm:$0xf]  ;;  %401 = vst [vmem:[#allocation2 + $0x158] sm:$0xf] %v2208_v21  ;;  %v2862_v21 = vld [vmem:[#allocation2 + $0x118] sm:$0xf0] }
  0xd0   : > { %v1688_v26 = vpop.f32.mrf.mxu3  ;;  %v1592_v27 = vpop.f32.mrf.mxu1  ;;  %v2339_v13 = vld [vmem:[#allocation2 + $0xc4] sm:$0xf0]  ;;  %432 = vst [vmem:[#allocation2 + $0x138] sm:$0xf] %v416_v22  ;;  %v2241_v22 = vld [vmem:[%s3108_s26 + $0xc0] sm:$0xf] }
  0xd1   : > { %v1689_v28 = vadd.f32 %v1688_v26, %v1640_v25  ;;  %v1593_v29 = vadd.f32 %v1592_v27, %v1544_v24  ;;  %v2345_v24 = vld [vmem:[#allocation2 + $0xa8] sm:$0xf]  ;;  %v2852_v25 = vld [vmem:[#allocation2 + $0xc8] sm:$0xf0]  ;;  %v2347_v27 = vld [vmem:[#allocation2 + $0xcc] sm:$0xf0] }
  0xd2   : > { %v1739_v30 = vpop.f32.mrf.mxu0  ;;  %v417_v26 = vld [vmem:[%s3108_s26 + $0x2c] sm:$0xf]  ;;  %v2346_v40 = vor.u32 %v2852_v25, %v2345_v24  ;;  %v2350_v45 = vor.u32 %v2848_v52, %v2347_v27  ;;  %v1557_v24 = vadd.f32 %v3412_v14, %v3438_v43  ;;  %467 = vst [vmem:[#allocation2 + $0x1a8] sm:$0xf] %v2226_v17 }
  0xd3   : > { %v3475_v44 = vadd.f32 %v1737_v23, %v1689_v28  ;;  %v2847_v23 = vld [vmem:[#allocation2 + $0xa4] sm:$0xf]  ;;  %v2223_v28 = vld [vmem:[%s3108_s26 + $0x70] sm:$0xf]  ;;  %433 = vst [vmem:[#allocation2 + $0x15c] sm:$0xf] %v417_v26 }
  0xd4   : > { %464 = vst [vmem:[#allocation2 + $0x13c] sm:$0xf] %v2223_v28  ;;  %v2342_v20 = vor.u32 %v2847_v23, %v2339_v13  ;;  %v2242_v13 = vld [vmem:[%s3108_s26 + $0xc4] sm:$0xf] }
  0xd5   : > { %498 = vst [vmem:[#allocation2 + $0x188] sm:$0xf] %v2241_v22 }
  0xd6   : > { %v1641_v54 = vpop.f32.mrf.mxu2  ;;  %499 = vst [vmem:[#allocation2 + $0x1ac] sm:$0xf] %v2242_v13 }
  0xd7   : > { %v1642_v57 = vadd.f32 %v1641_v54, %v1593_v29 }
  0xd8   : > { %v1690_v58 = vpop.f32.mrf.mxu3  ;;  %v1595_v61 = vpop.f32.mrf.mxu1 }
  0xd9   : > { %v1691_v0 = vadd.f32 %v1690_v58, %v1642_v57  ;;  %v1596_v1 = vadd.f32 %v1595_v61, %v1547_v56  ;;  %v1554_v56 = vadd.f32 %v3412_v14, %v3420_v19  ;;  %v2857_v19 = vld [vmem:[#allocation2 + $0xf4] sm:$0xf] }
  0xda   : > { %v1742_v2 = vpop.f32.mrf.mxu0 }
  0xdb   : > { %1790 = vmatmul.bf16.gmra.mxu1 %v2306_v59  ;;  %1839 = vmatmul.bf16.gmra.mxu2 %v2310_v60  ;;  %v3482_v3 = vadd.f32 %v1739_v30, %v1691_v0  ;;  %v2353_v30 = vld [vmem:[#allocation2 + $0xb0] sm:$0xf]  ;;  %v2210_v0 = vld [vmem:[%s3108_s26 + $0x194] sm:$0xf] }
  0xdc   : > { %v2354_v47 = vor.u32 %v2853_v32, %v2353_v30  ;;  %403 = vst [vmem:[#allocation2 + $0x1a0] sm:$0xf] %v2210_v0  ;;  %v2243_v0 = vld [vmem:[%s3108_s26 + $0xc8] sm:$0xf] }
  0xdd   : > { %1888 = vmatmul.bf16.gmra.mxu3 %v2314_v62  ;;  %1937 = vmatmul.bf16.gmra.mxu0 %v2318_v63  ;;  %v2209_v63 = vld [vmem:[%s3108_s26 + $0x190] sm:$0xf]  ;;  %500 = vst [vmem:[#allocation2 + $0x1d0] sm:$0xf] %v2243_v0 }
  0xde   : > { %v1644_v46 = vpop.f32.mrf.mxu2  ;;  %402 = vst [vmem:[#allocation2 + $0x17c] sm:$0xf] %v2209_v63  ;;  %v2871_v63 = vld [vmem:[#allocation2 + $0x160] sm:$0xf0] }
  0xdf   : > { %v1645_v5 = vadd.f32 %v1644_v46, %v1596_v1  ;;  %v418_v1 = vld [vmem:[%s3108_s26 + $0x30] sm:$0xf] }
  0xe0   : > { %v1693_v6 = vpop.f32.mrf.mxu3  ;;  %v1597_v8 = vpop.f32.mrf.mxu1  ;;  %v2375_v46 = vld [vmem:[#allocation2 + $0x10c] sm:$0xf0]  ;;  %434 = vst [vmem:[#allocation2 + $0x180] sm:$0xf] %v418_v1 }
  0xe1   : > { %v1694_v9 = vadd.f32 %v1693_v6, %v1645_v5  ;;  %v1598_v11 = vadd.f32 %v1597_v8, %v1549_v4  ;;  %v2381_v4 = vld [vmem:[#allocation2 + $0xf0] sm:$0xf]  ;;  %v2861_v5 = vld [vmem:[#allocation2 + $0x110] sm:$0xf0]  ;;  %v2383_v8 = vld [vmem:[#allocation2 + $0x114] sm:$0xf0] }
  0xe2   : > { %v1744_v15 = vpop.f32.mrf.mxu0  ;;  %v419_v6 = vld [vmem:[%s3108_s26 + $0x34] sm:$0xf]  ;;  %v2382_v27 = vor.u32 %v2861_v5, %v2381_v4  ;;  %v2386_v30 = vor.u32 %v2857_v19, %v2383_v8 }
  0xe3   : > { %v3491_v29 = vadd.f32 %v1742_v2, %v1694_v9  ;;  %v2856_v2 = vld [vmem:[#allocation2 + $0xec] sm:$0xf]  ;;  %v2225_v9 = vld [vmem:[%s3108_s26 + $0x78] sm:$0xf]  ;;  %435 = vst [vmem:[#allocation2 + $0x1a4] sm:$0xf] %v419_v6 }
  0xe4   : > { %466 = vst [vmem:[#allocation2 + $0x184] sm:$0xf] %v2225_v9  ;;  %v2378_v52 = vor.u32 %v2856_v2, %v2375_v46  ;;  %v2244_v2 = vld [vmem:[%s3108_s26 + $0xcc] sm:$0xf] }
  0xe5   : > { %501 = vst [vmem:[#allocation2 + $0x1f4] sm:$0xf] %v2244_v2 }
  0xe6   : > { %v1646_v34 = vpop.f32.mrf.mxu2 }
  0xe7   : > { %v1647_v37 = vadd.f32 %v1646_v34, %v1598_v11 }
  0xe8   : > { %v1695_v39 = vpop.f32.mrf.mxu3  ;;  %v1600_v41 = vpop.f32.mrf.mxu1 }
  0xe9   : > { %v1696_v49 = vadd.f32 %v1695_v39, %v1647_v37  ;;  %v1601_v53 = vadd.f32 %v1600_v41, %v1552_v36  ;;  %v1559_v36 = vadd.f32 %v3412_v14, %v3448_v51  ;;  %v2866_v14 = vld [vmem:[#allocation2 + $0x13c] sm:$0xf]  ;;  %v2419_v51 = vld [vmem:[#allocation2 + $0x15c] sm:$0xf0] }
  0xea   : > { %v1747_v54 = vpop.f32.mrf.mxu0  ;;  %v2422_v8 = vor.u32 %v2866_v14, %v2419_v51 }
  0xeb   : > { %1795 = vmatmul.bf16.gmra.mxu1 %v2342_v20  ;;  %1844 = vmatmul.bf16.gmra.mxu2 %v2346_v40  ;;  %v3498_v55 = vadd.f32 %v1744_v15, %v1696_v49  ;;  %v2389_v15 = vld [vmem:[#allocation2 + $0xf8] sm:$0xf]  ;;  %v2212_v49 = vld [vmem:[%s3108_s26 + $0x19c] sm:$0xf] }
  0xec   : > { %v2390_v31 = vor.u32 %v2862_v21, %v2389_v15  ;;  %405 = vst [vmem:[#allocation2 + $0x1e8] sm:$0xf] %v2212_v49  ;;  %v2246_v49 = vld [vmem:[%s3108_s26 + $0xd4] sm:$0xf] }
  0xed   : > { %1893 = vmatmul.bf16.gmra.mxu3 %v2350_v45  ;;  %1942 = vmatmul.bf16.gmra.mxu0 %v2354_v47  ;;  %v2211_v47 = vld [vmem:[%s3108_s26 + $0x198] sm:$0xf]  ;;  %503 = vst [vmem:[#allocation2 + $0x23c] sm:$0xf] %v2246_v49 }
  0xee   : > { %v1649_v10 = vpop.f32.mrf.mxu2  ;;  %404 = vst [vmem:[#allocation2 + $0x1c4] sm:$0xf] %v2211_v47 }
  0xef   : > { %v1650_v57 = vadd.f32 %v1649_v10, %v1601_v53  ;;  %v420_v53 = vld [vmem:[%s3108_s26 + $0x38] sm:$0xf] }
  0xf0   : > { %v1698_v58 = vpop.f32.mrf.mxu3  ;;  %v1602_v59 = vpop.f32.mrf.mxu1  ;;  %v2411_v10 = vld [vmem:[#allocation2 + $0x154] sm:$0xf0]  ;;  %436 = vst [vmem:[#allocation2 + $0x1c8] sm:$0xf] %v420_v53 }
  0xf1   : > { %v1699_v60 = vadd.f32 %v1698_v58, %v1650_v57  ;;  %v1603_v61 = vadd.f32 %v1602_v59, %v1554_v56  ;;  %v2417_v56 = vld [vmem:[#allocation2 + $0x138] sm:$0xf]  ;;  %v2870_v57 = vld [vmem:[#allocation2 + $0x158] sm:$0xf0]  ;;  %v2227_v59 = vld [vmem:[%s3108_s26 + $0x80] sm:$0xf] }
  0xf2   : > { %v1749_v62 = vpop.f32.mrf.mxu0  ;;  %v421_v58 = vld [vmem:[%s3108_s26 + $0x3c] sm:$0xf]  ;;  %468 = vst [vmem:[#allocation2 + $0x1cc] sm:$0xf] %v2227_v59  ;;  %v2418_v6 = vor.u32 %v2870_v57, %v2417_v56 }
  0xf3   : > { %v3507_v11 = vadd.f32 %v1747_v54, %v1699_v60  ;;  %v2865_v54 = vld [vmem:[#allocation2 + $0x134] sm:$0xf]  ;;  %437 = vst [vmem:[#allocation2 + $0x1ec] sm:$0xf] %v421_v58 }
  0xf4   : > { %v2414_v5 = vor.u32 %v2865_v54, %v2411_v10 }
  0xf6   : > { %v1651_v23 = vpop.f32.mrf.mxu2 }
  0xf7   : > { %v1652_v25 = vadd.f32 %v1651_v23, %v1603_v61  ;;  %v2425_v61 = vld [vmem:[#allocation2 + $0x140] sm:$0xf] }
  0xf8   : > { %v1700_v26 = vpop.f32.mrf.mxu3  ;;  %v1605_v28 = vpop.f32.mrf.mxu1  ;;  %v2426_v9 = vor.u32 %v2871_v63, %v2425_v61 }
  0xf9   : > { %v1701_v32 = vadd.f32 %v1700_v26, %v1652_v25  ;;  %v1606_v33 = vadd.f32 %v1605_v28, %v1557_v24  ;;  %v2214_v28 = vld [vmem:[%s3108_s26 + $0x1a4] sm:$0xf] }
  0xfa   : > { %v1752_v34 = vpop.f32.mrf.mxu0  ;;  %407 = vst [vmem:[#allocation2 + $0x230] sm:$0xf] %v2214_v28 }
  0xfb   : > { %1800 = vmatmul.bf16.gmra.mxu1 %v2378_v52  ;;  %1849 = vmatmul.bf16.gmra.mxu2 %v2382_v27  ;;  %v3514_v35 = vadd.f32 %v1749_v62, %v1701_v32  ;;  %v2228_v62 = vld [vmem:[%s3108_s26 + $0x84] sm:$0xf]  ;;  %v2213_v27 = vld [vmem:[%s3108_s26 + $0x1a0] sm:$0xf] }
  0xfc   : > { %469 = vst [vmem:[#allocation2 + $0x1f0] sm:$0xf] %v2228_v62  ;;  %v2447_v32 = vld [vmem:[#allocation2 + $0x19c] sm:$0xf0] }
  0xfd   : > { %1898 = vmatmul.bf16.gmra.mxu3 %v2386_v30  ;;  %1947 = vmatmul.bf16.gmra.mxu0 %v2390_v31  ;;  %v422_v30 = vld [vmem:[%s3108_s26 + $0x40] sm:$0xf]  ;;  %v2874_v31 = vld [vmem:[#allocation2 + $0x17c] sm:$0xf]  ;;  %406 = vst [vmem:[#allocation2 + $0x20c] sm:$0xf] %v2213_v27 }
  0xfe   : > { %v1654_v43 = vpop.f32.mrf.mxu2  ;;  %438 = vst [vmem:[#allocation2 + $0x210] sm:$0xf] %v422_v30  ;;  %v2450_v10 = vor.u32 %v2874_v31, %v2447_v32 }
  0xff   : > { %v1655_v37 = vadd.f32 %v1654_v43, %v1606_v33  ;;  %v2453_v33 = vld [vmem:[#allocation2 + $0x180] sm:$0xf]  ;;  %v423_v43 = vld [vmem:[%s3108_s26 + $0x44] sm:$0xf] }
 0x100   : > { %v1703_v39 = vpop.f32.mrf.mxu3  ;;  %v1607_v20 = vpop.f32.mrf.mxu1  ;;  %439 = vst [vmem:[#allocation2 + $0x234] sm:$0xf] %v423_v43 }
 0x101   : > { %v1704_v40 = vadd.f32 %v1703_v39, %v1655_v37  ;;  %v1608_v41 = vadd.f32 %v1607_v20, %v1559_v36  ;;  %v2875_v36 = vld [vmem:[#allocation2 + $0x184] sm:$0xf]  ;;  %v2455_v37 = vld [vmem:[#allocation2 + $0x1a4] sm:$0xf0] }
 0x102   : > { %v1754_v45 = vpop.f32.mrf.mxu0  ;;  %v2229_v39 = vld [vmem:[%s3108_s26 + $0x88] sm:$0xf]  ;;  %v2458_v58 = vor.u32 %v2875_v36, %v2455_v37 }
 0x103   : > { %v3523_v60 = vadd.f32 %v1752_v34, %v1704_v40  ;;  %v2879_v34 = vld [vmem:[#allocation2 + $0x1a0] sm:$0xf0]  ;;  %v2230_v40 = vld [vmem:[%s3108_s26 + $0x8c] sm:$0xf]  ;;  %470 = vst [vmem:[#allocation2 + $0x214] sm:$0xf] %v2229_v39 }
 0x104   : > { %v2454_v56 = vor.u32 %v2879_v34, %v2453_v33  ;;  %471 = vst [vmem:[#allocation2 + $0x238] sm:$0xf] %v2230_v40  ;;  %v2892_v40 = vld [vmem:[#allocation2 + $0x20c] sm:$0xf] }
 0x106   : > { %v1656_v1 = vpop.f32.mrf.mxu2 }
 0x107   : > { %v1657_v46 = vadd.f32 %v1656_v1, %v1608_v41  ;;  %v2880_v41 = vld [vmem:[#allocation2 + $0x1a8] sm:$0xf0] }
 0x108   : > { %v1705_v4 = vpop.f32.mrf.mxu3  ;;  %v1610_v19 = vpop.f32.mrf.mxu1 }
 0x109   : > { %v1706_v15 = vadd.f32 %v1705_v4, %v1657_v46  ;;  %v1611_v17 = vadd.f32 %v1610_v19, %v3415_v16  ;;  %v2483_v19 = vld [vmem:[#allocation2 + $0x1e4] sm:$0xf0] }
 0x10a   : > { %v1757_v21 = vpop.f32.mrf.mxu0  ;;  %v2893_v49 = vld [vmem:[#allocation2 + $0x214] sm:$0xf] }
 0x10b   : > { %1805 = vmatmul.bf16.gmra.mxu1 %v2414_v5  ;;  %1854 = vmatmul.bf16.gmra.mxu2 %v2418_v6  ;;  %v3529_v22 = vadd.f32 %v1754_v45, %v1706_v15  ;;  %v2245_v45 = vld [vmem:[%s3108_s26 + $0xd0] sm:$0xf]  ;;  %v2883_v6 = vld [vmem:[#allocation2 + $0x1c4] sm:$0xf]  ;;  %v2884_v15 = vld [vmem:[#allocation2 + $0x1cc] sm:$0xf] }
 0x10c   : > { %502 = vst [vmem:[#allocation2 + $0x218] sm:$0xf] %v2245_v45  ;;  %s2825_s26 = sshll.u32 %s3623_s16, 7 }
 0x10d   : > { %1903 = vmatmul.bf16.gmra.mxu3 %v2422_v8  ;;  %1952 = vmatmul.bf16.gmra.mxu0 %v2426_v9  ;;  %v2888_v9 = vld [vmem:[#allocation2 + $0x1e8] sm:$0xf0]  ;;  %s3567_s5 = scalar_lea.vmem %s3620_s3, %s2825_s26 }
 0x10e   : > { %v1659_v23 = vpop.f32.mrf.mxu2 }
 0x10f   : > { %v1660_v13 = vadd.f32 %v1659_v23, %v1611_v17  ;;  %v2491_v17 = vld [vmem:[#allocation2 + $0x1ec] sm:$0xf0]  ;;  %v2889_v23 = vld [vmem:[#allocation2 + $0x1f0] sm:$0xf0] }
 0x110   : > { %v1708_v24 = vpop.f32.mrf.mxu3  ;;  %v1612_v25 = vpop.f32.mrf.mxu1  ;;  %v2494_v27 = vor.u32 %v2884_v15, %v2491_v17 }
 0x111   : > { %v1709_v26 = vadd.f32 %v1708_v24, %v1660_v13  ;;  %v1613_v52 = vadd.f32 %v1612_v25, %v3433_v38  ;;  %v2461_v38 = vld [vmem:[#allocation2 + $0x188] sm:$0xf] }
 0x112   : > { %v1759_v16 = vpop.f32.mrf.mxu0  ;;  %v2462_v14 = vor.u32 %v2880_v41, %v2461_v38  ;;  %v2519_v41 = vld [vmem:[#allocation2 + $0x22c] sm:$0xf0] }
 0x113   : > { %v3537_v20 = vadd.f32 %v1757_v21, %v1709_v26  ;;  %v2497_v21 = vld [vmem:[#allocation2 + $0x1d0] sm:$0xf]  ;;  %v2486_v26 = vor.u32 %v2883_v6, %v2483_v19 }
 0x114   : > { %v2498_v28 = vor.u32 %v2889_v23, %v2497_v21 }
 0x116   : > { %v1661_v47 = vpop.f32.mrf.mxu2 }
 0x117   : > { %v1662_v53 = vadd.f32 %v1661_v47, %v1613_v52  ;;  %v2897_v47 = vld [vmem:[#allocation2 + $0x230] sm:$0xf0] }
 0x118   : > { %v1710_v54 = vpop.f32.mrf.mxu3  ;;  %v1615_v57 = vpop.f32.mrf.mxu1 }
 0x119   : > { %v1711_v51 = vadd.f32 %v1710_v54, %v1662_v53  ;;  %v1616_v59 = vadd.f32 %v1615_v57, %v3443_v48  ;;  %v2489_v48 = vld [vmem:[#allocation2 + $0x1c8] sm:$0xf]  ;;  %v2527_v53 = vld [vmem:[#allocation2 + $0x234] sm:$0xf0] }
 0x11a   : > { %v1762_v61 = vpop.f32.mrf.mxu0  ;;  %v2490_v52 = vor.u32 %v2888_v9, %v2489_v48  ;;  %v2533_v54 = vld [vmem:[#allocation2 + $0x218] sm:$0xf] }
 0x11b   : > { %1810 = vmatmul.bf16.gmra.mxu1 %v2450_v10  ;;  %1859 = vmatmul.bf16.gmra.mxu2 %v2454_v56  ;;  %v3543_v62 = vadd.f32 %v1759_v16, %v1711_v51  ;;  %v2898_v10 = vld [vmem:[#allocation2 + $0x238] sm:$0xf0] }
 0x11d   : > { %1908 = vmatmul.bf16.gmra.mxu3 %v2458_v58  ;;  %1957 = vmatmul.bf16.gmra.mxu0 %v2462_v14  ;;  %v2522_v14 = vor.u32 %v2892_v40, %v2519_v41 }
 0x11e   : > { %v1664_v63 = vpop.f32.mrf.mxu2 }
 0x11f   : > { %v1665_v0 = vadd.f32 %v1664_v63, %v1616_v59  ;;  %v2534_v63 = vor.u32 %v2898_v10, %v2533_v54 }
 0x120   : > { %v1713_v1 = vpop.f32.mrf.mxu3  ;;  %v1617_v2 = vpop.f32.mrf.mxu1 }
 0x121   : > { %v1714_v46 = vadd.f32 %v1713_v1, %v1665_v0  ;;  %v1618_v4 = vadd.f32 %v1617_v2, %v3463_v7 }
 0x122   : > { %v1764_v5 = vpop.f32.mrf.mxu0 }
 0x123   : > { %v3546_v8 = vadd.f32 %v1762_v61, %v1714_v46  ;;  %v2530_v61 = vor.u32 %v2893_v49, %v2527_v53 }
 0x126   : > { %v1666_v13 = vpop.f32.mrf.mxu2 }
 0x127   : > { %v1667_v24 = vadd.f32 %v1666_v13, %v1618_v4 }
 0x128   : > { %v1715_v25 = vpop.f32.mrf.mxu3  ;;  %v1620_v16 = vpop.f32.mrf.mxu1 }
 0x129   : > { %v1716_v7 = vadd.f32 %v1715_v25, %v1667_v24  ;;  %v1621_v30 = vadd.f32 %v1620_v16, %v3418_v18  ;;  %v2525_v18 = vld [vmem:[#allocation2 + $0x210] sm:$0xf] }
 0x12a   : > { %v1767_v31 = vpop.f32.mrf.mxu0  ;;  %v2526_v51 = vor.u32 %v2897_v47, %v2525_v18 }
 0x12b   : > { %1815 = vmatmul.bf16.gmra.mxu1 %v2486_v26  ;;  %1864 = vmatmul.bf16.gmra.mxu2 %v2490_v52  ;;  %v3549_v32 = vadd.f32 %v1764_v5, %v1716_v7 }
 0x12d   : > { %1913 = vmatmul.bf16.gmra.mxu3 %v2494_v27  ;;  %1962 = vmatmul.bf16.gmra.mxu0 %v2498_v28 }
 0x12e   : > { %v1669_v33 = vpop.f32.mrf.mxu2 }
 0x12f   : > { %v1670_v34 = vadd.f32 %v1669_v33, %v1621_v30 }
 0x130   : > { %v1718_v43 = vpop.f32.mrf.mxu3  ;;  %v1622_v36 = vpop.f32.mrf.mxu1 }
 0x131   : > { %v1719_v37 = vadd.f32 %v1718_v43, %v1670_v34  ;;  %v1623_v39 = vadd.f32 %v1622_v36, %v3436_v42 }
 0x132   : > { %v1769_v38 = vpop.f32.mrf.mxu0 }
 0x133   : > { %v3552_v45 = vadd.f32 %v1767_v31, %v1719_v37 }
 0x136   : > { %v1671_v56 = vpop.f32.mrf.mxu2 }
 0x137   : > { %v1672_v57 = vadd.f32 %v1671_v56, %v1623_v39 }
 0x138   : > { %v1720_v58 = vpop.f32.mrf.mxu3  ;;  %v1625_v59 = vpop.f32.mrf.mxu1 }
 0x139   : > { %v1721_v42 = vadd.f32 %v1720_v58, %v1672_v57  ;;  %v1626_v0 = vadd.f32 %v1625_v59, %v3446_v50 }
 0x13a   : > { %v1772_v1 = vpop.f32.mrf.mxu0 }
 0x13b   : > { %1820 = vmatmul.bf16.gmra.mxu1 %v2522_v14  ;;  %1869 = vmatmul.bf16.gmra.mxu2 %v2526_v51  ;;  %v3555_v2 = vadd.f32 %v1769_v38, %v1721_v42 }
 0x13d   : > { %1918 = vmatmul.bf16.gmra.mxu3 %v2530_v61  ;;  %1967 = vmatmul.bf16.gmra.mxu0 %v2534_v63 }
 0x13e   : > { %v1674_v46 = vpop.f32.mrf.mxu2 }
 0x13f   : > { %v1675_v4 = vadd.f32 %v1674_v46, %v1626_v0 }
 0x140   : > { %v1723_v5 = vpop.f32.mrf.mxu3  ;;  %v1627_v6 = vpop.f32.mrf.mxu1 }
 0x141   : > { %v1724_v19 = vadd.f32 %v1723_v5, %v1675_v4  ;;  %v1628_v48 = vadd.f32 %v1627_v6, %v3466_v12 }
 0x142   : > { %v1774_v9 = vpop.f32.mrf.mxu0 }
 0x143   : > { %v3558_v15 = vadd.f32 %v1772_v1, %v1724_v19 }
 0x146   : > { %v1676_v17 = vpop.f32.mrf.mxu2 }
 0x147   : > { %v1677_v50 = vadd.f32 %v1676_v17, %v1628_v48 }
 0x148   : > { %v1725_v21 = vpop.f32.mrf.mxu3  ;;  %v1786_v23 = vpop.f32.mrf.mxu1 }
 0x149   : > { %v1726_v13 = vadd.f32 %v1725_v21, %v1677_v50  ;;  %v1787_v26 = vadd.f32 %v1786_v23, %v3475_v44 }
 0x14a   : > { %v1933_v24 = vpop.f32.mrf.mxu0 }
 0x14b   : > { %v3560_v25 = vadd.f32 %v1774_v9, %v1726_v13 }
 0x14e   : > { %v1835_v52 = vpop.f32.mrf.mxu2 }
 0x14f   : > { %v1836_v16 = vadd.f32 %v1835_v52, %v1787_v26 }
 0x150   : > { %v1884_v27 = vpop.f32.mrf.mxu3  ;;  %v1788_v28 = vpop.f32.mrf.mxu1 }
 0x151   : > { %v1885_v12 = vadd.f32 %v1884_v27, %v1836_v16  ;;  %v1789_v31 = vadd.f32 %v1788_v28, %v3482_v3 }
 0x152   : > { %v1935_v7 = vpop.f32.mrf.mxu0 }
 0x153   : > { %v1934_v30 = vadd.f32 %v1933_v24, %v1885_v12 }
 0x155   : > { %1973 = vst [vmem:[%s3567_s5] sm:$0xff] %v1934_v30  ;;  %v1989_v38 = vmax.f32 %v1934_v30, 0.0 }
 0x156   : > { %v1837_v44 = vpop.f32.mrf.mxu2 }
 0x157   : > { %v1838_v33 = vadd.f32 %v1837_v44, %v1789_v31 }
 0x158   : > { %v1886_v34 = vpop.f32.mrf.mxu3  ;;  %v1791_v43 = vpop.f32.mrf.mxu1 }
 0x159   : > { %v1887_v36 = vadd.f32 %v1886_v34, %v1838_v33  ;;  %v1792_v41 = vadd.f32 %v1791_v43, %v3491_v29 }
 0x15a   : > { %v1938_v37 = vpop.f32.mrf.mxu0 }
 0x15b   : > { %v1936_v39 = vadd.f32 %v1935_v7, %v1887_v36 }
 0x15d   : > { %1974 = vst [vmem:[%s3567_s5 + $0x8] sm:$0xff] %v1936_v39  ;;  %v1990_v40 = vmax.f32 %v1936_v39, 0.0 }
 0x15e   : > { %v1840_v3 = vpop.f32.mrf.mxu2 }
 0x15f   : > { %v2974_v18 = vpack.c.bf16 %v1990_v40, %v1989_v38  ;;  %v1841_v47 = vadd.f32 %v1840_v3, %v1792_v41 }
 0x160   : > { %v1889_v49 = vpop.f32.mrf.mxu3  ;;  %v1793_v53 = vpop.f32.mrf.mxu1 }
 0x161   : > { %2975 = vst [vmem:[%s3577_s9] sm:$0xff] %v2974_v18   ;;  %v1890_v54 = vadd.f32 %v1889_v49, %v1841_v47  ;;  %v1794_v57 = vadd.f32 %v1793_v53, %v3498_v55 }
 0x162   : > { %v1940_v10 = vpop.f32.mrf.mxu0 }
 0x163   : > { %v1939_v56 = vadd.f32 %v1938_v37, %v1890_v54 }
 0x165   : > { %1975 = vst [vmem:[%s3567_s5 + $0x10] sm:$0xff] %v1939_v56  ;;  %v1991_v42 = vmax.f32 %v1939_v56, 0.0 }
 0x166   : > { %v1842_v29 = vpop.f32.mrf.mxu2 }
 0x167   : > { %v1843_v58 = vadd.f32 %v1842_v29, %v1794_v57 }
 0x168   : > { %v1891_v14 = vpop.f32.mrf.mxu3  ;;  %v1796_v51 = vpop.f32.mrf.mxu1 }
 0x169   : > { %v1892_v59 = vadd.f32 %v1891_v14, %v1843_v58  ;;  %v1797_v1 = vadd.f32 %v1796_v51, %v3507_v11 }
 0x16a   : > { %v1943_v61 = vpop.f32.mrf.mxu0 }
 0x16b   : > { %v1941_v63 = vadd.f32 %v1940_v10, %v1892_v59 }
 0x16d   : > { %1976 = vst [vmem:[%s3567_s5 + $0x18] sm:$0xff] %v1941_v63  ;;  %v1992_v0 = vmax.f32 %v1941_v63, 0.0 }
 0x16e   : > { %v1845_v46 = vpop.f32.mrf.mxu2 }
 0x16f   : > { %v2979_v4 = vpack.c.bf16 %v1992_v0, %v1991_v42  ;;  %v1846_v5 = vadd.f32 %v1845_v46, %v1797_v1 }
 0x170   : > { %v1894_v6 = vpop.f32.mrf.mxu3  ;;  %v1798_v55 = vpop.f32.mrf.mxu1 }
 0x171   : > { %3011 = vst [vmem:[%s3577_s9 + $0x8] sm:$0xff] %v2979_v4   ;;  %v1895_v19 = vadd.f32 %v1894_v6, %v1846_v5  ;;  %v1799_v17 = vadd.f32 %v1798_v55, %v3514_v35 }
 0x172   : > { %v1945_v48 = vpop.f32.mrf.mxu0 }
 0x173   : > { %v1944_v9 = vadd.f32 %v1943_v61, %v1895_v19 }
 0x175   : > { %1977 = vst [vmem:[%s3567_s5 + $0x20] sm:$0xff] %v1944_v9  ;;  %v1993_v52 = vmax.f32 %v1944_v9, 0.0 }
 0x176   : > { %v1847_v50 = vpop.f32.mrf.mxu2 }
 0x177   : > { %v1848_v21 = vadd.f32 %v1847_v50, %v1799_v17 }
 0x178   : > { %v1896_v23 = vpop.f32.mrf.mxu3  ;;  %v1801_v13 = vpop.f32.mrf.mxu1 }
 0x179   : > { %v1897_v24 = vadd.f32 %v1896_v23, %v1848_v21  ;;  %v1802_v27 = vadd.f32 %v1801_v13, %v3523_v60 }
 0x17a   : > { %v1948_v11 = vpop.f32.mrf.mxu0 }
 0x17b   : > { %v1946_v26 = vadd.f32 %v1945_v48, %v1897_v24 }
 0x17d   : > { %1978 = vst [vmem:[%s3567_s5 + $0x28] sm:$0xff] %v1946_v26  ;;  %v1994_v16 = vmax.f32 %v1946_v26, 0.0 }
 0x17e   : > { %v1850_v28 = vpop.f32.mrf.mxu2 }
 0x17f   : > { %v2984_v12 = vpack.c.bf16 %v1994_v16, %v1993_v52  ;;  %v1851_v7 = vadd.f32 %v1850_v28, %v1802_v27 }
 0x180   : > { %v1899_v30 = vpop.f32.mrf.mxu3  ;;  %v1803_v35 = vpop.f32.mrf.mxu1 }
 0x181   : > { %3012 = vst [vmem:[%s3577_s9 + $0x10] sm:$0xff] %v2984_v12   ;;  %v1900_v31 = vadd.f32 %v1899_v30, %v1851_v7  ;;  %v1804_v34 = vadd.f32 %v1803_v35, %v3529_v22 }
 0x182   : > { %v1950_v44 = vpop.f32.mrf.mxu0 }
 0x183   : > { %v1949_v33 = vadd.f32 %v1948_v11, %v1900_v31 }
 0x185   : > { %1979 = vst [vmem:[%s3567_s5 + $0x30] sm:$0xff] %v1949_v33  ;;  %v1995_v41 = vmax.f32 %v1949_v33, 0.0 }
 0x186   : > { %v1852_v43 = vpop.f32.mrf.mxu2 }
 0x187   : > { %v1853_v36 = vadd.f32 %v1852_v43, %v1804_v34 }
 0x188   : > { %v1901_v37 = vpop.f32.mrf.mxu3  ;;  %v1806_v39 = vpop.f32.mrf.mxu1 }
 0x189   : > { %v1902_v38 = vadd.f32 %v1901_v37, %v1853_v36  ;;  %v1807_v18 = vadd.f32 %v1806_v39, %v3537_v20 }
 0x18a   : > { %v1953_v60 = vpop.f32.mrf.mxu0 }
 0x18b   : > { %v1951_v40 = vadd.f32 %v1950_v44, %v1902_v38 }
 0x18d   : > { %1980 = vst [vmem:[%s3567_s5 + $0x38] sm:$0xff] %v1951_v40  ;;  %v1996_v3 = vmax.f32 %v1951_v40, 0.0 }
 0x18e   : > { %v1855_v47 = vpop.f32.mrf.mxu2 }
 0x18f   : > { %v2989_v49 = vpack.c.bf16 %v1996_v3, %v1995_v41  ;;  %v1856_v53 = vadd.f32 %v1855_v47, %v1807_v18 }
 0x190   : > { %v1904_v54 = vpop.f32.mrf.mxu3  ;;  %v1808_v22 = vpop.f32.mrf.mxu1 }
 0x191   : > { %3013 = vst [vmem:[%s3577_s9 + $0x18] sm:$0xff] %v2989_v49   ;;  %v1905_v10 = vadd.f32 %v1904_v54, %v1856_v53  ;;  %v1809_v29 = vadd.f32 %v1808_v22, %v3543_v62 }
 0x192   : > { %v1955_v56 = vpop.f32.mrf.mxu0 }
 0x193   : > { %v1954_v57 = vadd.f32 %v1953_v60, %v1905_v10 }
 0x195   : > { %1981 = vst [vmem:[%s3567_s5 + $0x40] sm:$0xff] %v1954_v57  ;;  %v1997_v42 = vmax.f32 %v1954_v57, 0.0 }
 0x196   : > { %v1857_v58 = vpop.f32.mrf.mxu2 }
 0x197   : > { %v1858_v14 = vadd.f32 %v1857_v58, %v1809_v29 }
 0x198   : > { %v1906_v51 = vpop.f32.mrf.mxu3  ;;  %v1811_v59 = vpop.f32.mrf.mxu1 }
 0x199   : > { %v1907_v61 = vadd.f32 %v1906_v51, %v1858_v14  ;;  %v1812_v1 = vadd.f32 %v1811_v59, %v3546_v8 }
 0x19a   : > { %v1958_v20 = vpop.f32.mrf.mxu0 }
 0x19b   : > { %v1956_v63 = vadd.f32 %v1955_v56, %v1907_v61 }
 0x19d   : > { %1982 = vst [vmem:[%s3567_s5 + $0x48] sm:$0xff] %v1956_v63  ;;  %v1998_v0 = vmax.f32 %v1956_v63, 0.0 }
 0x19e   : > { %v1860_v46 = vpop.f32.mrf.mxu2 }
 0x19f   : > { %v2994_v4 = vpack.c.bf16 %v1998_v0, %v1997_v42  ;;  %v1861_v5 = vadd.f32 %v1860_v46, %v1812_v1 }
 0x1a0   : > { %v1909_v6 = vpop.f32.mrf.mxu3  ;;  %v1813_v62 = vpop.f32.mrf.mxu1 }
 0x1a1   : > { %3014 = vst [vmem:[%s3577_s9 + $0x20] sm:$0xff] %v2994_v4   ;;  %v1910_v55 = vadd.f32 %v1909_v6, %v1861_v5  ;;  %v1814_v9 = vadd.f32 %v1813_v62, %v3549_v32 }
 0x1a2   : > { %v1960_v19 = vpop.f32.mrf.mxu0 }
 0x1a3   : > { %v1959_v48 = vadd.f32 %v1958_v20, %v1910_v55 }
 0x1a5   : > { %1983 = vst [vmem:[%s3567_s5 + $0x50] sm:$0xff] %v1959_v48  ;;  %v1999_v11 = vmax.f32 %v1959_v48, 0.0 }
 0x1a6   : > { %v1862_v17 = vpop.f32.mrf.mxu2 }
 0x1a7   : > { %v1863_v50 = vadd.f32 %v1862_v17, %v1814_v9 }
 0x1a8   : > { %v1911_v21 = vpop.f32.mrf.mxu3  ;;  %v1816_v23 = vpop.f32.mrf.mxu1 }
 0x1a9   : > { %v1912_v8 = vadd.f32 %v1911_v21, %v1863_v50  ;;  %v1817_v52 = vadd.f32 %v1816_v23, %v3552_v45 }
 0x1aa   : > { %v1963_v24 = vpop.f32.mrf.mxu0 }
 0x1ab   : > { %v1961_v13 = vadd.f32 %v1960_v19, %v1912_v8 }
 0x1ad   : > { %1984 = vst [vmem:[%s3567_s5 + $0x58] sm:$0xff] %v1961_v13  ;;  %v2000_v26 = vmax.f32 %v1961_v13, 0.0 }
 0x1ae   : > { %v1865_v16 = vpop.f32.mrf.mxu2 }
 0x1af   : > { %v2999_v27 = vpack.c.bf16 %v2000_v26, %v1999_v11  ;;  %v1866_v28 = vadd.f32 %v1865_v16, %v1817_v52 }
 0x1b0   : > { %v1914_v12 = vpop.f32.mrf.mxu3  ;;  %v1818_v32 = vpop.f32.mrf.mxu1 }
 0x1b1   : > { %3015 = vst [vmem:[%s3577_s9 + $0x28] sm:$0xff] %v2999_v27   ;;  %v1915_v7 = vadd.f32 %v1914_v12, %v1866_v28  ;;  %v1819_v35 = vadd.f32 %v1818_v32, %v3555_v2 }
 0x1b2   : > { %v1965_v31 = vpop.f32.mrf.mxu0 }
 0x1b3   : > { %v1964_v30 = vadd.f32 %v1963_v24, %v1915_v7 }
 0x1b5   : > { %1985 = vst [vmem:[%s3567_s5 + $0x60] sm:$0xff] %v1964_v30  ;;  %v2001_v37 = vmax.f32 %v1964_v30, 0.0 }
 0x1b6   : > { %v1867_v44 = vpop.f32.mrf.mxu2 }
 0x1b7   : > { %v1868_v33 = vadd.f32 %v1867_v44, %v1819_v35 }
 0x1b8   : > { %v1916_v34 = vpop.f32.mrf.mxu3  ;;  %v1821_v43 = vpop.f32.mrf.mxu1 }
 0x1b9   : > { %v1917_v45 = vadd.f32 %v1916_v34, %v1868_v33  ;;  %v1822_v38 = vadd.f32 %v1821_v43, %v3558_v15 }
 0x1ba   : > { %v1968_v2 = vpop.f32.mrf.mxu0 }
 0x1bb   : > { %v1966_v36 = vadd.f32 %v1965_v31, %v1917_v45 }
 0x1bd   : > { %1986 = vst [vmem:[%s3567_s5 + $0x68] sm:$0xff] %v1966_v36  ;;  %v2002_v39 = vmax.f32 %v1966_v36, 0.0 }
 0x1be   : > { %v1870_v60 = vpop.f32.mrf.mxu2 }
 0x1bf   : > { %v3004_v40 = vpack.c.bf16 %v2002_v39, %v2001_v37  ;;  %v1871_v41 = vadd.f32 %v1870_v60, %v1822_v38 }
 0x1c0   : > { %v1919_v3 = vpop.f32.mrf.mxu3  ;;  %v1823_v47 = vpop.f32.mrf.mxu1 }
 0x1c1   : > { %3016 = vst [vmem:[%s3577_s9 + $0x30] sm:$0xff] %v3004_v40   ;;  %v1920_v18 = vadd.f32 %v1919_v3, %v1871_v41  ;;  %v1824_v53 = vadd.f32 %v1823_v47, %v3560_v25 }
 0x1c2   : > { %v1970_v57 = vpop.f32.mrf.mxu0 }
 0x1c3   : > { %v1969_v49 = vadd.f32 %v1968_v2, %v1920_v18 }
 0x1c5   : > { %1987 = vst [vmem:[%s3567_s5 + $0x70] sm:$0xff] %v1969_v49  ;;  %v2003_v29 = vmax.f32 %v1969_v49, 0.0 }
 0x1c6   : > { %v1872_v54 = vpop.f32.mrf.mxu2 }
 0x1c7   : > { %v1873_v22 = vadd.f32 %v1872_v54, %v1824_v53 }
 0x1c8   : > { %v1921_v10 = vpop.f32.mrf.mxu3 }
 0x1c9   : > { %v1922_v56 = vadd.f32 %v1921_v10, %v1873_v22 }
 0x1cb   : > { %v1971_v15 = vadd.f32 %v1970_v57, %v1922_v56 }
 0x1cd   : > { %1988 = vst [vmem:[%s3567_s5 + $0x78] sm:$0xff] %v1971_v15  ;;  %v2004_v58 = vmax.f32 %v1971_v15, 0.0 }
 0x1cf   : > { %v3009_v14 = vpack.c.bf16 %v2004_v58, %v2003_v29 }
 0x1d1   : > { %3017 = vst [vmem:[%s3577_s9 + $0x38] sm:$0xff] %v3009_v14  }
 0x1d2 PF: > { %s15_s15 = sadd.s32 1, %s3058_s15  }
 0x1d3   : > { %p12_p4 = scmp.ge.s32.totalorder %s15_s15, 4  }
 0x1d5   :  { %14 = sbr.rel (!%p12_p4) target bundleno = 1 (0x1), region = 79 }

</bundles_post_ra>
